<compile_context>
chip_gen: v6e
topology: v6e:2x2x1
jax: 0.10.0
libtpu: 0.0.40
codegen_flags: <defaults>
</compile_context>

<pallas_src>
import functools

import jax
import jax.numpy as jnp
from jax.experimental import pallas as pl
from jax.experimental.pallas import tpu as pltpu

LANE = 128
SUBLANE = 8


# ------------------------------ fused kernel ---------------------------------

def _bilstm_fused_kernel(text_ref,            # SMEM (T, B) int32
                         emb_wih_f_ref,       # VMEM (V, 8H): emb @ W_ih_l0_fwd (fused cols)
                         emb_wih_b_ref,       # VMEM (V, 8H): emb @ W_ih_l0_bwd (fused cols)
                         b0_ref,              # VMEM (1, 8H)
                         whh0_ref,            # VMEM (2H, 8H) block-diagonal
                         w1ff_ref, w1fb_ref,  # VMEM (H, 4H) each (layer-1 fwd, K-split)
                         whh1_ref, b1f_ref,   # VMEM (H, 4H), (1, 4H)
                         w1bf_ref, w1bb_ref, b1b_ref,   # layer-1 bwd (single step)
                         wfc_f_ref, wfc_b_ref, bfc_ref, # fc, K-split + lane-padded
                         out_ref,             # VMEM (Bp, Fp)
                         gx0_ref, h0f_ref, h0b_ref, gx1_ref,   # VMEM scratch
                         *, seq_len, batch, batch_p, hidden_dim):
    T, B, Bp, H = seq_len, batch, batch_p, hidden_dim
    f32 = jnp.float32
    dot = functools.partial(jnp.dot, preferred_element_type=f32)

    # ------- Embedding gather + hoisted layer-0 input projections -------
    # emb_wih_* rows already equal (embedding_row @ W_ih) in the fused,
    # gate-permuted, sigmoid-folded column layout, so the gather IS the
    # projection.  The backward direction reads time T-1-s, so tile s of the
    # slab is already time-reversed (no separate reverse/concat pass).
    b0 = b0_ref[...]                                              # (1, 8H)
    gx0_ref[...] = jnp.broadcast_to(b0, (T * Bp, 8 * H))          # covers padded rows
    for s in range(T):
        for b in range(B):
            vf = text_ref[s, b]
            vb = text_ref[T - 1 - s, b]
            gx0_ref[pl.ds(s * Bp + b, 1), :] = (
                emb_wih_f_ref[pl.ds(vf, 1), :]
                + emb_wih_b_ref[pl.ds(vb, 1), :] + b0)

    # ------- Layer 0: fused fwd+bwd recurrence -------
    # state layout h = [h_f | h_b] (Bp, 2H), c likewise; per-step gate layout
    # [i_f i_b | f_f f_b | g_f g_b | o_f o_b] (8H lanes), i/f/o pre-halved.
    whh0 = whh0_ref[...]                                          # (2H, 8H)
    h = jnp.zeros((Bp, 2 * H), f32)
    c = jnp.zeros((Bp, 2 * H), f32)
    for s in range(T):
        g = gx0_ref[s * Bp:(s + 1) * Bp, :] + dot(h, whh0)        # (Bp, 8H)
        t = jnp.tanh(g)                                           # all gates, both dirs
        i_g = 0.5 + 0.5 * t[:, 0:2 * H]                           # == sigmoid(full preact)
        f_g = 0.5 + 0.5 * t[:, 2 * H:4 * H]
        g_g = t[:, 4 * H:6 * H]
        o_g = 0.5 + 0.5 * t[:, 6 * H:8 * H]
        c = f_g * c + i_g * g_g
        h = o_g * jnp.tanh(c)
        h0f_ref[s * Bp:(s + 1) * Bp, :] = h[:, 0:H]               # fwd out @ time s
        h0b_ref[(T - 1 - s) * Bp:(T - s) * Bp, :] = h[:, H:2 * H] # bwd out @ time T-1-s

    # ------- Layer 1 forward (eval: inter-layer dropout == identity) -------
    # Hoisted input projection.  NOTE: no useful overlap with layer 0 exists:
    # layer-1 step 0 needs h0_bwd[t=0], which layer 0 produces on its LAST
    # step, so the hoisted form is already on the shortest serial chain.
    gx1_ref[...] = (dot(h0f_ref[...], w1ff_ref[...])
                    + dot(h0b_ref[...], w1fb_ref[...]) + b1f_ref[...])
    whh1 = whh1_ref[...]
    h1 = jnp.zeros((Bp, H), f32)
    c1 = jnp.zeros((Bp, H), f32)
    for s in range(T):
        g = gx1_ref[s * Bp:(s + 1) * Bp, :] + dot(h1, whh1)
        t = jnp.tanh(g)
        i_g = 0.5 + 0.5 * t[:, 0:H]
        f_g = 0.5 + 0.5 * t[:, H:2 * H]
        g_g = t[:, 2 * H:3 * H]
        o_g = 0.5 + 0.5 * t[:, 3 * H:4 * H]
        c1 = f_g * c1 + i_g * g_g
        h1 = o_g * jnp.tanh(c1)

    # ------- Layer 1 backward: only its step at t = T-1 feeds fc(output[-1]).
    # Valid ONLY because the initial (h, c) are zero and only output[-1] is
    # consumed: the h @ W_hh_l1_reverse and f*c terms vanish identically.
    h0f_last = h0f_ref[(T - 1) * Bp:T * Bp, :]
    h0b_last = h0b_ref[(T - 1) * Bp:T * Bp, :]
    g = (dot(h0f_last, w1bf_ref[...]) + dot(h0b_last, w1bb_ref[...])
         + b1b_ref[...])
    t = jnp.tanh(g)
    i_g = 0.5 + 0.5 * t[:, 0:H]
    g_g = t[:, 2 * H:3 * H]
    o_g = 0.5 + 0.5 * t[:, 3 * H:4 * H]
    h1b = o_g * jnp.tanh(i_g * g_g)

    # ------- fc(output[-1]); K-split weights avoid a lane concat -------
    out_ref[...] = (dot(h1, wfc_f_ref[...]) + dot(h1b, wfc_b_ref[...])
                    + bfc_ref[...])


# --------------------------- one-time weight prep -----------------------------

def prepare_params(params, *, hidden_dim, output_dim):
    """One-time (outside jit) weight massaging: direction fusion, block-diag
    W_hh, gate-column permutation, sigmoid->tanh 0.5 folding, embedding
    pre-multiplication, fc splitting + lane padding."""
    H = hidden_dim

    def gate_blocks(w):
        # PyTorch gate order (i, f, g, o); fold sigmoid(x)=0.5*(1+tanh(x/2))
        # by halving the i/f/o columns (g stays a plain tanh).
        i, f, g, o = (w[..., 0:H], w[..., H:2 * H],
                      w[..., 2 * H:3 * H], w[..., 3 * H:4 * H])
        return 0.5 * i, 0.5 * f, g, 0.5 * o

    def fuse_cols(w, d_off):
        # place gate blocks into the fused 8H layout [i_f i_b|f_f f_b|g_f g_b|o_f o_b]
        out = jnp.zeros(w.shape[:-1] + (8 * H,), jnp.float32)
        for gi, blk in enumerate(gate_blocks(w)):
            c0 = gi * 2 * H + d_off
            out = out.at[..., c0:c0 + H].set(blk)
        return out

    def scale_cols(w):                      # keep [i f g o] layout, i/f/o halved
        return jnp.concatenate(gate_blocks(w), axis=-1)

    (wih0f, whh0f, b0f), (wih0b, whh0b, b0b) = params["lstm"][0]
    (wih1f, whh1f, b1f), (wih1b, _whh1b, b1b) = params["lstm"][1]
    # _whh1b (W_hh of layer-1 reverse) provably cannot influence fc(output[-1]).

    emb = params["embedding"]                                   # (V, E)
    hp = jax.lax.Precision.HIGHEST
    emb_wih_f = jnp.dot(emb, fuse_cols(wih0f, 0), precision=hp)  # (V, 8H)
    emb_wih_b = jnp.dot(emb, fuse_cols(wih0b, H), precision=hp)
    b0 = fuse_cols(b0f, 0) + fuse_cols(b0b, H)                   # (1, 8H)

    whh0_bd = jnp.zeros((2 * H, 8 * H), jnp.float32)
    whh0_bd = whh0_bd.at[0:H, :].set(fuse_cols(whh0f, 0))
    whh0_bd = whh0_bd.at[H:2 * H, :].set(fuse_cols(whh0b, H))

    Fp = ((output_dim + LANE - 1) // LANE) * LANE
    wfc = params["fc_w_t"]
    return dict(
        emb_wih_f=emb_wih_f, emb_wih_b=emb_wih_b, b0=b0, whh0_bd=whh0_bd,
        w1ff=scale_cols(wih1f[0:H, :]), w1fb=scale_cols(wih1f[H:2 * H, :]),
        whh1=scale_cols(whh1f), b1f=scale_cols(b1f),
        w1bf=scale_cols(wih1b[0:H, :]), w1bb=scale_cols(wih1b[H:2 * H, :]),
        b1b=scale_cols(b1b),
        wfc_f=jnp.pad(wfc[0:H, :], ((0, 0), (0, Fp - output_dim))),
        wfc_b=jnp.pad(wfc[H:2 * H, :], ((0, 0), (0, Fp - output_dim))),
        bfc=jnp.pad(params["fc_b"], ((0, 0), (0, Fp - output_dim))),
    )


# --------------------------------- wrapper ------------------------------------

def bilstm_forward(prepared, text, *, hidden_dim, output_dim):
    """text: (T, B) int32  ->  (B, output_dim) float32 (eval-mode forward)."""
    T, B = text.shape
    H = hidden_dim
    Bp = ((B + SUBLANE - 1) // SUBLANE) * SUBLANE
    Fp = prepared["wfc_f"].shape[1]

    kernel = functools.partial(_bilstm_fused_kernel, seq_len=T, batch=B,
                               batch_p=Bp, hidden_dim=H)
    vmem = pl.BlockSpec(memory_space=pltpu.MemorySpace.VMEM)
    smem = pl.BlockSpec(memory_space=pltpu.MemorySpace.SMEM)
    args = (text,
            prepared["emb_wih_f"], prepared["emb_wih_b"], prepared["b0"],
            prepared["whh0_bd"],
            prepared["w1ff"], prepared["w1fb"], prepared["whh1"], prepared["b1f"],
            prepared["w1bf"], prepared["w1bb"], prepared["b1b"],
            prepared["wfc_f"], prepared["wfc_b"], prepared["bfc"])

    flops = int(
        T * 2 * Bp * (2 * H) * (8 * H)               # layer-0 fused recurrence
        + 2 * 2 * (T * Bp) * H * (4 * H)             # layer-1 input projection
        + T * 2 * Bp * H * (4 * H)                   # layer-1 fwd recurrence
        + 2 * 2 * Bp * H * (4 * H)                   # layer-1 bwd single step
        + 2 * 2 * Bp * H * Fp)                       # fc
    transcendentals = int(T * Bp * (8 * H + 2 * H) + T * Bp * (4 * H + H)
                          + Bp * (4 * H + H))
    bytes_accessed = int(sum(a.size * a.dtype.itemsize for a in args)
                         + Bp * Fp * 4)

    out_p = pl.pallas_call(
        kernel,
        out_shape=jax.ShapeDtypeStruct((Bp, Fp), jnp.float32),
        in_specs=[smem] + [vmem] * (len(args) - 1),
        out_specs=vmem,
        scratch_shapes=[
            pltpu.VMEM((T * Bp, 8 * H), jnp.float32),   # fused layer-0 gate slab
            pltpu.VMEM((T * Bp, H), jnp.float32),       # layer-0 fwd output sequence
            pltpu.VMEM((T * Bp, H), jnp.float32),       # layer-0 bwd output sequence
            pltpu.VMEM((T * Bp, 4 * H), jnp.float32),   # layer-1 fwd gate slab
        ],
        cost_estimate=pl.CostEstimate(flops=flops,
                                      transcendentals=transcendentals,
                                      bytes_accessed=bytes_accessed),
    )(*args)
    return out_p[:B, :output_dim]


# ----------------------------- pure-JAX reference -----------------------------

def reference_forward(params, text, *, hidden_dim):
    H = hidden_dim
    emb = jnp.take(params["embedding"], text, axis=0)           # (T, B, E)

    def run_dir(xs, w_ih_t, w_hh_t, b):
        Bsz = xs.shape[1]

        def step(carry, x):
            h, c = carry
            g = x @ w_ih_t + h @ w_hh_t + b
            i = jax.nn.sigmoid(g[:, 0:H])
            f = jax.nn.sigmoid(g[:, H:2 * H])
            gg = jnp.tanh(g[:, 2 * H:3 * H])
            o = jax.nn.sigmoid(g[:, 3 * H:4 * H])
            c = f * c + i * gg
            h = o * jnp.tanh(c)
            return (h, c), h

        init = (jnp.zeros((Bsz, H), jnp.float32), jnp.zeros((Bsz, H), jnp.float32))
        _, ys = jax.lax.scan(step, init, xs)
        return ys

    (w0f, u0f, b0f), (w0b, u0b, b0b) = params["lstm"][0]
    (w1f, u1f, b1f), (w1b, u1b, b1b) = params["lstm"][1]
    y0f = run_dir(emb, w0f, u0f, b0f)
    y0b = run_dir(emb[::-1], w0b, u0b, b0b)[::-1]
    h0 = jnp.concatenate([y0f, y0b], axis=-1)
    y1f = run_dir(h0, w1f, u1f, b1f)
    y1b = run_dir(h0[::-1], w1b, u1b, b1b)[::-1]
    last = jnp.concatenate([y1f[-1], y1b[-1]], axis=-1)
    return last @ params["fc_w_t"] + params["fc_b"]


# ------------------------------ parameter init --------------------------------

def init_params(key, input_dim, embedding_dim, hidden_dim, output_dim):
    """Synthetic params, shapes matching the PyTorch module (weights stored
    transposed; per-direction bias = b_ih + b_hh, shape (1, 4H))."""
    keys = jax.random.split(key, 32)
    k_iter = iter(keys)
    scale = 1.0 / jnp.sqrt(hidden_dim)

    def u(k, shape):
        return jax.random.uniform(k, shape, jnp.float32, -scale, scale)

    params = {}
    params["embedding"] = jax.random.normal(
        next(k_iter), (input_dim, embedding_dim), jnp.float32) * 0.1

    lstm = []
    for layer in range(2):
        in_dim = embedding_dim if layer == 0 else 2 * hidden_dim
        directions = []
        for _ in range(2):  # forward, backward
            w_ih_t = u(next(k_iter), (in_dim, 4 * hidden_dim))
            w_hh_t = u(next(k_iter), (hidden_dim, 4 * hidden_dim))
            b_ih = u(next(k_iter), (1, 4 * hidden_dim))
            b_hh = u(next(k_iter), (1, 4 * hidden_dim))
            directions.append((w_ih_t, w_hh_t, b_ih + b_hh))
        lstm.append(tuple(directions))
    params["lstm"] = lstm

    fc_scale = 1.0 / jnp.sqrt(2 * hidden_dim)
    params["fc_w_t"] = jax.random.uniform(
        next(k_iter), (2 * hidden_dim, output_dim), jnp.float32,
        -fc_scale, fc_scale)
    params["fc_b"] = jax.random.uniform(
        next(k_iter), (1, output_dim), jnp.float32, -fc_scale, fc_scale)
    return params


# ------------------------------------ main ------------------------------------

if __name__ == "__main__":
    INPUT_DIM = 50        # vocab size
    EMBEDDING_DIM = 32
    HIDDEN_DIM = 32
    OUTPUT_DIM = 8
    SEQ_LEN = 8
    BATCH = 4

    key = jax.random.PRNGKey(0)
    k_param, k_text = jax.random.split(key)

    params = init_params(k_param, INPUT_DIM, EMBEDDING_DIM, HIDDEN_DIM,
                         OUTPUT_DIM)
    text = jax.random.randint(k_text, (SEQ_LEN, BATCH), 0, INPUT_DIM,
                              dtype=jnp.int32)

    prepared = prepare_params(params, hidden_dim=HIDDEN_DIM,
                              output_dim=OUTPUT_DIM)   # one-time, outside jit
    fwd = jax.jit(functools.partial(bilstm_forward, hidden_dim=HIDDEN_DIM,
                                    output_dim=OUTPUT_DIM))
    out = jax.block_until_ready(fwd(prepared, text))

    assert out.shape == (BATCH, OUTPUT_DIM), out.shape
    assert out.dtype == jnp.float32
    assert bool(jnp.all(jnp.isfinite(out)))

    with jax.default_matmul_precision("highest"):
        ref = reference_forward(params, text, hidden_dim=HIDDEN_DIM)
    assert bool(jnp.allclose(out, ref, atol=5e-2, rtol=5e-2)), (
        float(jnp.max(jnp.abs(out - ref))))

    print("KERNEL_OK")
</pallas_src>

<mosaic_0001>
module attributes {stable_mosaic.version = 11 : i64} {
  func.func @_bilstm_fused_kernel(%arg0: memref<8x4xi32, #tpu.memory_space<smem>>, %arg1: memref<50x256xf32, #tpu.memory_space<vmem>>, %arg2: memref<50x256xf32, #tpu.memory_space<vmem>>, %arg3: memref<1x256xf32, #tpu.memory_space<vmem>>, %arg4: memref<64x256xf32, #tpu.memory_space<vmem>>, %arg5: memref<32x128xf32, #tpu.memory_space<vmem>>, %arg6: memref<32x128xf32, #tpu.memory_space<vmem>>, %arg7: memref<32x128xf32, #tpu.memory_space<vmem>>, %arg8: memref<1x128xf32, #tpu.memory_space<vmem>>, %arg9: memref<32x128xf32, #tpu.memory_space<vmem>>, %arg10: memref<32x128xf32, #tpu.memory_space<vmem>>, %arg11: memref<1x128xf32, #tpu.memory_space<vmem>>, %arg12: memref<32x128xf32, #tpu.memory_space<vmem>>, %arg13: memref<32x128xf32, #tpu.memory_space<vmem>>, %arg14: memref<1x128xf32, #tpu.memory_space<vmem>>, %arg15: memref<8x128xf32, #tpu.memory_space<vmem>>, %arg16: memref<64x256xf32, #tpu.memory_space<vmem>>, %arg17: memref<64x32xf32, #tpu.memory_space<vmem>>, %arg18: memref<64x32xf32, #tpu.memory_space<vmem>>, %arg19: memref<64x128xf32, #tpu.memory_space<vmem>>) attributes {dimension_semantics = [], scalar_prefetch = 0 : i64, scratch_operands = 4 : i64, tpu.core_type = #tpu.core_type<tc>} {
    %c0 = arith.constant 0 : index
    %c0_0 = arith.constant 0 : index
    %0 = vector.load %arg3[%c0, %c0_0] : memref<1x256xf32, #tpu.memory_space<vmem>>, vector<1x256xf32>
    %1 = vector.shape_cast %0 : vector<1x256xf32> to vector<1x256xf32>
    %2 = vector.broadcast %1 : vector<1x256xf32> to vector<64x256xf32>
    %c0_1 = arith.constant 0 : index
    %c0_2 = arith.constant 0 : index
    %3 = vector.load %arg16[%c0_1, %c0_2] : memref<64x256xf32, #tpu.memory_space<vmem>>, vector<64x256xf32>
    tpu.vector_store %arg16[%c0_1, %c0_2], %2 {strides = array<i32>} : memref<64x256xf32, #tpu.memory_space<vmem>>, vector<64x256xf32>,
    %c0_3 = arith.constant 0 : index
    %c0_4 = arith.constant 0 : index
    %4 = memref.load %arg0[%c0_3, %c0_4] : memref<8x4xi32, #tpu.memory_space<smem>>
    %c7 = arith.constant 7 : index
    %c0_5 = arith.constant 0 : index
    %5 = memref.load %arg0[%c7, %c0_5] : memref<8x4xi32, #tpu.memory_space<smem>>
    %6 = arith.index_cast %4 : i32 to index
    %c0_6 = arith.constant 0 : index
    %7 = vector.load %arg1[%6, %c0_6] : memref<50x256xf32, #tpu.memory_space<vmem>>, vector<1x256xf32>
    %8 = arith.index_cast %5 : i32 to index
    %c0_7 = arith.constant 0 : index
    %9 = vector.load %arg2[%8, %c0_7] : memref<50x256xf32, #tpu.memory_space<vmem>>, vector<1x256xf32>
    %10 = arith.addf %7, %9 : vector<1x256xf32>
    %11 = arith.addf %10, %0 : vector<1x256xf32>
    %c0_8 = arith.constant 0 : index
    %c0_9 = arith.constant 0 : index
    %12 = vector.load %arg16[%c0_8, %c0_9] : memref<64x256xf32, #tpu.memory_space<vmem>>, vector<1x256xf32>
    tpu.vector_store %arg16[%c0_8, %c0_9], %11 {strides = array<i32>} : memref<64x256xf32, #tpu.memory_space<vmem>>, vector<1x256xf32>,
    %c0_10 = arith.constant 0 : index
    %c1 = arith.constant 1 : index
    %13 = memref.load %arg0[%c0_10, %c1] : memref<8x4xi32, #tpu.memory_space<smem>>
    %c7_11 = arith.constant 7 : index
    %c1_12 = arith.constant 1 : index
    %14 = memref.load %arg0[%c7_11, %c1_12] : memref<8x4xi32, #tpu.memory_space<smem>>
    %15 = arith.index_cast %13 : i32 to index
    %c0_13 = arith.constant 0 : index
    %16 = vector.load %arg1[%15, %c0_13] : memref<50x256xf32, #tpu.memory_space<vmem>>, vector<1x256xf32>
    %17 = arith.index_cast %14 : i32 to index
    %c0_14 = arith.constant 0 : index
    %18 = vector.load %arg2[%17, %c0_14] : memref<50x256xf32, #tpu.memory_space<vmem>>, vector<1x256xf32>
    %19 = arith.addf %16, %18 : vector<1x256xf32>
    %20 = arith.addf %19, %0 : vector<1x256xf32>
    %c1_15 = arith.constant 1 : index
    %c0_16 = arith.constant 0 : index
    %21 = vector.load %arg16[%c1_15, %c0_16] : memref<64x256xf32, #tpu.memory_space<vmem>>, vector<1x256xf32>
    tpu.vector_store %arg16[%c1_15, %c0_16], %20 {strides = array<i32>} : memref<64x256xf32, #tpu.memory_space<vmem>>, vector<1x256xf32>,
    %c0_17 = arith.constant 0 : index
    %c2 = arith.constant 2 : index
    %22 = memref.load %arg0[%c0_17, %c2] : memref<8x4xi32, #tpu.memory_space<smem>>
    %c7_18 = arith.constant 7 : index
    %c2_19 = arith.constant 2 : index
    %23 = memref.load %arg0[%c7_18, %c2_19] : memref<8x4xi32, #tpu.memory_space<smem>>
    %24 = arith.index_cast %22 : i32 to index
    %c0_20 = arith.constant 0 : index
    %25 = vector.load %arg1[%24, %c0_20] : memref<50x256xf32, #tpu.memory_space<vmem>>, vector<1x256xf32>
    %26 = arith.index_cast %23 : i32 to index
    %c0_21 = arith.constant 0 : index
    %27 = vector.load %arg2[%26, %c0_21] : memref<50x256xf32, #tpu.memory_space<vmem>>, vector<1x256xf32>
    %28 = arith.addf %25, %27 : vector<1x256xf32>
    %29 = arith.addf %28, %0 : vector<1x256xf32>
    %c2_22 = arith.constant 2 : index
    %c0_23 = arith.constant 0 : index
    %30 = vector.load %arg16[%c2_22, %c0_23] : memref<64x256xf32, #tpu.memory_space<vmem>>, vector<1x256xf32>
    tpu.vector_store %arg16[%c2_22, %c0_23], %29 {strides = array<i32>} : memref<64x256xf32, #tpu.memory_space<vmem>>, vector<1x256xf32>,
    %c0_24 = arith.constant 0 : index
    %c3 = arith.constant 3 : index
    %31 = memref.load %arg0[%c0_24, %c3] : memref<8x4xi32, #tpu.memory_space<smem>>
    %c7_25 = arith.constant 7 : index
    %c3_26 = arith.constant 3 : index
    %32 = memref.load %arg0[%c7_25, %c3_26] : memref<8x4xi32, #tpu.memory_space<smem>>
    %33 = arith.index_cast %31 : i32 to index
    %c0_27 = arith.constant 0 : index
    %34 = vector.load %arg1[%33, %c0_27] : memref<50x256xf32, #tpu.memory_space<vmem>>, vector<1x256xf32>
    %35 = arith.index_cast %32 : i32 to index
    %c0_28 = arith.constant 0 : index
    %36 = vector.load %arg2[%35, %c0_28] : memref<50x256xf32, #tpu.memory_space<vmem>>, vector<1x256xf32>
    %37 = arith.addf %34, %36 : vector<1x256xf32>
    %38 = arith.addf %37, %0 : vector<1x256xf32>
    %c3_29 = arith.constant 3 : index
    %c0_30 = arith.constant 0 : index
    %39 = vector.load %arg16[%c3_29, %c0_30] : memref<64x256xf32, #tpu.memory_space<vmem>>, vector<1x256xf32>
    tpu.vector_store %arg16[%c3_29, %c0_30], %38 {strides = array<i32>} : memref<64x256xf32, #tpu.memory_space<vmem>>, vector<1x256xf32>,
    %c1_31 = arith.constant 1 : index
    %c0_32 = arith.constant 0 : index
    %40 = memref.load %arg0[%c1_31, %c0_32] : memref<8x4xi32, #tpu.memory_space<smem>>
    %c6 = arith.constant 6 : index
    %c0_33 = arith.constant 0 : index
    %41 = memref.load %arg0[%c6, %c0_33] : memref<8x4xi32, #tpu.memory_space<smem>>
    %42 = arith.index_cast %40 : i32 to index
    %c0_34 = arith.constant 0 : index
    %43 = vector.load %arg1[%42, %c0_34] : memref<50x256xf32, #tpu.memory_space<vmem>>, vector<1x256xf32>
    %44 = arith.index_cast %41 : i32 to index
    %c0_35 = arith.constant 0 : index
    %45 = vector.load %arg2[%44, %c0_35] : memref<50x256xf32, #tpu.memory_space<vmem>>, vector<1x256xf32>
    %46 = arith.addf %43, %45 : vector<1x256xf32>
    %47 = arith.addf %46, %0 : vector<1x256xf32>
    %c8 = arith.constant 8 : index
    %c0_36 = arith.constant 0 : index
    %48 = vector.load %arg16[%c8, %c0_36] : memref<64x256xf32, #tpu.memory_space<vmem>>, vector<1x256xf32>
    tpu.vector_store %arg16[%c8, %c0_36], %47 {strides = array<i32>} : memref<64x256xf32, #tpu.memory_space<vmem>>, vector<1x256xf32>,
    %c1_37 = arith.constant 1 : index
    %c1_38 = arith.constant 1 : index
    %49 = memref.load %arg0[%c1_37, %c1_38] : memref<8x4xi32, #tpu.memory_space<smem>>
    %c6_39 = arith.constant 6 : index
    %c1_40 = arith.constant 1 : index
    %50 = memref.load %arg0[%c6_39, %c1_40] : memref<8x4xi32, #tpu.memory_space<smem>>
    %51 = arith.index_cast %49 : i32 to index
    %c0_41 = arith.constant 0 : index
    %52 = vector.load %arg1[%51, %c0_41] : memref<50x256xf32, #tpu.memory_space<vmem>>, vector<1x256xf32>
    %53 = arith.index_cast %50 : i32 to index
    %c0_42 = arith.constant 0 : index
    %54 = vector.load %arg2[%53, %c0_42] : memref<50x256xf32, #tpu.memory_space<vmem>>, vector<1x256xf32>
    %55 = arith.addf %52, %54 : vector<1x256xf32>
    %56 = arith.addf %55, %0 : vector<1x256xf32>
    %c9 = arith.constant 9 : index
    %c0_43 = arith.constant 0 : index
    %57 = vector.load %arg16[%c9, %c0_43] : memref<64x256xf32, #tpu.memory_space<vmem>>, vector<1x256xf32>
    tpu.vector_store %arg16[%c9, %c0_43], %56 {strides = array<i32>} : memref<64x256xf32, #tpu.memory_space<vmem>>, vector<1x256xf32>,
    %c1_44 = arith.constant 1 : index
    %c2_45 = arith.constant 2 : index
    %58 = memref.load %arg0[%c1_44, %c2_45] : memref<8x4xi32, #tpu.memory_space<smem>>
    %c6_46 = arith.constant 6 : index
    %c2_47 = arith.constant 2 : index
    %59 = memref.load %arg0[%c6_46, %c2_47] : memref<8x4xi32, #tpu.memory_space<smem>>
    %60 = arith.index_cast %58 : i32 to index
    %c0_48 = arith.constant 0 : index
    %61 = vector.load %arg1[%60, %c0_48] : memref<50x256xf32, #tpu.memory_space<vmem>>, vector<1x256xf32>
    %62 = arith.index_cast %59 : i32 to index
    %c0_49 = arith.constant 0 : index
    %63 = vector.load %arg2[%62, %c0_49] : memref<50x256xf32, #tpu.memory_space<vmem>>, vector<1x256xf32>
    %64 = arith.addf %61, %63 : vector<1x256xf32>
    %65 = arith.addf %64, %0 : vector<1x256xf32>
    %c10 = arith.constant 10 : index
    %c0_50 = arith.constant 0 : index
    %66 = vector.load %arg16[%c10, %c0_50] : memref<64x256xf32, #tpu.memory_space<vmem>>, vector<1x256xf32>
    tpu.vector_store %arg16[%c10, %c0_50], %65 {strides = array<i32>} : memref<64x256xf32, #tpu.memory_space<vmem>>, vector<1x256xf32>,
    %c1_51 = arith.constant 1 : index
    %c3_52 = arith.constant 3 : index
    %67 = memref.load %arg0[%c1_51, %c3_52] : memref<8x4xi32, #tpu.memory_space<smem>>
    %c6_53 = arith.constant 6 : index
    %c3_54 = arith.constant 3 : index
    %68 = memref.load %arg0[%c6_53, %c3_54] : memref<8x4xi32, #tpu.memory_space<smem>>
    %69 = arith.index_cast %67 : i32 to index
    %c0_55 = arith.constant 0 : index
    %70 = vector.load %arg1[%69, %c0_55] : memref<50x256xf32, #tpu.memory_space<vmem>>, vector<1x256xf32>
    %71 = arith.index_cast %68 : i32 to index
    %c0_56 = arith.constant 0 : index
    %72 = vector.load %arg2[%71, %c0_56] : memref<50x256xf32, #tpu.memory_space<vmem>>, vector<1x256xf32>
    %73 = arith.addf %70, %72 : vector<1x256xf32>
    %74 = arith.addf %73, %0 : vector<1x256xf32>
    %c11 = arith.constant 11 : index
    %c0_57 = arith.constant 0 : index
    %75 = vector.load %arg16[%c11, %c0_57] : memref<64x256xf32, #tpu.memory_space<vmem>>, vector<1x256xf32>
    tpu.vector_store %arg16[%c11, %c0_57], %74 {strides = array<i32>} : memref<64x256xf32, #tpu.memory_space<vmem>>, vector<1x256xf32>,
    %c2_58 = arith.constant 2 : index
    %c0_59 = arith.constant 0 : index
    %76 = memref.load %arg0[%c2_58, %c0_59] : memref<8x4xi32, #tpu.memory_space<smem>>
    %c5 = arith.constant 5 : index
    %c0_60 = arith.constant 0 : index
    %77 = memref.load %arg0[%c5, %c0_60] : memref<8x4xi32, #tpu.memory_space<smem>>
    %78 = arith.index_cast %76 : i32 to index
    %c0_61 = arith.constant 0 : index
    %79 = vector.load %arg1[%78, %c0_61] : memref<50x256xf32, #tpu.memory_space<vmem>>, vector<1x256xf32>
    %80 = arith.index_cast %77 : i32 to index
    %c0_62 = arith.constant 0 : index
    %81 = vector.load %arg2[%80, %c0_62] : memref<50x256xf32, #tpu.memory_space<vmem>>, vector<1x256xf32>
    %82 = arith.addf %79, %81 : vector<1x256xf32>
    %83 = arith.addf %82, %0 : vector<1x256xf32>
    %c16 = arith.constant 16 : index
    %c0_63 = arith.constant 0 : index
    %84 = vector.load %arg16[%c16, %c0_63] : memref<64x256xf32, #tpu.memory_space<vmem>>, vector<1x256xf32>
    tpu.vector_store %arg16[%c16, %c0_63], %83 {strides = array<i32>} : memref<64x256xf32, #tpu.memory_space<vmem>>, vector<1x256xf32>,
    %c2_64 = arith.constant 2 : index
    %c1_65 = arith.constant 1 : index
    %85 = memref.load %arg0[%c2_64, %c1_65] : memref<8x4xi32, #tpu.memory_space<smem>>
    %c5_66 = arith.constant 5 : index
    %c1_67 = arith.constant 1 : index
    %86 = memref.load %arg0[%c5_66, %c1_67] : memref<8x4xi32, #tpu.memory_space<smem>>
    %87 = arith.index_cast %85 : i32 to index
    %c0_68 = arith.constant 0 : index
    %88 = vector.load %arg1[%87, %c0_68] : memref<50x256xf32, #tpu.memory_space<vmem>>, vector<1x256xf32>
    %89 = arith.index_cast %86 : i32 to index
    %c0_69 = arith.constant 0 : index
    %90 = vector.load %arg2[%89, %c0_69] : memref<50x256xf32, #tpu.memory_space<vmem>>, vector<1x256xf32>
    %91 = arith.addf %88, %90 : vector<1x256xf32>
    %92 = arith.addf %91, %0 : vector<1x256xf32>
    %c17 = arith.constant 17 : index
    %c0_70 = arith.constant 0 : index
    %93 = vector.load %arg16[%c17, %c0_70] : memref<64x256xf32, #tpu.memory_space<vmem>>, vector<1x256xf32>
    tpu.vector_store %arg16[%c17, %c0_70], %92 {strides = array<i32>} : memref<64x256xf32, #tpu.memory_space<vmem>>, vector<1x256xf32>,
    %c2_71 = arith.constant 2 : index
    %c2_72 = arith.constant 2 : index
    %94 = memref.load %arg0[%c2_71, %c2_72] : memref<8x4xi32, #tpu.memory_space<smem>>
    %c5_73 = arith.constant 5 : index
    %c2_74 = arith.constant 2 : index
    %95 = memref.load %arg0[%c5_73, %c2_74] : memref<8x4xi32, #tpu.memory_space<smem>>
    %96 = arith.index_cast %94 : i32 to index
    %c0_75 = arith.constant 0 : index
    %97 = vector.load %arg1[%96, %c0_75] : memref<50x256xf32, #tpu.memory_space<vmem>>, vector<1x256xf32>
    %98 = arith.index_cast %95 : i32 to index
    %c0_76 = arith.constant 0 : index
    %99 = vector.load %arg2[%98, %c0_76] : memref<50x256xf32, #tpu.memory_space<vmem>>, vector<1x256xf32>
    %100 = arith.addf %97, %99 : vector<1x256xf32>
    %101 = arith.addf %100, %0 : vector<1x256xf32>
    %c18 = arith.constant 18 : index
    %c0_77 = arith.constant 0 : index
    %102 = vector.load %arg16[%c18, %c0_77] : memref<64x256xf32, #tpu.memory_space<vmem>>, vector<1x256xf32>
    tpu.vector_store %arg16[%c18, %c0_77], %101 {strides = array<i32>} : memref<64x256xf32, #tpu.memory_space<vmem>>, vector<1x256xf32>,
    %c2_78 = arith.constant 2 : index
    %c3_79 = arith.constant 3 : index
    %103 = memref.load %arg0[%c2_78, %c3_79] : memref<8x4xi32, #tpu.memory_space<smem>>
    %c5_80 = arith.constant 5 : index
    %c3_81 = arith.constant 3 : index
    %104 = memref.load %arg0[%c5_80, %c3_81] : memref<8x4xi32, #tpu.memory_space<smem>>
    %105 = arith.index_cast %103 : i32 to index
    %c0_82 = arith.constant 0 : index
    %106 = vector.load %arg1[%105, %c0_82] : memref<50x256xf32, #tpu.memory_space<vmem>>, vector<1x256xf32>
    %107 = arith.index_cast %104 : i32 to index
    %c0_83 = arith.constant 0 : index
    %108 = vector.load %arg2[%107, %c0_83] : memref<50x256xf32, #tpu.memory_space<vmem>>, vector<1x256xf32>
    %109 = arith.addf %106, %108 : vector<1x256xf32>
    %110 = arith.addf %109, %0 : vector<1x256xf32>
    %c19 = arith.constant 19 : index
    %c0_84 = arith.constant 0 : index
    %111 = vector.load %arg16[%c19, %c0_84] : memref<64x256xf32, #tpu.memory_space<vmem>>, vector<1x256xf32>
    tpu.vector_store %arg16[%c19, %c0_84], %110 {strides = array<i32>} : memref<64x256xf32, #tpu.memory_space<vmem>>, vector<1x256xf32>,
    %c3_85 = arith.constant 3 : index
    %c0_86 = arith.constant 0 : index
    %112 = memref.load %arg0[%c3_85, %c0_86] : memref<8x4xi32, #tpu.memory_space<smem>>
    %c4 = arith.constant 4 : index
    %c0_87 = arith.constant 0 : index
    %113 = memref.load %arg0[%c4, %c0_87] : memref<8x4xi32, #tpu.memory_space<smem>>
    %114 = arith.index_cast %112 : i32 to index
    %c0_88 = arith.constant 0 : index
    %115 = vector.load %arg1[%114, %c0_88] : memref<50x256xf32, #tpu.memory_space<vmem>>, vector<1x256xf32>
    %116 = arith.index_cast %113 : i32 to index
    %c0_89 = arith.constant 0 : index
    %117 = vector.load %arg2[%116, %c0_89] : memref<50x256xf32, #tpu.memory_space<vmem>>, vector<1x256xf32>
    %118 = arith.addf %115, %117 : vector<1x256xf32>
    %119 = arith.addf %118, %0 : vector<1x256xf32>
    %c24 = arith.constant 24 : index
    %c0_90 = arith.constant 0 : index
    %120 = vector.load %arg16[%c24, %c0_90] : memref<64x256xf32, #tpu.memory_space<vmem>>, vector<1x256xf32>
    tpu.vector_store %arg16[%c24, %c0_90], %119 {strides = array<i32>} : memref<64x256xf32, #tpu.memory_space<vmem>>, vector<1x256xf32>,
    %c3_91 = arith.constant 3 : index
    %c1_92 = arith.constant 1 : index
    %121 = memref.load %arg0[%c3_91, %c1_92] : memref<8x4xi32, #tpu.memory_space<smem>>
    %c4_93 = arith.constant 4 : index
    %c1_94 = arith.constant 1 : index
    %122 = memref.load %arg0[%c4_93, %c1_94] : memref<8x4xi32, #tpu.memory_space<smem>>
    %123 = arith.index_cast %121 : i32 to index
    %c0_95 = arith.constant 0 : index
    %124 = vector.load %arg1[%123, %c0_95] : memref<50x256xf32, #tpu.memory_space<vmem>>, vector<1x256xf32>
    %125 = arith.index_cast %122 : i32 to index
    %c0_96 = arith.constant 0 : index
    %126 = vector.load %arg2[%125, %c0_96] : memref<50x256xf32, #tpu.memory_space<vmem>>, vector<1x256xf32>
    %127 = arith.addf %124, %126 : vector<1x256xf32>
    %128 = arith.addf %127, %0 : vector<1x256xf32>
    %c25 = arith.constant 25 : index
    %c0_97 = arith.constant 0 : index
    %129 = vector.load %arg16[%c25, %c0_97] : memref<64x256xf32, #tpu.memory_space<vmem>>, vector<1x256xf32>
    tpu.vector_store %arg16[%c25, %c0_97], %128 {strides = array<i32>} : memref<64x256xf32, #tpu.memory_space<vmem>>, vector<1x256xf32>,
    %c3_98 = arith.constant 3 : index
    %c2_99 = arith.constant 2 : index
    %130 = memref.load %arg0[%c3_98, %c2_99] : memref<8x4xi32, #tpu.memory_space<smem>>
    %c4_100 = arith.constant 4 : index
    %c2_101 = arith.constant 2 : index
    %131 = memref.load %arg0[%c4_100, %c2_101] : memref<8x4xi32, #tpu.memory_space<smem>>
    %132 = arith.index_cast %130 : i32 to index
    %c0_102 = arith.constant 0 : index
    %133 = vector.load %arg1[%132, %c0_102] : memref<50x256xf32, #tpu.memory_space<vmem>>, vector<1x256xf32>
    %134 = arith.index_cast %131 : i32 to index
    %c0_103 = arith.constant 0 : index
    %135 = vector.load %arg2[%134, %c0_103] : memref<50x256xf32, #tpu.memory_space<vmem>>, vector<1x256xf32>
    %136 = arith.addf %133, %135 : vector<1x256xf32>
    %137 = arith.addf %136, %0 : vector<1x256xf32>
    %c26 = arith.constant 26 : index
    %c0_104 = arith.constant 0 : index
    %138 = vector.load %arg16[%c26, %c0_104] : memref<64x256xf32, #tpu.memory_space<vmem>>, vector<1x256xf32>
    tpu.vector_store %arg16[%c26, %c0_104], %137 {strides = array<i32>} : memref<64x256xf32, #tpu.memory_space<vmem>>, vector<1x256xf32>,
    %c3_105 = arith.constant 3 : index
    %c3_106 = arith.constant 3 : index
    %139 = memref.load %arg0[%c3_105, %c3_106] : memref<8x4xi32, #tpu.memory_space<smem>>
    %c4_107 = arith.constant 4 : index
    %c3_108 = arith.constant 3 : index
    %140 = memref.load %arg0[%c4_107, %c3_108] : memref<8x4xi32, #tpu.memory_space<smem>>
    %141 = arith.index_cast %139 : i32 to index
    %c0_109 = arith.constant 0 : index
    %142 = vector.load %arg1[%141, %c0_109] : memref<50x256xf32, #tpu.memory_space<vmem>>, vector<1x256xf32>
    %143 = arith.index_cast %140 : i32 to index
    %c0_110 = arith.constant 0 : index
    %144 = vector.load %arg2[%143, %c0_110] : memref<50x256xf32, #tpu.memory_space<vmem>>, vector<1x256xf32>
    %145 = arith.addf %142, %144 : vector<1x256xf32>
    %146 = arith.addf %145, %0 : vector<1x256xf32>
    %c27 = arith.constant 27 : index
    %c0_111 = arith.constant 0 : index
    %147 = vector.load %arg16[%c27, %c0_111] : memref<64x256xf32, #tpu.memory_space<vmem>>, vector<1x256xf32>
    tpu.vector_store %arg16[%c27, %c0_111], %146 {strides = array<i32>} : memref<64x256xf32, #tpu.memory_space<vmem>>, vector<1x256xf32>,
    %c4_112 = arith.constant 4 : index
    %c0_113 = arith.constant 0 : index
    %148 = memref.load %arg0[%c4_112, %c0_113] : memref<8x4xi32, #tpu.memory_space<smem>>
    %c3_114 = arith.constant 3 : index
    %c0_115 = arith.constant 0 : index
    %149 = memref.load %arg0[%c3_114, %c0_115] : memref<8x4xi32, #tpu.memory_space<smem>>
    %150 = arith.index_cast %148 : i32 to index
    %c0_116 = arith.constant 0 : index
    %151 = vector.load %arg1[%150, %c0_116] : memref<50x256xf32, #tpu.memory_space<vmem>>, vector<1x256xf32>
    %152 = arith.index_cast %149 : i32 to index
    %c0_117 = arith.constant 0 : index
    %153 = vector.load %arg2[%152, %c0_117] : memref<50x256xf32, #tpu.memory_space<vmem>>, vector<1x256xf32>
    %154 = arith.addf %151, %153 : vector<1x256xf32>
    %155 = arith.addf %154, %0 : vector<1x256xf32>
    %c32 = arith.constant 32 : index
    %c0_118 = arith.constant 0 : index
    %156 = vector.load %arg16[%c32, %c0_118] : memref<64x256xf32, #tpu.memory_space<vmem>>, vector<1x256xf32>
    tpu.vector_store %arg16[%c32, %c0_118], %155 {strides = array<i32>} : memref<64x256xf32, #tpu.memory_space<vmem>>, vector<1x256xf32>,
    %c4_119 = arith.constant 4 : index
    %c1_120 = arith.constant 1 : index
    %157 = memref.load %arg0[%c4_119, %c1_120] : memref<8x4xi32, #tpu.memory_space<smem>>
    %c3_121 = arith.constant 3 : index
    %c1_122 = arith.constant 1 : index
    %158 = memref.load %arg0[%c3_121, %c1_122] : memref<8x4xi32, #tpu.memory_space<smem>>
    %159 = arith.index_cast %157 : i32 to index
    %c0_123 = arith.constant 0 : index
    %160 = vector.load %arg1[%159, %c0_123] : memref<50x256xf32, #tpu.memory_space<vmem>>, vector<1x256xf32>
    %161 = arith.index_cast %158 : i32 to index
    %c0_124 = arith.constant 0 : index
    %162 = vector.load %arg2[%161, %c0_124] : memref<50x256xf32, #tpu.memory_space<vmem>>, vector<1x256xf32>
    %163 = arith.addf %160, %162 : vector<1x256xf32>
    %164 = arith.addf %163, %0 : vector<1x256xf32>
    %c33 = arith.constant 33 : index
    %c0_125 = arith.constant 0 : index
    %165 = vector.load %arg16[%c33, %c0_125] : memref<64x256xf32, #tpu.memory_space<vmem>>, vector<1x256xf32>
    tpu.vector_store %arg16[%c33, %c0_125], %164 {strides = array<i32>} : memref<64x256xf32, #tpu.memory_space<vmem>>, vector<1x256xf32>,
    %c4_126 = arith.constant 4 : index
    %c2_127 = arith.constant 2 : index
    %166 = memref.load %arg0[%c4_126, %c2_127] : memref<8x4xi32, #tpu.memory_space<smem>>
    %c3_128 = arith.constant 3 : index
    %c2_129 = arith.constant 2 : index
    %167 = memref.load %arg0[%c3_128, %c2_129] : memref<8x4xi32, #tpu.memory_space<smem>>
    %168 = arith.index_cast %166 : i32 to index
    %c0_130 = arith.constant 0 : index
    %169 = vector.load %arg1[%168, %c0_130] : memref<50x256xf32, #tpu.memory_space<vmem>>, vector<1x256xf32>
    %170 = arith.index_cast %167 : i32 to index
    %c0_131 = arith.constant 0 : index
    %171 = vector.load %arg2[%170, %c0_131] : memref<50x256xf32, #tpu.memory_space<vmem>>, vector<1x256xf32>
    %172 = arith.addf %169, %171 : vector<1x256xf32>
    %173 = arith.addf %172, %0 : vector<1x256xf32>
    %c34 = arith.constant 34 : index
    %c0_132 = arith.constant 0 : index
    %174 = vector.load %arg16[%c34, %c0_132] : memref<64x256xf32, #tpu.memory_space<vmem>>, vector<1x256xf32>
    tpu.vector_store %arg16[%c34, %c0_132], %173 {strides = array<i32>} : memref<64x256xf32, #tpu.memory_space<vmem>>, vector<1x256xf32>,
    %c4_133 = arith.constant 4 : index
    %c3_134 = arith.constant 3 : index
    %175 = memref.load %arg0[%c4_133, %c3_134] : memref<8x4xi32, #tpu.memory_space<smem>>
    %c3_135 = arith.constant 3 : index
    %c3_136 = arith.constant 3 : index
    %176 = memref.load %arg0[%c3_135, %c3_136] : memref<8x4xi32, #tpu.memory_space<smem>>
    %177 = arith.index_cast %175 : i32 to index
    %c0_137 = arith.constant 0 : index
    %178 = vector.load %arg1[%177, %c0_137] : memref<50x256xf32, #tpu.memory_space<vmem>>, vector<1x256xf32>
    %179 = arith.index_cast %176 : i32 to index
    %c0_138 = arith.constant 0 : index
    %180 = vector.load %arg2[%179, %c0_138] : memref<50x256xf32, #tpu.memory_space<vmem>>, vector<1x256xf32>
    %181 = arith.addf %178, %180 : vector<1x256xf32>
    %182 = arith.addf %181, %0 : vector<1x256xf32>
    %c35 = arith.constant 35 : index
    %c0_139 = arith.constant 0 : index
    %183 = vector.load %arg16[%c35, %c0_139] : memref<64x256xf32, #tpu.memory_space<vmem>>, vector<1x256xf32>
    tpu.vector_store %arg16[%c35, %c0_139], %182 {strides = array<i32>} : memref<64x256xf32, #tpu.memory_space<vmem>>, vector<1x256xf32>,
    %c5_140 = arith.constant 5 : index
    %c0_141 = arith.constant 0 : index
    %184 = memref.load %arg0[%c5_140, %c0_141] : memref<8x4xi32, #tpu.memory_space<smem>>
    %c2_142 = arith.constant 2 : index
    %c0_143 = arith.constant 0 : index
    %185 = memref.load %arg0[%c2_142, %c0_143] : memref<8x4xi32, #tpu.memory_space<smem>>
    %186 = arith.index_cast %184 : i32 to index
    %c0_144 = arith.constant 0 : index
    %187 = vector.load %arg1[%186, %c0_144] : memref<50x256xf32, #tpu.memory_space<vmem>>, vector<1x256xf32>
    %188 = arith.index_cast %185 : i32 to index
    %c0_145 = arith.constant 0 : index
    %189 = vector.load %arg2[%188, %c0_145] : memref<50x256xf32, #tpu.memory_space<vmem>>, vector<1x256xf32>
    %190 = arith.addf %187, %189 : vector<1x256xf32>
    %191 = arith.addf %190, %0 : vector<1x256xf32>
    %c40 = arith.constant 40 : index
    %c0_146 = arith.constant 0 : index
    %192 = vector.load %arg16[%c40, %c0_146] : memref<64x256xf32, #tpu.memory_space<vmem>>, vector<1x256xf32>
    tpu.vector_store %arg16[%c40, %c0_146], %191 {strides = array<i32>} : memref<64x256xf32, #tpu.memory_space<vmem>>, vector<1x256xf32>,
    %c5_147 = arith.constant 5 : index
    %c1_148 = arith.constant 1 : index
    %193 = memref.load %arg0[%c5_147, %c1_148] : memref<8x4xi32, #tpu.memory_space<smem>>
    %c2_149 = arith.constant 2 : index
    %c1_150 = arith.constant 1 : index
    %194 = memref.load %arg0[%c2_149, %c1_150] : memref<8x4xi32, #tpu.memory_space<smem>>
    %195 = arith.index_cast %193 : i32 to index
    %c0_151 = arith.constant 0 : index
    %196 = vector.load %arg1[%195, %c0_151] : memref<50x256xf32, #tpu.memory_space<vmem>>, vector<1x256xf32>
    %197 = arith.index_cast %194 : i32 to index
    %c0_152 = arith.constant 0 : index
    %198 = vector.load %arg2[%197, %c0_152] : memref<50x256xf32, #tpu.memory_space<vmem>>, vector<1x256xf32>
    %199 = arith.addf %196, %198 : vector<1x256xf32>
    %200 = arith.addf %199, %0 : vector<1x256xf32>
    %c41 = arith.constant 41 : index
    %c0_153 = arith.constant 0 : index
    %201 = vector.load %arg16[%c41, %c0_153] : memref<64x256xf32, #tpu.memory_space<vmem>>, vector<1x256xf32>
    tpu.vector_store %arg16[%c41, %c0_153], %200 {strides = array<i32>} : memref<64x256xf32, #tpu.memory_space<vmem>>, vector<1x256xf32>,
    %c5_154 = arith.constant 5 : index
    %c2_155 = arith.constant 2 : index
    %202 = memref.load %arg0[%c5_154, %c2_155] : memref<8x4xi32, #tpu.memory_space<smem>>
    %c2_156 = arith.constant 2 : index
    %c2_157 = arith.constant 2 : index
    %203 = memref.load %arg0[%c2_156, %c2_157] : memref<8x4xi32, #tpu.memory_space<smem>>
    %204 = arith.index_cast %202 : i32 to index
    %c0_158 = arith.constant 0 : index
    %205 = vector.load %arg1[%204, %c0_158] : memref<50x256xf32, #tpu.memory_space<vmem>>, vector<1x256xf32>
    %206 = arith.index_cast %203 : i32 to index
    %c0_159 = arith.constant 0 : index
    %207 = vector.load %arg2[%206, %c0_159] : memref<50x256xf32, #tpu.memory_space<vmem>>, vector<1x256xf32>
    %208 = arith.addf %205, %207 : vector<1x256xf32>
    %209 = arith.addf %208, %0 : vector<1x256xf32>
    %c42 = arith.constant 42 : index
    %c0_160 = arith.constant 0 : index
    %210 = vector.load %arg16[%c42, %c0_160] : memref<64x256xf32, #tpu.memory_space<vmem>>, vector<1x256xf32>
    tpu.vector_store %arg16[%c42, %c0_160], %209 {strides = array<i32>} : memref<64x256xf32, #tpu.memory_space<vmem>>, vector<1x256xf32>,
    %c5_161 = arith.constant 5 : index
    %c3_162 = arith.constant 3 : index
    %211 = memref.load %arg0[%c5_161, %c3_162] : memref<8x4xi32, #tpu.memory_space<smem>>
    %c2_163 = arith.constant 2 : index
    %c3_164 = arith.constant 3 : index
    %212 = memref.load %arg0[%c2_163, %c3_164] : memref<8x4xi32, #tpu.memory_space<smem>>
    %213 = arith.index_cast %211 : i32 to index
    %c0_165 = arith.constant 0 : index
    %214 = vector.load %arg1[%213, %c0_165] : memref<50x256xf32, #tpu.memory_space<vmem>>, vector<1x256xf32>
    %215 = arith.index_cast %212 : i32 to index
    %c0_166 = arith.constant 0 : index
    %216 = vector.load %arg2[%215, %c0_166] : memref<50x256xf32, #tpu.memory_space<vmem>>, vector<1x256xf32>
    %217 = arith.addf %214, %216 : vector<1x256xf32>
    %218 = arith.addf %217, %0 : vector<1x256xf32>
    %c43 = arith.constant 43 : index
    %c0_167 = arith.constant 0 : index
    %219 = vector.load %arg16[%c43, %c0_167] : memref<64x256xf32, #tpu.memory_space<vmem>>, vector<1x256xf32>
    tpu.vector_store %arg16[%c43, %c0_167], %218 {strides = array<i32>} : memref<64x256xf32, #tpu.memory_space<vmem>>, vector<1x256xf32>,
    %c6_168 = arith.constant 6 : index
    %c0_169 = arith.constant 0 : index
    %220 = memref.load %arg0[%c6_168, %c0_169] : memref<8x4xi32, #tpu.memory_space<smem>>
    %c1_170 = arith.constant 1 : index
    %c0_171 = arith.constant 0 : index
    %221 = memref.load %arg0[%c1_170, %c0_171] : memref<8x4xi32, #tpu.memory_space<smem>>
    %222 = arith.index_cast %220 : i32 to index
    %c0_172 = arith.constant 0 : index
    %223 = vector.load %arg1[%222, %c0_172] : memref<50x256xf32, #tpu.memory_space<vmem>>, vector<1x256xf32>
    %224 = arith.index_cast %221 : i32 to index
    %c0_173 = arith.constant 0 : index
    %225 = vector.load %arg2[%224, %c0_173] : memref<50x256xf32, #tpu.memory_space<vmem>>, vector<1x256xf32>
    %226 = arith.addf %223, %225 : vector<1x256xf32>
    %227 = arith.addf %226, %0 : vector<1x256xf32>
    %c48 = arith.constant 48 : index
    %c0_174 = arith.constant 0 : index
    %228 = vector.load %arg16[%c48, %c0_174] : memref<64x256xf32, #tpu.memory_space<vmem>>, vector<1x256xf32>
    tpu.vector_store %arg16[%c48, %c0_174], %227 {strides = array<i32>} : memref<64x256xf32, #tpu.memory_space<vmem>>, vector<1x256xf32>,
    %c6_175 = arith.constant 6 : index
    %c1_176 = arith.constant 1 : index
    %229 = memref.load %arg0[%c6_175, %c1_176] : memref<8x4xi32, #tpu.memory_space<smem>>
    %c1_177 = arith.constant 1 : index
    %c1_178 = arith.constant 1 : index
    %230 = memref.load %arg0[%c1_177, %c1_178] : memref<8x4xi32, #tpu.memory_space<smem>>
    %231 = arith.index_cast %229 : i32 to index
    %c0_179 = arith.constant 0 : index
    %232 = vector.load %arg1[%231, %c0_179] : memref<50x256xf32, #tpu.memory_space<vmem>>, vector<1x256xf32>
    %233 = arith.index_cast %230 : i32 to index
    %c0_180 = arith.constant 0 : index
    %234 = vector.load %arg2[%233, %c0_180] : memref<50x256xf32, #tpu.memory_space<vmem>>, vector<1x256xf32>
    %235 = arith.addf %232, %234 : vector<1x256xf32>
    %236 = arith.addf %235, %0 : vector<1x256xf32>
    %c49 = arith.constant 49 : index
    %c0_181 = arith.constant 0 : index
    %237 = vector.load %arg16[%c49, %c0_181] : memref<64x256xf32, #tpu.memory_space<vmem>>, vector<1x256xf32>
    tpu.vector_store %arg16[%c49, %c0_181], %236 {strides = array<i32>} : memref<64x256xf32, #tpu.memory_space<vmem>>, vector<1x256xf32>,
    %c6_182 = arith.constant 6 : index
    %c2_183 = arith.constant 2 : index
    %238 = memref.load %arg0[%c6_182, %c2_183] : memref<8x4xi32, #tpu.memory_space<smem>>
    %c1_184 = arith.constant 1 : index
    %c2_185 = arith.constant 2 : index
    %239 = memref.load %arg0[%c1_184, %c2_185] : memref<8x4xi32, #tpu.memory_space<smem>>
    %240 = arith.index_cast %238 : i32 to index
    %c0_186 = arith.constant 0 : index
    %241 = vector.load %arg1[%240, %c0_186] : memref<50x256xf32, #tpu.memory_space<vmem>>, vector<1x256xf32>
    %242 = arith.index_cast %239 : i32 to index
    %c0_187 = arith.constant 0 : index
    %243 = vector.load %arg2[%242, %c0_187] : memref<50x256xf32, #tpu.memory_space<vmem>>, vector<1x256xf32>
    %244 = arith.addf %241, %243 : vector<1x256xf32>
    %245 = arith.addf %244, %0 : vector<1x256xf32>
    %c50 = arith.constant 50 : index
    %c0_188 = arith.constant 0 : index
    %246 = vector.load %arg16[%c50, %c0_188] : memref<64x256xf32, #tpu.memory_space<vmem>>, vector<1x256xf32>
    tpu.vector_store %arg16[%c50, %c0_188], %245 {strides = array<i32>} : memref<64x256xf32, #tpu.memory_space<vmem>>, vector<1x256xf32>,
    %c6_189 = arith.constant 6 : index
    %c3_190 = arith.constant 3 : index
    %247 = memref.load %arg0[%c6_189, %c3_190] : memref<8x4xi32, #tpu.memory_space<smem>>
    %c1_191 = arith.constant 1 : index
    %c3_192 = arith.constant 3 : index
    %248 = memref.load %arg0[%c1_191, %c3_192] : memref<8x4xi32, #tpu.memory_space<smem>>
    %249 = arith.index_cast %247 : i32 to index
    %c0_193 = arith.constant 0 : index
    %250 = vector.load %arg1[%249, %c0_193] : memref<50x256xf32, #tpu.memory_space<vmem>>, vector<1x256xf32>
    %251 = arith.index_cast %248 : i32 to index
    %c0_194 = arith.constant 0 : index
    %252 = vector.load %arg2[%251, %c0_194] : memref<50x256xf32, #tpu.memory_space<vmem>>, vector<1x256xf32>
    %253 = arith.addf %250, %252 : vector<1x256xf32>
    %254 = arith.addf %253, %0 : vector<1x256xf32>
    %c51 = arith.constant 51 : index
    %c0_195 = arith.constant 0 : index
    %255 = vector.load %arg16[%c51, %c0_195] : memref<64x256xf32, #tpu.memory_space<vmem>>, vector<1x256xf32>
    tpu.vector_store %arg16[%c51, %c0_195], %254 {strides = array<i32>} : memref<64x256xf32, #tpu.memory_space<vmem>>, vector<1x256xf32>,
    %c7_196 = arith.constant 7 : index
    %c0_197 = arith.constant 0 : index
    %256 = memref.load %arg0[%c7_196, %c0_197] : memref<8x4xi32, #tpu.memory_space<smem>>
    %c0_198 = arith.constant 0 : index
    %c0_199 = arith.constant 0 : index
    %257 = memref.load %arg0[%c0_198, %c0_199] : memref<8x4xi32, #tpu.memory_space<smem>>
    %258 = arith.index_cast %256 : i32 to index
    %c0_200 = arith.constant 0 : index
    %259 = vector.load %arg1[%258, %c0_200] : memref<50x256xf32, #tpu.memory_space<vmem>>, vector<1x256xf32>
    %260 = arith.index_cast %257 : i32 to index
    %c0_201 = arith.constant 0 : index
    %261 = vector.load %arg2[%260, %c0_201] : memref<50x256xf32, #tpu.memory_space<vmem>>, vector<1x256xf32>
    %262 = arith.addf %259, %261 : vector<1x256xf32>
    %263 = arith.addf %262, %0 : vector<1x256xf32>
    %c56 = arith.constant 56 : index
    %c0_202 = arith.constant 0 : index
    %264 = vector.load %arg16[%c56, %c0_202] : memref<64x256xf32, #tpu.memory_space<vmem>>, vector<1x256xf32>
    tpu.vector_store %arg16[%c56, %c0_202], %263 {strides = array<i32>} : memref<64x256xf32, #tpu.memory_space<vmem>>, vector<1x256xf32>,
    %c7_203 = arith.constant 7 : index
    %c1_204 = arith.constant 1 : index
    %265 = memref.load %arg0[%c7_203, %c1_204] : memref<8x4xi32, #tpu.memory_space<smem>>
    %c0_205 = arith.constant 0 : index
    %c1_206 = arith.constant 1 : index
    %266 = memref.load %arg0[%c0_205, %c1_206] : memref<8x4xi32, #tpu.memory_space<smem>>
    %267 = arith.index_cast %265 : i32 to index
    %c0_207 = arith.constant 0 : index
    %268 = vector.load %arg1[%267, %c0_207] : memref<50x256xf32, #tpu.memory_space<vmem>>, vector<1x256xf32>
    %269 = arith.index_cast %266 : i32 to index
    %c0_208 = arith.constant 0 : index
    %270 = vector.load %arg2[%269, %c0_208] : memref<50x256xf32, #tpu.memory_space<vmem>>, vector<1x256xf32>
    %271 = arith.addf %268, %270 : vector<1x256xf32>
    %272 = arith.addf %271, %0 : vector<1x256xf32>
    %c57 = arith.constant 57 : index
    %c0_209 = arith.constant 0 : index
    %273 = vector.load %arg16[%c57, %c0_209] : memref<64x256xf32, #tpu.memory_space<vmem>>, vector<1x256xf32>
    tpu.vector_store %arg16[%c57, %c0_209], %272 {strides = array<i32>} : memref<64x256xf32, #tpu.memory_space<vmem>>, vector<1x256xf32>,
    %c7_210 = arith.constant 7 : index
    %c2_211 = arith.constant 2 : index
    %274 = memref.load %arg0[%c7_210, %c2_211] : memref<8x4xi32, #tpu.memory_space<smem>>
    %c0_212 = arith.constant 0 : index
    %c2_213 = arith.constant 2 : index
    %275 = memref.load %arg0[%c0_212, %c2_213] : memref<8x4xi32, #tpu.memory_space<smem>>
    %276 = arith.index_cast %274 : i32 to index
    %c0_214 = arith.constant 0 : index
    %277 = vector.load %arg1[%276, %c0_214] : memref<50x256xf32, #tpu.memory_space<vmem>>, vector<1x256xf32>
    %278 = arith.index_cast %275 : i32 to index
    %c0_215 = arith.constant 0 : index
    %279 = vector.load %arg2[%278, %c0_215] : memref<50x256xf32, #tpu.memory_space<vmem>>, vector<1x256xf32>
    %280 = arith.addf %277, %279 : vector<1x256xf32>
    %281 = arith.addf %280, %0 : vector<1x256xf32>
    %c58 = arith.constant 58 : index
    %c0_216 = arith.constant 0 : index
    %282 = vector.load %arg16[%c58, %c0_216] : memref<64x256xf32, #tpu.memory_space<vmem>>, vector<1x256xf32>
    tpu.vector_store %arg16[%c58, %c0_216], %281 {strides = array<i32>} : memref<64x256xf32, #tpu.memory_space<vmem>>, vector<1x256xf32>,
    %c7_217 = arith.constant 7 : index
    %c3_218 = arith.constant 3 : index
    %283 = memref.load %arg0[%c7_217, %c3_218] : memref<8x4xi32, #tpu.memory_space<smem>>
    %c0_219 = arith.constant 0 : index
    %c3_220 = arith.constant 3 : index
    %284 = memref.load %arg0[%c0_219, %c3_220] : memref<8x4xi32, #tpu.memory_space<smem>>
    %285 = arith.index_cast %283 : i32 to index
    %c0_221 = arith.constant 0 : index
    %286 = vector.load %arg1[%285, %c0_221] : memref<50x256xf32, #tpu.memory_space<vmem>>, vector<1x256xf32>
    %287 = arith.index_cast %284 : i32 to index
    %c0_222 = arith.constant 0 : index
    %288 = vector.load %arg2[%287, %c0_222] : memref<50x256xf32, #tpu.memory_space<vmem>>, vector<1x256xf32>
    %289 = arith.addf %286, %288 : vector<1x256xf32>
    %290 = arith.addf %289, %0 : vector<1x256xf32>
    %c59 = arith.constant 59 : index
    %c0_223 = arith.constant 0 : index
    %291 = vector.load %arg16[%c59, %c0_223] : memref<64x256xf32, #tpu.memory_space<vmem>>, vector<1x256xf32>
    tpu.vector_store %arg16[%c59, %c0_223], %290 {strides = array<i32>} : memref<64x256xf32, #tpu.memory_space<vmem>>, vector<1x256xf32>,
    %c0_224 = arith.constant 0 : index
    %c0_225 = arith.constant 0 : index
    %292 = vector.load %arg4[%c0_224, %c0_225] : memref<64x256xf32, #tpu.memory_space<vmem>>, vector<64x256xf32>
    %cst = arith.constant 0.000000e+00 : f32
    %293 = vector.broadcast %cst : f32 to vector<8x64xf32>
    %cst_226 = arith.constant 0.000000e+00 : f32
    %294 = vector.broadcast %cst_226 : f32 to vector<8x64xf32>
    %c0_227 = arith.constant 0 : index
    %c0_228 = arith.constant 0 : index
    %295 = vector.load %arg16[%c0_227, %c0_228] : memref<64x256xf32, #tpu.memory_space<vmem>>, vector<8x256xf32>
    %cst_229 = arith.constant dense<0.000000e+00> : vector<8x256xf32>
    %296 = tpu.matmul %293, %292, %cst_229 {dimension_numbers = #tpu.dot_dimension_numbers<[1], [0], [0], [1], [0, 0, 1, 1], [], []>} : vector<8x64xf32>, vector<64x256xf32>, vector<8x256xf32> -> vector<8x256xf32>
    %297 = arith.addf %295, %296 : vector<8x256xf32>
    %298 = math.tanh %297 : vector<8x256xf32>
    %299 = vector.extract_strided_slice %298 {offsets = [0, 0], sizes = [8, 64], strides = [1, 1]} : vector<8x256xf32> to vector<8x64xf32>
    %cst_230 = arith.constant 5.000000e-01 : f32
    %300 = vector.broadcast %cst_230 : f32 to vector<8x64xf32>
    %301 = arith.mulf %300, %299 : vector<8x64xf32>
    %cst_231 = arith.constant 5.000000e-01 : f32
    %302 = vector.broadcast %cst_231 : f32 to vector<8x64xf32>
    %303 = arith.addf %302, %301 : vector<8x64xf32>
    %304 = vector.extract_strided_slice %298 {offsets = [0, 64], sizes = [8, 64], strides = [1, 1]} : vector<8x256xf32> to vector<8x64xf32>
    %cst_232 = arith.constant 5.000000e-01 : f32
    %305 = vector.broadcast %cst_232 : f32 to vector<8x64xf32>
    %306 = arith.mulf %305, %304 : vector<8x64xf32>
    %cst_233 = arith.constant 5.000000e-01 : f32
    %307 = vector.broadcast %cst_233 : f32 to vector<8x64xf32>
    %308 = arith.addf %307, %306 : vector<8x64xf32>
    %309 = vector.extract_strided_slice %298 {offsets = [0, 128], sizes = [8, 64], strides = [1, 1]} : vector<8x256xf32> to vector<8x64xf32>
    %310 = vector.extract_strided_slice %298 {offsets = [0, 192], sizes = [8, 64], strides = [1, 1]} : vector<8x256xf32> to vector<8x64xf32>
    %cst_234 = arith.constant 5.000000e-01 : f32
    %311 = vector.broadcast %cst_234 : f32 to vector<8x64xf32>
    %312 = arith.mulf %311, %310 : vector<8x64xf32>
    %cst_235 = arith.constant 5.000000e-01 : f32
    %313 = vector.broadcast %cst_235 : f32 to vector<8x64xf32>
    %314 = arith.addf %313, %312 : vector<8x64xf32>
    %315 = arith.mulf %308, %294 : vector<8x64xf32>
    %316 = arith.mulf %303, %309 : vector<8x64xf32>
    %317 = arith.addf %315, %316 : vector<8x64xf32>
    %318 = math.tanh %317 : vector<8x64xf32>
    %319 = arith.mulf %314, %318 : vector<8x64xf32>
    %320 = vector.extract_strided_slice %319 {offsets = [0, 0], sizes = [8, 32], strides = [1, 1]} : vector<8x64xf32> to vector<8x32xf32>
    %c0_236 = arith.constant 0 : index
    %c0_237 = arith.constant 0 : index
    %321 = vector.load %arg17[%c0_236, %c0_237] : memref<64x32xf32, #tpu.memory_space<vmem>>, vector<8x32xf32>
    tpu.vector_store %arg17[%c0_236, %c0_237], %320 {strides = array<i32>} : memref<64x32xf32, #tpu.memory_space<vmem>>, vector<8x32xf32>,
    %322 = vector.extract_strided_slice %319 {offsets = [0, 32], sizes = [8, 32], strides = [1, 1]} : vector<8x64xf32> to vector<8x32xf32>
    %c56_238 = arith.constant 56 : index
    %c0_239 = arith.constant 0 : index
    %323 = vector.load %arg18[%c56_238, %c0_239] : memref<64x32xf32, #tpu.memory_space<vmem>>, vector<8x32xf32>
    tpu.vector_store %arg18[%c56_238, %c0_239], %322 {strides = array<i32>} : memref<64x32xf32, #tpu.memory_space<vmem>>, vector<8x32xf32>,
    %c8_240 = arith.constant 8 : index
    %c0_241 = arith.constant 0 : index
    %324 = vector.load %arg16[%c8_240, %c0_241] : memref<64x256xf32, #tpu.memory_space<vmem>>, vector<8x256xf32>
    %cst_242 = arith.constant dense<0.000000e+00> : vector<8x256xf32>
    %325 = tpu.matmul %319, %292, %cst_242 {dimension_numbers = #tpu.dot_dimension_numbers<[1], [0], [0], [1], [0, 0, 1, 1], [], []>} : vector<8x64xf32>, vector<64x256xf32>, vector<8x256xf32> -> vector<8x256xf32>
    %326 = arith.addf %324, %325 : vector<8x256xf32>
    %327 = math.tanh %326 : vector<8x256xf32>
    %328 = vector.extract_strided_slice %327 {offsets = [0, 0], sizes = [8, 64], strides = [1, 1]} : vector<8x256xf32> to vector<8x64xf32>
    %cst_243 = arith.constant 5.000000e-01 : f32
    %329 = vector.broadcast %cst_243 : f32 to vector<8x64xf32>
    %330 = arith.mulf %329, %328 : vector<8x64xf32>
    %cst_244 = arith.constant 5.000000e-01 : f32
    %331 = vector.broadcast %cst_244 : f32 to vector<8x64xf32>
    %332 = arith.addf %331, %330 : vector<8x64xf32>
    %333 = vector.extract_strided_slice %327 {offsets = [0, 64], sizes = [8, 64], strides = [1, 1]} : vector<8x256xf32> to vector<8x64xf32>
    %cst_245 = arith.constant 5.000000e-01 : f32
    %334 = vector.broadcast %cst_245 : f32 to vector<8x64xf32>
    %335 = arith.mulf %334, %333 : vector<8x64xf32>
    %cst_246 = arith.constant 5.000000e-01 : f32
    %336 = vector.broadcast %cst_246 : f32 to vector<8x64xf32>
    %337 = arith.addf %336, %335 : vector<8x64xf32>
    %338 = vector.extract_strided_slice %327 {offsets = [0, 128], sizes = [8, 64], strides = [1, 1]} : vector<8x256xf32> to vector<8x64xf32>
    %339 = vector.extract_strided_slice %327 {offsets = [0, 192], sizes = [8, 64], strides = [1, 1]} : vector<8x256xf32> to vector<8x64xf32>
    %cst_247 = arith.constant 5.000000e-01 : f32
    %340 = vector.broadcast %cst_247 : f32 to vector<8x64xf32>
    %341 = arith.mulf %340, %339 : vector<8x64xf32>
    %cst_248 = arith.constant 5.000000e-01 : f32
    %342 = vector.broadcast %cst_248 : f32 to vector<8x64xf32>
    %343 = arith.addf %342, %341 : vector<8x64xf32>
    %344 = arith.mulf %337, %317 : vector<8x64xf32>
    %345 = arith.mulf %332, %338 : vector<8x64xf32>
    %346 = arith.addf %344, %345 : vector<8x64xf32>
    %347 = math.tanh %346 : vector<8x64xf32>
    %348 = arith.mulf %343, %347 : vector<8x64xf32>
    %349 = vector.extract_strided_slice %348 {offsets = [0, 0], sizes = [8, 32], strides = [1, 1]} : vector<8x64xf32> to vector<8x32xf32>
    %c8_249 = arith.constant 8 : index
    %c0_250 = arith.constant 0 : index
    %350 = vector.load %arg17[%c8_249, %c0_250] : memref<64x32xf32, #tpu.memory_space<vmem>>, vector<8x32xf32>
    tpu.vector_store %arg17[%c8_249, %c0_250], %349 {strides = array<i32>} : memref<64x32xf32, #tpu.memory_space<vmem>>, vector<8x32xf32>,
    %351 = vector.extract_strided_slice %348 {offsets = [0, 32], sizes = [8, 32], strides = [1, 1]} : vector<8x64xf32> to vector<8x32xf32>
    %c48_251 = arith.constant 48 : index
    %c0_252 = arith.constant 0 : index
    %352 = vector.load %arg18[%c48_251, %c0_252] : memref<64x32xf32, #tpu.memory_space<vmem>>, vector<8x32xf32>
    tpu.vector_store %arg18[%c48_251, %c0_252], %351 {strides = array<i32>} : memref<64x32xf32, #tpu.memory_space<vmem>>, vector<8x32xf32>,
    %c16_253 = arith.constant 16 : index
    %c0_254 = arith.constant 0 : index
    %353 = vector.load %arg16[%c16_253, %c0_254] : memref<64x256xf32, #tpu.memory_space<vmem>>, vector<8x256xf32>
    %cst_255 = arith.constant dense<0.000000e+00> : vector<8x256xf32>
    %354 = tpu.matmul %348, %292, %cst_255 {dimension_numbers = #tpu.dot_dimension_numbers<[1], [0], [0], [1], [0, 0, 1, 1], [], []>} : vector<8x64xf32>, vector<64x256xf32>, vector<8x256xf32> -> vector<8x256xf32>
    %355 = arith.addf %353, %354 : vector<8x256xf32>
    %356 = math.tanh %355 : vector<8x256xf32>
    %357 = vector.extract_strided_slice %356 {offsets = [0, 0], sizes = [8, 64], strides = [1, 1]} : vector<8x256xf32> to vector<8x64xf32>
    %cst_256 = arith.constant 5.000000e-01 : f32
    %358 = vector.broadcast %cst_256 : f32 to vector<8x64xf32>
    %359 = arith.mulf %358, %357 : vector<8x64xf32>
    %cst_257 = arith.constant 5.000000e-01 : f32
    %360 = vector.broadcast %cst_257 : f32 to vector<8x64xf32>
    %361 = arith.addf %360, %359 : vector<8x64xf32>
    %362 = vector.extract_strided_slice %356 {offsets = [0, 64], sizes = [8, 64], strides = [1, 1]} : vector<8x256xf32> to vector<8x64xf32>
    %cst_258 = arith.constant 5.000000e-01 : f32
    %363 = vector.broadcast %cst_258 : f32 to vector<8x64xf32>
    %364 = arith.mulf %363, %362 : vector<8x64xf32>
    %cst_259 = arith.constant 5.000000e-01 : f32
    %365 = vector.broadcast %cst_259 : f32 to vector<8x64xf32>
    %366 = arith.addf %365, %364 : vector<8x64xf32>
    %367 = vector.extract_strided_slice %356 {offsets = [0, 128], sizes = [8, 64], strides = [1, 1]} : vector<8x256xf32> to vector<8x64xf32>
    %368 = vector.extract_strided_slice %356 {offsets = [0, 192], sizes = [8, 64], strides = [1, 1]} : vector<8x256xf32> to vector<8x64xf32>
    %cst_260 = arith.constant 5.000000e-01 : f32
    %369 = vector.broadcast %cst_260 : f32 to vector<8x64xf32>
    %370 = arith.mulf %369, %368 : vector<8x64xf32>
    %cst_261 = arith.constant 5.000000e-01 : f32
    %371 = vector.broadcast %cst_261 : f32 to vector<8x64xf32>
    %372 = arith.addf %371, %370 : vector<8x64xf32>
    %373 = arith.mulf %366, %346 : vector<8x64xf32>
    %374 = arith.mulf %361, %367 : vector<8x64xf32>
    %375 = arith.addf %373, %374 : vector<8x64xf32>
    %376 = math.tanh %375 : vector<8x64xf32>
    %377 = arith.mulf %372, %376 : vector<8x64xf32>
    %378 = vector.extract_strided_slice %377 {offsets = [0, 0], sizes = [8, 32], strides = [1, 1]} : vector<8x64xf32> to vector<8x32xf32>
    %c16_262 = arith.constant 16 : index
    %c0_263 = arith.constant 0 : index
    %379 = vector.load %arg17[%c16_262, %c0_263] : memref<64x32xf32, #tpu.memory_space<vmem>>, vector<8x32xf32>
    tpu.vector_store %arg17[%c16_262, %c0_263], %378 {strides = array<i32>} : memref<64x32xf32, #tpu.memory_space<vmem>>, vector<8x32xf32>,
    %380 = vector.extract_strided_slice %377 {offsets = [0, 32], sizes = [8, 32], strides = [1, 1]} : vector<8x64xf32> to vector<8x32xf32>
    %c40_264 = arith.constant 40 : index
    %c0_265 = arith.constant 0 : index
    %381 = vector.load %arg18[%c40_264, %c0_265] : memref<64x32xf32, #tpu.memory_space<vmem>>, vector<8x32xf32>
    tpu.vector_store %arg18[%c40_264, %c0_265], %380 {strides = array<i32>} : memref<64x32xf32, #tpu.memory_space<vmem>>, vector<8x32xf32>,
    %c24_266 = arith.constant 24 : index
    %c0_267 = arith.constant 0 : index
    %382 = vector.load %arg16[%c24_266, %c0_267] : memref<64x256xf32, #tpu.memory_space<vmem>>, vector<8x256xf32>
    %cst_268 = arith.constant dense<0.000000e+00> : vector<8x256xf32>
    %383 = tpu.matmul %377, %292, %cst_268 {dimension_numbers = #tpu.dot_dimension_numbers<[1], [0], [0], [1], [0, 0, 1, 1], [], []>} : vector<8x64xf32>, vector<64x256xf32>, vector<8x256xf32> -> vector<8x256xf32>
    %384 = arith.addf %382, %383 : vector<8x256xf32>
    %385 = math.tanh %384 : vector<8x256xf32>
    %386 = vector.extract_strided_slice %385 {offsets = [0, 0], sizes = [8, 64], strides = [1, 1]} : vector<8x256xf32> to vector<8x64xf32>
    %cst_269 = arith.constant 5.000000e-01 : f32
    %387 = vector.broadcast %cst_269 : f32 to vector<8x64xf32>
    %388 = arith.mulf %387, %386 : vector<8x64xf32>
    %cst_270 = arith.constant 5.000000e-01 : f32
    %389 = vector.broadcast %cst_270 : f32 to vector<8x64xf32>
    %390 = arith.addf %389, %388 : vector<8x64xf32>
    %391 = vector.extract_strided_slice %385 {offsets = [0, 64], sizes = [8, 64], strides = [1, 1]} : vector<8x256xf32> to vector<8x64xf32>
    %cst_271 = arith.constant 5.000000e-01 : f32
    %392 = vector.broadcast %cst_271 : f32 to vector<8x64xf32>
    %393 = arith.mulf %392, %391 : vector<8x64xf32>
    %cst_272 = arith.constant 5.000000e-01 : f32
    %394 = vector.broadcast %cst_272 : f32 to vector<8x64xf32>
    %395 = arith.addf %394, %393 : vector<8x64xf32>
    %396 = vector.extract_strided_slice %385 {offsets = [0, 128], sizes = [8, 64], strides = [1, 1]} : vector<8x256xf32> to vector<8x64xf32>
    %397 = vector.extract_strided_slice %385 {offsets = [0, 192], sizes = [8, 64], strides = [1, 1]} : vector<8x256xf32> to vector<8x64xf32>
    %cst_273 = arith.constant 5.000000e-01 : f32
    %398 = vector.broadcast %cst_273 : f32 to vector<8x64xf32>
    %399 = arith.mulf %398, %397 : vector<8x64xf32>
    %cst_274 = arith.constant 5.000000e-01 : f32
    %400 = vector.broadcast %cst_274 : f32 to vector<8x64xf32>
    %401 = arith.addf %400, %399 : vector<8x64xf32>
    %402 = arith.mulf %395, %375 : vector<8x64xf32>
    %403 = arith.mulf %390, %396 : vector<8x64xf32>
    %404 = arith.addf %402, %403 : vector<8x64xf32>
    %405 = math.tanh %404 : vector<8x64xf32>
    %406 = arith.mulf %401, %405 : vector<8x64xf32>
    %407 = vector.extract_strided_slice %406 {offsets = [0, 0], sizes = [8, 32], strides = [1, 1]} : vector<8x64xf32> to vector<8x32xf32>
    %c24_275 = arith.constant 24 : index
    %c0_276 = arith.constant 0 : index
    %408 = vector.load %arg17[%c24_275, %c0_276] : memref<64x32xf32, #tpu.memory_space<vmem>>, vector<8x32xf32>
    tpu.vector_store %arg17[%c24_275, %c0_276], %407 {strides = array<i32>} : memref<64x32xf32, #tpu.memory_space<vmem>>, vector<8x32xf32>,
    %409 = vector.extract_strided_slice %406 {offsets = [0, 32], sizes = [8, 32], strides = [1, 1]} : vector<8x64xf32> to vector<8x32xf32>
    %c32_277 = arith.constant 32 : index
    %c0_278 = arith.constant 0 : index
    %410 = vector.load %arg18[%c32_277, %c0_278] : memref<64x32xf32, #tpu.memory_space<vmem>>, vector<8x32xf32>
    tpu.vector_store %arg18[%c32_277, %c0_278], %409 {strides = array<i32>} : memref<64x32xf32, #tpu.memory_space<vmem>>, vector<8x32xf32>,
    %c32_279 = arith.constant 32 : index
    %c0_280 = arith.constant 0 : index
    %411 = vector.load %arg16[%c32_279, %c0_280] : memref<64x256xf32, #tpu.memory_space<vmem>>, vector<8x256xf32>
    %cst_281 = arith.constant dense<0.000000e+00> : vector<8x256xf32>
    %412 = tpu.matmul %406, %292, %cst_281 {dimension_numbers = #tpu.dot_dimension_numbers<[1], [0], [0], [1], [0, 0, 1, 1], [], []>} : vector<8x64xf32>, vector<64x256xf32>, vector<8x256xf32> -> vector<8x256xf32>
    %413 = arith.addf %411, %412 : vector<8x256xf32>
    %414 = math.tanh %413 : vector<8x256xf32>
    %415 = vector.extract_strided_slice %414 {offsets = [0, 0], sizes = [8, 64], strides = [1, 1]} : vector<8x256xf32> to vector<8x64xf32>
    %cst_282 = arith.constant 5.000000e-01 : f32
    %416 = vector.broadcast %cst_282 : f32 to vector<8x64xf32>
    %417 = arith.mulf %416, %415 : vector<8x64xf32>
    %cst_283 = arith.constant 5.000000e-01 : f32
    %418 = vector.broadcast %cst_283 : f32 to vector<8x64xf32>
    %419 = arith.addf %418, %417 : vector<8x64xf32>
    %420 = vector.extract_strided_slice %414 {offsets = [0, 64], sizes = [8, 64], strides = [1, 1]} : vector<8x256xf32> to vector<8x64xf32>
    %cst_284 = arith.constant 5.000000e-01 : f32
    %421 = vector.broadcast %cst_284 : f32 to vector<8x64xf32>
    %422 = arith.mulf %421, %420 : vector<8x64xf32>
    %cst_285 = arith.constant 5.000000e-01 : f32
    %423 = vector.broadcast %cst_285 : f32 to vector<8x64xf32>
    %424 = arith.addf %423, %422 : vector<8x64xf32>
    %425 = vector.extract_strided_slice %414 {offsets = [0, 128], sizes = [8, 64], strides = [1, 1]} : vector<8x256xf32> to vector<8x64xf32>
    %426 = vector.extract_strided_slice %414 {offsets = [0, 192], sizes = [8, 64], strides = [1, 1]} : vector<8x256xf32> to vector<8x64xf32>
    %cst_286 = arith.constant 5.000000e-01 : f32
    %427 = vector.broadcast %cst_286 : f32 to vector<8x64xf32>
    %428 = arith.mulf %427, %426 : vector<8x64xf32>
    %cst_287 = arith.constant 5.000000e-01 : f32
    %429 = vector.broadcast %cst_287 : f32 to vector<8x64xf32>
    %430 = arith.addf %429, %428 : vector<8x64xf32>
    %431 = arith.mulf %424, %404 : vector<8x64xf32>
    %432 = arith.mulf %419, %425 : vector<8x64xf32>
    %433 = arith.addf %431, %432 : vector<8x64xf32>
    %434 = math.tanh %433 : vector<8x64xf32>
    %435 = arith.mulf %430, %434 : vector<8x64xf32>
    %436 = vector.extract_strided_slice %435 {offsets = [0, 0], sizes = [8, 32], strides = [1, 1]} : vector<8x64xf32> to vector<8x32xf32>
    %c32_288 = arith.constant 32 : index
    %c0_289 = arith.constant 0 : index
    %437 = vector.load %arg17[%c32_288, %c0_289] : memref<64x32xf32, #tpu.memory_space<vmem>>, vector<8x32xf32>
    tpu.vector_store %arg17[%c32_288, %c0_289], %436 {strides = array<i32>} : memref<64x32xf32, #tpu.memory_space<vmem>>, vector<8x32xf32>,
    %438 = vector.extract_strided_slice %435 {offsets = [0, 32], sizes = [8, 32], strides = [1, 1]} : vector<8x64xf32> to vector<8x32xf32>
    %c24_290 = arith.constant 24 : index
    %c0_291 = arith.constant 0 : index
    %439 = vector.load %arg18[%c24_290, %c0_291] : memref<64x32xf32, #tpu.memory_space<vmem>>, vector<8x32xf32>
    tpu.vector_store %arg18[%c24_290, %c0_291], %438 {strides = array<i32>} : memref<64x32xf32, #tpu.memory_space<vmem>>, vector<8x32xf32>,
    %c40_292 = arith.constant 40 : index
    %c0_293 = arith.constant 0 : index
    %440 = vector.load %arg16[%c40_292, %c0_293] : memref<64x256xf32, #tpu.memory_space<vmem>>, vector<8x256xf32>
    %cst_294 = arith.constant dense<0.000000e+00> : vector<8x256xf32>
    %441 = tpu.matmul %435, %292, %cst_294 {dimension_numbers = #tpu.dot_dimension_numbers<[1], [0], [0], [1], [0, 0, 1, 1], [], []>} : vector<8x64xf32>, vector<64x256xf32>, vector<8x256xf32> -> vector<8x256xf32>
    %442 = arith.addf %440, %441 : vector<8x256xf32>
    %443 = math.tanh %442 : vector<8x256xf32>
    %444 = vector.extract_strided_slice %443 {offsets = [0, 0], sizes = [8, 64], strides = [1, 1]} : vector<8x256xf32> to vector<8x64xf32>
    %cst_295 = arith.constant 5.000000e-01 : f32
    %445 = vector.broadcast %cst_295 : f32 to vector<8x64xf32>
    %446 = arith.mulf %445, %444 : vector<8x64xf32>
    %cst_296 = arith.constant 5.000000e-01 : f32
    %447 = vector.broadcast %cst_296 : f32 to vector<8x64xf32>
    %448 = arith.addf %447, %446 : vector<8x64xf32>
    %449 = vector.extract_strided_slice %443 {offsets = [0, 64], sizes = [8, 64], strides = [1, 1]} : vector<8x256xf32> to vector<8x64xf32>
    %cst_297 = arith.constant 5.000000e-01 : f32
    %450 = vector.broadcast %cst_297 : f32 to vector<8x64xf32>
    %451 = arith.mulf %450, %449 : vector<8x64xf32>
    %cst_298 = arith.constant 5.000000e-01 : f32
    %452 = vector.broadcast %cst_298 : f32 to vector<8x64xf32>
    %453 = arith.addf %452, %451 : vector<8x64xf32>
    %454 = vector.extract_strided_slice %443 {offsets = [0, 128], sizes = [8, 64], strides = [1, 1]} : vector<8x256xf32> to vector<8x64xf32>
    %455 = vector.extract_strided_slice %443 {offsets = [0, 192], sizes = [8, 64], strides = [1, 1]} : vector<8x256xf32> to vector<8x64xf32>
    %cst_299 = arith.constant 5.000000e-01 : f32
    %456 = vector.broadcast %cst_299 : f32 to vector<8x64xf32>
    %457 = arith.mulf %456, %455 : vector<8x64xf32>
    %cst_300 = arith.constant 5.000000e-01 : f32
    %458 = vector.broadcast %cst_300 : f32 to vector<8x64xf32>
    %459 = arith.addf %458, %457 : vector<8x64xf32>
    %460 = arith.mulf %453, %433 : vector<8x64xf32>
    %461 = arith.mulf %448, %454 : vector<8x64xf32>
    %462 = arith.addf %460, %461 : vector<8x64xf32>
    %463 = math.tanh %462 : vector<8x64xf32>
    %464 = arith.mulf %459, %463 : vector<8x64xf32>
    %465 = vector.extract_strided_slice %464 {offsets = [0, 0], sizes = [8, 32], strides = [1, 1]} : vector<8x64xf32> to vector<8x32xf32>
    %c40_301 = arith.constant 40 : index
    %c0_302 = arith.constant 0 : index
    %466 = vector.load %arg17[%c40_301, %c0_302] : memref<64x32xf32, #tpu.memory_space<vmem>>, vector<8x32xf32>
    tpu.vector_store %arg17[%c40_301, %c0_302], %465 {strides = array<i32>} : memref<64x32xf32, #tpu.memory_space<vmem>>, vector<8x32xf32>,
    %467 = vector.extract_strided_slice %464 {offsets = [0, 32], sizes = [8, 32], strides = [1, 1]} : vector<8x64xf32> to vector<8x32xf32>
    %c16_303 = arith.constant 16 : index
    %c0_304 = arith.constant 0 : index
    %468 = vector.load %arg18[%c16_303, %c0_304] : memref<64x32xf32, #tpu.memory_space<vmem>>, vector<8x32xf32>
    tpu.vector_store %arg18[%c16_303, %c0_304], %467 {strides = array<i32>} : memref<64x32xf32, #tpu.memory_space<vmem>>, vector<8x32xf32>,
    %c48_305 = arith.constant 48 : index
    %c0_306 = arith.constant 0 : index
    %469 = vector.load %arg16[%c48_305, %c0_306] : memref<64x256xf32, #tpu.memory_space<vmem>>, vector<8x256xf32>
    %cst_307 = arith.constant dense<0.000000e+00> : vector<8x256xf32>
    %470 = tpu.matmul %464, %292, %cst_307 {dimension_numbers = #tpu.dot_dimension_numbers<[1], [0], [0], [1], [0, 0, 1, 1], [], []>} : vector<8x64xf32>, vector<64x256xf32>, vector<8x256xf32> -> vector<8x256xf32>
    %471 = arith.addf %469, %470 : vector<8x256xf32>
    %472 = math.tanh %471 : vector<8x256xf32>
    %473 = vector.extract_strided_slice %472 {offsets = [0, 0], sizes = [8, 64], strides = [1, 1]} : vector<8x256xf32> to vector<8x64xf32>
    %cst_308 = arith.constant 5.000000e-01 : f32
    %474 = vector.broadcast %cst_308 : f32 to vector<8x64xf32>
    %475 = arith.mulf %474, %473 : vector<8x64xf32>
    %cst_309 = arith.constant 5.000000e-01 : f32
    %476 = vector.broadcast %cst_309 : f32 to vector<8x64xf32>
    %477 = arith.addf %476, %475 : vector<8x64xf32>
    %478 = vector.extract_strided_slice %472 {offsets = [0, 64], sizes = [8, 64], strides = [1, 1]} : vector<8x256xf32> to vector<8x64xf32>
    %cst_310 = arith.constant 5.000000e-01 : f32
    %479 = vector.broadcast %cst_310 : f32 to vector<8x64xf32>
    %480 = arith.mulf %479, %478 : vector<8x64xf32>
    %cst_311 = arith.constant 5.000000e-01 : f32
    %481 = vector.broadcast %cst_311 : f32 to vector<8x64xf32>
    %482 = arith.addf %481, %480 : vector<8x64xf32>
    %483 = vector.extract_strided_slice %472 {offsets = [0, 128], sizes = [8, 64], strides = [1, 1]} : vector<8x256xf32> to vector<8x64xf32>
    %484 = vector.extract_strided_slice %472 {offsets = [0, 192], sizes = [8, 64], strides = [1, 1]} : vector<8x256xf32> to vector<8x64xf32>
    %cst_312 = arith.constant 5.000000e-01 : f32
    %485 = vector.broadcast %cst_312 : f32 to vector<8x64xf32>
    %486 = arith.mulf %485, %484 : vector<8x64xf32>
    %cst_313 = arith.constant 5.000000e-01 : f32
    %487 = vector.broadcast %cst_313 : f32 to vector<8x64xf32>
    %488 = arith.addf %487, %486 : vector<8x64xf32>
    %489 = arith.mulf %482, %462 : vector<8x64xf32>
    %490 = arith.mulf %477, %483 : vector<8x64xf32>
    %491 = arith.addf %489, %490 : vector<8x64xf32>
    %492 = math.tanh %491 : vector<8x64xf32>
    %493 = arith.mulf %488, %492 : vector<8x64xf32>
    %494 = vector.extract_strided_slice %493 {offsets = [0, 0], sizes = [8, 32], strides = [1, 1]} : vector<8x64xf32> to vector<8x32xf32>
    %c48_314 = arith.constant 48 : index
    %c0_315 = arith.constant 0 : index
    %495 = vector.load %arg17[%c48_314, %c0_315] : memref<64x32xf32, #tpu.memory_space<vmem>>, vector<8x32xf32>
    tpu.vector_store %arg17[%c48_314, %c0_315], %494 {strides = array<i32>} : memref<64x32xf32, #tpu.memory_space<vmem>>, vector<8x32xf32>,
    %496 = vector.extract_strided_slice %493 {offsets = [0, 32], sizes = [8, 32], strides = [1, 1]} : vector<8x64xf32> to vector<8x32xf32>
    %c8_316 = arith.constant 8 : index
    %c0_317 = arith.constant 0 : index
    %497 = vector.load %arg18[%c8_316, %c0_317] : memref<64x32xf32, #tpu.memory_space<vmem>>, vector<8x32xf32>
    tpu.vector_store %arg18[%c8_316, %c0_317], %496 {strides = array<i32>} : memref<64x32xf32, #tpu.memory_space<vmem>>, vector<8x32xf32>,
    %c56_318 = arith.constant 56 : index
    %c0_319 = arith.constant 0 : index
    %498 = vector.load %arg16[%c56_318, %c0_319] : memref<64x256xf32, #tpu.memory_space<vmem>>, vector<8x256xf32>
    %cst_320 = arith.constant dense<0.000000e+00> : vector<8x256xf32>
    %499 = tpu.matmul %493, %292, %cst_320 {dimension_numbers = #tpu.dot_dimension_numbers<[1], [0], [0], [1], [0, 0, 1, 1], [], []>} : vector<8x64xf32>, vector<64x256xf32>, vector<8x256xf32> -> vector<8x256xf32>
    %500 = arith.addf %498, %499 : vector<8x256xf32>
    %501 = math.tanh %500 : vector<8x256xf32>
    %502 = vector.extract_strided_slice %501 {offsets = [0, 0], sizes = [8, 64], strides = [1, 1]} : vector<8x256xf32> to vector<8x64xf32>
    %cst_321 = arith.constant 5.000000e-01 : f32
    %503 = vector.broadcast %cst_321 : f32 to vector<8x64xf32>
    %504 = arith.mulf %503, %502 : vector<8x64xf32>
    %cst_322 = arith.constant 5.000000e-01 : f32
    %505 = vector.broadcast %cst_322 : f32 to vector<8x64xf32>
    %506 = arith.addf %505, %504 : vector<8x64xf32>
    %507 = vector.extract_strided_slice %501 {offsets = [0, 64], sizes = [8, 64], strides = [1, 1]} : vector<8x256xf32> to vector<8x64xf32>
    %cst_323 = arith.constant 5.000000e-01 : f32
    %508 = vector.broadcast %cst_323 : f32 to vector<8x64xf32>
    %509 = arith.mulf %508, %507 : vector<8x64xf32>
    %cst_324 = arith.constant 5.000000e-01 : f32
    %510 = vector.broadcast %cst_324 : f32 to vector<8x64xf32>
    %511 = arith.addf %510, %509 : vector<8x64xf32>
    %512 = vector.extract_strided_slice %501 {offsets = [0, 128], sizes = [8, 64], strides = [1, 1]} : vector<8x256xf32> to vector<8x64xf32>
    %513 = vector.extract_strided_slice %501 {offsets = [0, 192], sizes = [8, 64], strides = [1, 1]} : vector<8x256xf32> to vector<8x64xf32>
    %cst_325 = arith.constant 5.000000e-01 : f32
    %514 = vector.broadcast %cst_325 : f32 to vector<8x64xf32>
    %515 = arith.mulf %514, %513 : vector<8x64xf32>
    %cst_326 = arith.constant 5.000000e-01 : f32
    %516 = vector.broadcast %cst_326 : f32 to vector<8x64xf32>
    %517 = arith.addf %516, %515 : vector<8x64xf32>
    %518 = arith.mulf %511, %491 : vector<8x64xf32>
    %519 = arith.mulf %506, %512 : vector<8x64xf32>
    %520 = arith.addf %518, %519 : vector<8x64xf32>
    %521 = math.tanh %520 : vector<8x64xf32>
    %522 = arith.mulf %517, %521 : vector<8x64xf32>
    %523 = vector.extract_strided_slice %522 {offsets = [0, 0], sizes = [8, 32], strides = [1, 1]} : vector<8x64xf32> to vector<8x32xf32>
    %c56_327 = arith.constant 56 : index
    %c0_328 = arith.constant 0 : index
    %524 = vector.load %arg17[%c56_327, %c0_328] : memref<64x32xf32, #tpu.memory_space<vmem>>, vector<8x32xf32>
    tpu.vector_store %arg17[%c56_327, %c0_328], %523 {strides = array<i32>} : memref<64x32xf32, #tpu.memory_space<vmem>>, vector<8x32xf32>,
    %525 = vector.extract_strided_slice %522 {offsets = [0, 32], sizes = [8, 32], strides = [1, 1]} : vector<8x64xf32> to vector<8x32xf32>
    %c0_329 = arith.constant 0 : index
    %c0_330 = arith.constant 0 : index
    %526 = vector.load %arg18[%c0_329, %c0_330] : memref<64x32xf32, #tpu.memory_space<vmem>>, vector<8x32xf32>
    tpu.vector_store %arg18[%c0_329, %c0_330], %525 {strides = array<i32>} : memref<64x32xf32, #tpu.memory_space<vmem>>, vector<8x32xf32>,
    %c0_331 = arith.constant 0 : index
    %c0_332 = arith.constant 0 : index
    %527 = vector.load %arg17[%c0_331, %c0_332] : memref<64x32xf32, #tpu.memory_space<vmem>>, vector<64x32xf32>
    %c0_333 = arith.constant 0 : index
    %c0_334 = arith.constant 0 : index
    %528 = vector.load %arg5[%c0_333, %c0_334] : memref<32x128xf32, #tpu.memory_space<vmem>>, vector<32x128xf32>
    %cst_335 = arith.constant dense<0.000000e+00> : vector<64x128xf32>
    %529 = tpu.matmul %527, %528, %cst_335 {dimension_numbers = #tpu.dot_dimension_numbers<[1], [0], [0], [1], [0, 0, 1, 1], [], []>} : vector<64x32xf32>, vector<32x128xf32>, vector<64x128xf32> -> vector<64x128xf32>
    %c0_336 = arith.constant 0 : index
    %c0_337 = arith.constant 0 : index
    %530 = vector.load %arg18[%c0_336, %c0_337] : memref<64x32xf32, #tpu.memory_space<vmem>>, vector<64x32xf32>
    %c0_338 = arith.constant 0 : index
    %c0_339 = arith.constant 0 : index
    %531 = vector.load %arg6[%c0_338, %c0_339] : memref<32x128xf32, #tpu.memory_space<vmem>>, vector<32x128xf32>
    %cst_340 = arith.constant dense<0.000000e+00> : vector<64x128xf32>
    %532 = tpu.matmul %530, %531, %cst_340 {dimension_numbers = #tpu.dot_dimension_numbers<[1], [0], [0], [1], [0, 0, 1, 1], [], []>} : vector<64x32xf32>, vector<32x128xf32>, vector<64x128xf32> -> vector<64x128xf32>
    %533 = arith.addf %529, %532 : vector<64x128xf32>
    %c0_341 = arith.constant 0 : index
    %c0_342 = arith.constant 0 : index
    %534 = vector.load %arg8[%c0_341, %c0_342] : memref<1x128xf32, #tpu.memory_space<vmem>>, vector<1x128xf32>
    %535 = vector.broadcast %534 : vector<1x128xf32> to vector<64x128xf32>
    %536 = arith.addf %533, %535 : vector<64x128xf32>
    %c0_343 = arith.constant 0 : index
    %c0_344 = arith.constant 0 : index
    %537 = vector.load %arg19[%c0_343, %c0_344] : memref<64x128xf32, #tpu.memory_space<vmem>>, vector<64x128xf32>
    tpu.vector_store %arg19[%c0_343, %c0_344], %536 {strides = array<i32>} : memref<64x128xf32, #tpu.memory_space<vmem>>, vector<64x128xf32>,
    %c0_345 = arith.constant 0 : index
    %c0_346 = arith.constant 0 : index
    %538 = vector.load %arg7[%c0_345, %c0_346] : memref<32x128xf32, #tpu.memory_space<vmem>>, vector<32x128xf32>
    %cst_347 = arith.constant 0.000000e+00 : f32
    %539 = vector.broadcast %cst_347 : f32 to vector<8x32xf32>
    %cst_348 = arith.constant 0.000000e+00 : f32
    %540 = vector.broadcast %cst_348 : f32 to vector<8x32xf32>
    %c0_349 = arith.constant 0 : index
    %c0_350 = arith.constant 0 : index
    %541 = vector.load %arg19[%c0_349, %c0_350] : memref<64x128xf32, #tpu.memory_space<vmem>>, vector<8x128xf32>
    %cst_351 = arith.constant dense<0.000000e+00> : vector<8x128xf32>
    %542 = tpu.matmul %539, %538, %cst_351 {dimension_numbers = #tpu.dot_dimension_numbers<[1], [0], [0], [1], [0, 0, 1, 1], [], []>} : vector<8x32xf32>, vector<32x128xf32>, vector<8x128xf32> -> vector<8x128xf32>
    %543 = arith.addf %541, %542 : vector<8x128xf32>
    %544 = math.tanh %543 : vector<8x128xf32>
    %545 = vector.extract_strided_slice %544 {offsets = [0, 0], sizes = [8, 32], strides = [1, 1]} : vector<8x128xf32> to vector<8x32xf32>
    %cst_352 = arith.constant 5.000000e-01 : f32
    %546 = vector.broadcast %cst_352 : f32 to vector<8x32xf32>
    %547 = arith.mulf %546, %545 : vector<8x32xf32>
    %cst_353 = arith.constant 5.000000e-01 : f32
    %548 = vector.broadcast %cst_353 : f32 to vector<8x32xf32>
    %549 = arith.addf %548, %547 : vector<8x32xf32>
    %550 = vector.extract_strided_slice %544 {offsets = [0, 32], sizes = [8, 32], strides = [1, 1]} : vector<8x128xf32> to vector<8x32xf32>
    %cst_354 = arith.constant 5.000000e-01 : f32
    %551 = vector.broadcast %cst_354 : f32 to vector<8x32xf32>
    %552 = arith.mulf %551, %550 : vector<8x32xf32>
    %cst_355 = arith.constant 5.000000e-01 : f32
    %553 = vector.broadcast %cst_355 : f32 to vector<8x32xf32>
    %554 = arith.addf %553, %552 : vector<8x32xf32>
    %555 = vector.extract_strided_slice %544 {offsets = [0, 64], sizes = [8, 32], strides = [1, 1]} : vector<8x128xf32> to vector<8x32xf32>
    %556 = vector.extract_strided_slice %544 {offsets = [0, 96], sizes = [8, 32], strides = [1, 1]} : vector<8x128xf32> to vector<8x32xf32>
    %cst_356 = arith.constant 5.000000e-01 : f32
    %557 = vector.broadcast %cst_356 : f32 to vector<8x32xf32>
    %558 = arith.mulf %557, %556 : vector<8x32xf32>
    %cst_357 = arith.constant 5.000000e-01 : f32
    %559 = vector.broadcast %cst_357 : f32 to vector<8x32xf32>
    %560 = arith.addf %559, %558 : vector<8x32xf32>
    %561 = arith.mulf %554, %540 : vector<8x32xf32>
    %562 = arith.mulf %549, %555 : vector<8x32xf32>
    %563 = arith.addf %561, %562 : vector<8x32xf32>
    %564 = math.tanh %563 : vector<8x32xf32>
    %565 = arith.mulf %560, %564 : vector<8x32xf32>
    %c8_358 = arith.constant 8 : index
    %c0_359 = arith.constant 0 : index
    %566 = vector.load %arg19[%c8_358, %c0_359] : memref<64x128xf32, #tpu.memory_space<vmem>>, vector<8x128xf32>
    %cst_360 = arith.constant dense<0.000000e+00> : vector<8x128xf32>
    %567 = tpu.matmul %565, %538, %cst_360 {dimension_numbers = #tpu.dot_dimension_numbers<[1], [0], [0], [1], [0, 0, 1, 1], [], []>} : vector<8x32xf32>, vector<32x128xf32>, vector<8x128xf32> -> vector<8x128xf32>
    %568 = arith.addf %566, %567 : vector<8x128xf32>
    %569 = math.tanh %568 : vector<8x128xf32>
    %570 = vector.extract_strided_slice %569 {offsets = [0, 0], sizes = [8, 32], strides = [1, 1]} : vector<8x128xf32> to vector<8x32xf32>
    %cst_361 = arith.constant 5.000000e-01 : f32
    %571 = vector.broadcast %cst_361 : f32 to vector<8x32xf32>
    %572 = arith.mulf %571, %570 : vector<8x32xf32>
    %cst_362 = arith.constant 5.000000e-01 : f32
    %573 = vector.broadcast %cst_362 : f32 to vector<8x32xf32>
    %574 = arith.addf %573, %572 : vector<8x32xf32>
    %575 = vector.extract_strided_slice %569 {offsets = [0, 32], sizes = [8, 32], strides = [1, 1]} : vector<8x128xf32> to vector<8x32xf32>
    %cst_363 = arith.constant 5.000000e-01 : f32
    %576 = vector.broadcast %cst_363 : f32 to vector<8x32xf32>
    %577 = arith.mulf %576, %575 : vector<8x32xf32>
    %cst_364 = arith.constant 5.000000e-01 : f32
    %578 = vector.broadcast %cst_364 : f32 to vector<8x32xf32>
    %579 = arith.addf %578, %577 : vector<8x32xf32>
    %580 = vector.extract_strided_slice %569 {offsets = [0, 64], sizes = [8, 32], strides = [1, 1]} : vector<8x128xf32> to vector<8x32xf32>
    %581 = vector.extract_strided_slice %569 {offsets = [0, 96], sizes = [8, 32], strides = [1, 1]} : vector<8x128xf32> to vector<8x32xf32>
    %cst_365 = arith.constant 5.000000e-01 : f32
    %582 = vector.broadcast %cst_365 : f32 to vector<8x32xf32>
    %583 = arith.mulf %582, %581 : vector<8x32xf32>
    %cst_366 = arith.constant 5.000000e-01 : f32
    %584 = vector.broadcast %cst_366 : f32 to vector<8x32xf32>
    %585 = arith.addf %584, %583 : vector<8x32xf32>
    %586 = arith.mulf %579, %563 : vector<8x32xf32>
    %587 = arith.mulf %574, %580 : vector<8x32xf32>
    %588 = arith.addf %586, %587 : vector<8x32xf32>
    %589 = math.tanh %588 : vector<8x32xf32>
    %590 = arith.mulf %585, %589 : vector<8x32xf32>
    %c16_367 = arith.constant 16 : index
    %c0_368 = arith.constant 0 : index
    %591 = vector.load %arg19[%c16_367, %c0_368] : memref<64x128xf32, #tpu.memory_space<vmem>>, vector<8x128xf32>
    %cst_369 = arith.constant dense<0.000000e+00> : vector<8x128xf32>
    %592 = tpu.matmul %590, %538, %cst_369 {dimension_numbers = #tpu.dot_dimension_numbers<[1], [0], [0], [1], [0, 0, 1, 1], [], []>} : vector<8x32xf32>, vector<32x128xf32>, vector<8x128xf32> -> vector<8x128xf32>
    %593 = arith.addf %591, %592 : vector<8x128xf32>
    %594 = math.tanh %593 : vector<8x128xf32>
    %595 = vector.extract_strided_slice %594 {offsets = [0, 0], sizes = [8, 32], strides = [1, 1]} : vector<8x128xf32> to vector<8x32xf32>
    %cst_370 = arith.constant 5.000000e-01 : f32
    %596 = vector.broadcast %cst_370 : f32 to vector<8x32xf32>
    %597 = arith.mulf %596, %595 : vector<8x32xf32>
    %cst_371 = arith.constant 5.000000e-01 : f32
    %598 = vector.broadcast %cst_371 : f32 to vector<8x32xf32>
    %599 = arith.addf %598, %597 : vector<8x32xf32>
    %600 = vector.extract_strided_slice %594 {offsets = [0, 32], sizes = [8, 32], strides = [1, 1]} : vector<8x128xf32> to vector<8x32xf32>
    %cst_372 = arith.constant 5.000000e-01 : f32
    %601 = vector.broadcast %cst_372 : f32 to vector<8x32xf32>
    %602 = arith.mulf %601, %600 : vector<8x32xf32>
    %cst_373 = arith.constant 5.000000e-01 : f32
    %603 = vector.broadcast %cst_373 : f32 to vector<8x32xf32>
    %604 = arith.addf %603, %602 : vector<8x32xf32>
    %605 = vector.extract_strided_slice %594 {offsets = [0, 64], sizes = [8, 32], strides = [1, 1]} : vector<8x128xf32> to vector<8x32xf32>
    %606 = vector.extract_strided_slice %594 {offsets = [0, 96], sizes = [8, 32], strides = [1, 1]} : vector<8x128xf32> to vector<8x32xf32>
    %cst_374 = arith.constant 5.000000e-01 : f32
    %607 = vector.broadcast %cst_374 : f32 to vector<8x32xf32>
    %608 = arith.mulf %607, %606 : vector<8x32xf32>
    %cst_375 = arith.constant 5.000000e-01 : f32
    %609 = vector.broadcast %cst_375 : f32 to vector<8x32xf32>
    %610 = arith.addf %609, %608 : vector<8x32xf32>
    %611 = arith.mulf %604, %588 : vector<8x32xf32>
    %612 = arith.mulf %599, %605 : vector<8x32xf32>
    %613 = arith.addf %611, %612 : vector<8x32xf32>
    %614 = math.tanh %613 : vector<8x32xf32>
    %615 = arith.mulf %610, %614 : vector<8x32xf32>
    %c24_376 = arith.constant 24 : index
    %c0_377 = arith.constant 0 : index
    %616 = vector.load %arg19[%c24_376, %c0_377] : memref<64x128xf32, #tpu.memory_space<vmem>>, vector<8x128xf32>
    %cst_378 = arith.constant dense<0.000000e+00> : vector<8x128xf32>
    %617 = tpu.matmul %615, %538, %cst_378 {dimension_numbers = #tpu.dot_dimension_numbers<[1], [0], [0], [1], [0, 0, 1, 1], [], []>} : vector<8x32xf32>, vector<32x128xf32>, vector<8x128xf32> -> vector<8x128xf32>
    %618 = arith.addf %616, %617 : vector<8x128xf32>
    %619 = math.tanh %618 : vector<8x128xf32>
    %620 = vector.extract_strided_slice %619 {offsets = [0, 0], sizes = [8, 32], strides = [1, 1]} : vector<8x128xf32> to vector<8x32xf32>
    %cst_379 = arith.constant 5.000000e-01 : f32
    %621 = vector.broadcast %cst_379 : f32 to vector<8x32xf32>
    %622 = arith.mulf %621, %620 : vector<8x32xf32>
    %cst_380 = arith.constant 5.000000e-01 : f32
    %623 = vector.broadcast %cst_380 : f32 to vector<8x32xf32>
    %624 = arith.addf %623, %622 : vector<8x32xf32>
    %625 = vector.extract_strided_slice %619 {offsets = [0, 32], sizes = [8, 32], strides = [1, 1]} : vector<8x128xf32> to vector<8x32xf32>
    %cst_381 = arith.constant 5.000000e-01 : f32
    %626 = vector.broadcast %cst_381 : f32 to vector<8x32xf32>
    %627 = arith.mulf %626, %625 : vector<8x32xf32>
    %cst_382 = arith.constant 5.000000e-01 : f32
    %628 = vector.broadcast %cst_382 : f32 to vector<8x32xf32>
    %629 = arith.addf %628, %627 : vector<8x32xf32>
    %630 = vector.extract_strided_slice %619 {offsets = [0, 64], sizes = [8, 32], strides = [1, 1]} : vector<8x128xf32> to vector<8x32xf32>
    %631 = vector.extract_strided_slice %619 {offsets = [0, 96], sizes = [8, 32], strides = [1, 1]} : vector<8x128xf32> to vector<8x32xf32>
    %cst_383 = arith.constant 5.000000e-01 : f32
    %632 = vector.broadcast %cst_383 : f32 to vector<8x32xf32>
    %633 = arith.mulf %632, %631 : vector<8x32xf32>
    %cst_384 = arith.constant 5.000000e-01 : f32
    %634 = vector.broadcast %cst_384 : f32 to vector<8x32xf32>
    %635 = arith.addf %634, %633 : vector<8x32xf32>
    %636 = arith.mulf %629, %613 : vector<8x32xf32>
    %637 = arith.mulf %624, %630 : vector<8x32xf32>
    %638 = arith.addf %636, %637 : vector<8x32xf32>
    %639 = math.tanh %638 : vector<8x32xf32>
    %640 = arith.mulf %635, %639 : vector<8x32xf32>
    %c32_385 = arith.constant 32 : index
    %c0_386 = arith.constant 0 : index
    %641 = vector.load %arg19[%c32_385, %c0_386] : memref<64x128xf32, #tpu.memory_space<vmem>>, vector<8x128xf32>
    %cst_387 = arith.constant dense<0.000000e+00> : vector<8x128xf32>
    %642 = tpu.matmul %640, %538, %cst_387 {dimension_numbers = #tpu.dot_dimension_numbers<[1], [0], [0], [1], [0, 0, 1, 1], [], []>} : vector<8x32xf32>, vector<32x128xf32>, vector<8x128xf32> -> vector<8x128xf32>
    %643 = arith.addf %641, %642 : vector<8x128xf32>
    %644 = math.tanh %643 : vector<8x128xf32>
    %645 = vector.extract_strided_slice %644 {offsets = [0, 0], sizes = [8, 32], strides = [1, 1]} : vector<8x128xf32> to vector<8x32xf32>
    %cst_388 = arith.constant 5.000000e-01 : f32
    %646 = vector.broadcast %cst_388 : f32 to vector<8x32xf32>
    %647 = arith.mulf %646, %645 : vector<8x32xf32>
    %cst_389 = arith.constant 5.000000e-01 : f32
    %648 = vector.broadcast %cst_389 : f32 to vector<8x32xf32>
    %649 = arith.addf %648, %647 : vector<8x32xf32>
    %650 = vector.extract_strided_slice %644 {offsets = [0, 32], sizes = [8, 32], strides = [1, 1]} : vector<8x128xf32> to vector<8x32xf32>
    %cst_390 = arith.constant 5.000000e-01 : f32
    %651 = vector.broadcast %cst_390 : f32 to vector<8x32xf32>
    %652 = arith.mulf %651, %650 : vector<8x32xf32>
    %cst_391 = arith.constant 5.000000e-01 : f32
    %653 = vector.broadcast %cst_391 : f32 to vector<8x32xf32>
    %654 = arith.addf %653, %652 : vector<8x32xf32>
    %655 = vector.extract_strided_slice %644 {offsets = [0, 64], sizes = [8, 32], strides = [1, 1]} : vector<8x128xf32> to vector<8x32xf32>
    %656 = vector.extract_strided_slice %644 {offsets = [0, 96], sizes = [8, 32], strides = [1, 1]} : vector<8x128xf32> to vector<8x32xf32>
    %cst_392 = arith.constant 5.000000e-01 : f32
    %657 = vector.broadcast %cst_392 : f32 to vector<8x32xf32>
    %658 = arith.mulf %657, %656 : vector<8x32xf32>
    %cst_393 = arith.constant 5.000000e-01 : f32
    %659 = vector.broadcast %cst_393 : f32 to vector<8x32xf32>
    %660 = arith.addf %659, %658 : vector<8x32xf32>
    %661 = arith.mulf %654, %638 : vector<8x32xf32>
    %662 = arith.mulf %649, %655 : vector<8x32xf32>
    %663 = arith.addf %661, %662 : vector<8x32xf32>
    %664 = math.tanh %663 : vector<8x32xf32>
    %665 = arith.mulf %660, %664 : vector<8x32xf32>
    %c40_394 = arith.constant 40 : index
    %c0_395 = arith.constant 0 : index
    %666 = vector.load %arg19[%c40_394, %c0_395] : memref<64x128xf32, #tpu.memory_space<vmem>>, vector<8x128xf32>
    %cst_396 = arith.constant dense<0.000000e+00> : vector<8x128xf32>
    %667 = tpu.matmul %665, %538, %cst_396 {dimension_numbers = #tpu.dot_dimension_numbers<[1], [0], [0], [1], [0, 0, 1, 1], [], []>} : vector<8x32xf32>, vector<32x128xf32>, vector<8x128xf32> -> vector<8x128xf32>
    %668 = arith.addf %666, %667 : vector<8x128xf32>
    %669 = math.tanh %668 : vector<8x128xf32>
    %670 = vector.extract_strided_slice %669 {offsets = [0, 0], sizes = [8, 32], strides = [1, 1]} : vector<8x128xf32> to vector<8x32xf32>
    %cst_397 = arith.constant 5.000000e-01 : f32
    %671 = vector.broadcast %cst_397 : f32 to vector<8x32xf32>
    %672 = arith.mulf %671, %670 : vector<8x32xf32>
    %cst_398 = arith.constant 5.000000e-01 : f32
    %673 = vector.broadcast %cst_398 : f32 to vector<8x32xf32>
    %674 = arith.addf %673, %672 : vector<8x32xf32>
    %675 = vector.extract_strided_slice %669 {offsets = [0, 32], sizes = [8, 32], strides = [1, 1]} : vector<8x128xf32> to vector<8x32xf32>
    %cst_399 = arith.constant 5.000000e-01 : f32
    %676 = vector.broadcast %cst_399 : f32 to vector<8x32xf32>
    %677 = arith.mulf %676, %675 : vector<8x32xf32>
    %cst_400 = arith.constant 5.000000e-01 : f32
    %678 = vector.broadcast %cst_400 : f32 to vector<8x32xf32>
    %679 = arith.addf %678, %677 : vector<8x32xf32>
    %680 = vector.extract_strided_slice %669 {offsets = [0, 64], sizes = [8, 32], strides = [1, 1]} : vector<8x128xf32> to vector<8x32xf32>
    %681 = vector.extract_strided_slice %669 {offsets = [0, 96], sizes = [8, 32], strides = [1, 1]} : vector<8x128xf32> to vector<8x32xf32>
    %cst_401 = arith.constant 5.000000e-01 : f32
    %682 = vector.broadcast %cst_401 : f32 to vector<8x32xf32>
    %683 = arith.mulf %682, %681 : vector<8x32xf32>
    %cst_402 = arith.constant 5.000000e-01 : f32
    %684 = vector.broadcast %cst_402 : f32 to vector<8x32xf32>
    %685 = arith.addf %684, %683 : vector<8x32xf32>
    %686 = arith.mulf %679, %663 : vector<8x32xf32>
    %687 = arith.mulf %674, %680 : vector<8x32xf32>
    %688 = arith.addf %686, %687 : vector<8x32xf32>
    %689 = math.tanh %688 : vector<8x32xf32>
    %690 = arith.mulf %685, %689 : vector<8x32xf32>
    %c48_403 = arith.constant 48 : index
    %c0_404 = arith.constant 0 : index
    %691 = vector.load %arg19[%c48_403, %c0_404] : memref<64x128xf32, #tpu.memory_space<vmem>>, vector<8x128xf32>
    %cst_405 = arith.constant dense<0.000000e+00> : vector<8x128xf32>
    %692 = tpu.matmul %690, %538, %cst_405 {dimension_numbers = #tpu.dot_dimension_numbers<[1], [0], [0], [1], [0, 0, 1, 1], [], []>} : vector<8x32xf32>, vector<32x128xf32>, vector<8x128xf32> -> vector<8x128xf32>
    %693 = arith.addf %691, %692 : vector<8x128xf32>
    %694 = math.tanh %693 : vector<8x128xf32>
    %695 = vector.extract_strided_slice %694 {offsets = [0, 0], sizes = [8, 32], strides = [1, 1]} : vector<8x128xf32> to vector<8x32xf32>
    %cst_406 = arith.constant 5.000000e-01 : f32
    %696 = vector.broadcast %cst_406 : f32 to vector<8x32xf32>
    %697 = arith.mulf %696, %695 : vector<8x32xf32>
    %cst_407 = arith.constant 5.000000e-01 : f32
    %698 = vector.broadcast %cst_407 : f32 to vector<8x32xf32>
    %699 = arith.addf %698, %697 : vector<8x32xf32>
    %700 = vector.extract_strided_slice %694 {offsets = [0, 32], sizes = [8, 32], strides = [1, 1]} : vector<8x128xf32> to vector<8x32xf32>
    %cst_408 = arith.constant 5.000000e-01 : f32
    %701 = vector.broadcast %cst_408 : f32 to vector<8x32xf32>
    %702 = arith.mulf %701, %700 : vector<8x32xf32>
    %cst_409 = arith.constant 5.000000e-01 : f32
    %703 = vector.broadcast %cst_409 : f32 to vector<8x32xf32>
    %704 = arith.addf %703, %702 : vector<8x32xf32>
    %705 = vector.extract_strided_slice %694 {offsets = [0, 64], sizes = [8, 32], strides = [1, 1]} : vector<8x128xf32> to vector<8x32xf32>
    %706 = vector.extract_strided_slice %694 {offsets = [0, 96], sizes = [8, 32], strides = [1, 1]} : vector<8x128xf32> to vector<8x32xf32>
    %cst_410 = arith.constant 5.000000e-01 : f32
    %707 = vector.broadcast %cst_410 : f32 to vector<8x32xf32>
    %708 = arith.mulf %707, %706 : vector<8x32xf32>
    %cst_411 = arith.constant 5.000000e-01 : f32
    %709 = vector.broadcast %cst_411 : f32 to vector<8x32xf32>
    %710 = arith.addf %709, %708 : vector<8x32xf32>
    %711 = arith.mulf %704, %688 : vector<8x32xf32>
    %712 = arith.mulf %699, %705 : vector<8x32xf32>
    %713 = arith.addf %711, %712 : vector<8x32xf32>
    %714 = math.tanh %713 : vector<8x32xf32>
    %715 = arith.mulf %710, %714 : vector<8x32xf32>
    %c56_412 = arith.constant 56 : index
    %c0_413 = arith.constant 0 : index
    %716 = vector.load %arg19[%c56_412, %c0_413] : memref<64x128xf32, #tpu.memory_space<vmem>>, vector<8x128xf32>
    %cst_414 = arith.constant dense<0.000000e+00> : vector<8x128xf32>
    %717 = tpu.matmul %715, %538, %cst_414 {dimension_numbers = #tpu.dot_dimension_numbers<[1], [0], [0], [1], [0, 0, 1, 1], [], []>} : vector<8x32xf32>, vector<32x128xf32>, vector<8x128xf32> -> vector<8x128xf32>
    %718 = arith.addf %716, %717 : vector<8x128xf32>
    %719 = math.tanh %718 : vector<8x128xf32>
    %720 = vector.extract_strided_slice %719 {offsets = [0, 0], sizes = [8, 32], strides = [1, 1]} : vector<8x128xf32> to vector<8x32xf32>
    %cst_415 = arith.constant 5.000000e-01 : f32
    %721 = vector.broadcast %cst_415 : f32 to vector<8x32xf32>
    %722 = arith.mulf %721, %720 : vector<8x32xf32>
    %cst_416 = arith.constant 5.000000e-01 : f32
    %723 = vector.broadcast %cst_416 : f32 to vector<8x32xf32>
    %724 = arith.addf %723, %722 : vector<8x32xf32>
    %725 = vector.extract_strided_slice %719 {offsets = [0, 32], sizes = [8, 32], strides = [1, 1]} : vector<8x128xf32> to vector<8x32xf32>
    %cst_417 = arith.constant 5.000000e-01 : f32
    %726 = vector.broadcast %cst_417 : f32 to vector<8x32xf32>
    %727 = arith.mulf %726, %725 : vector<8x32xf32>
    %cst_418 = arith.constant 5.000000e-01 : f32
    %728 = vector.broadcast %cst_418 : f32 to vector<8x32xf32>
    %729 = arith.addf %728, %727 : vector<8x32xf32>
    %730 = vector.extract_strided_slice %719 {offsets = [0, 64], sizes = [8, 32], strides = [1, 1]} : vector<8x128xf32> to vector<8x32xf32>
    %731 = vector.extract_strided_slice %719 {offsets = [0, 96], sizes = [8, 32], strides = [1, 1]} : vector<8x128xf32> to vector<8x32xf32>
    %cst_419 = arith.constant 5.000000e-01 : f32
    %732 = vector.broadcast %cst_419 : f32 to vector<8x32xf32>
    %733 = arith.mulf %732, %731 : vector<8x32xf32>
    %cst_420 = arith.constant 5.000000e-01 : f32
    %734 = vector.broadcast %cst_420 : f32 to vector<8x32xf32>
    %735 = arith.addf %734, %733 : vector<8x32xf32>
    %736 = arith.mulf %729, %713 : vector<8x32xf32>
    %737 = arith.mulf %724, %730 : vector<8x32xf32>
    %738 = arith.addf %736, %737 : vector<8x32xf32>
    %739 = math.tanh %738 : vector<8x32xf32>
    %740 = arith.mulf %735, %739 : vector<8x32xf32>
    %c56_421 = arith.constant 56 : index
    %c0_422 = arith.constant 0 : index
    %741 = vector.load %arg17[%c56_421, %c0_422] : memref<64x32xf32, #tpu.memory_space<vmem>>, vector<8x32xf32>
    %c56_423 = arith.constant 56 : index
    %c0_424 = arith.constant 0 : index
    %742 = vector.load %arg18[%c56_423, %c0_424] : memref<64x32xf32, #tpu.memory_space<vmem>>, vector<8x32xf32>
    %c0_425 = arith.constant 0 : index
    %c0_426 = arith.constant 0 : index
    %743 = vector.load %arg9[%c0_425, %c0_426] : memref<32x128xf32, #tpu.memory_space<vmem>>, vector<32x128xf32>
    %cst_427 = arith.constant dense<0.000000e+00> : vector<8x128xf32>
    %744 = tpu.matmul %741, %743, %cst_427 {dimension_numbers = #tpu.dot_dimension_numbers<[1], [0], [0], [1], [0, 0, 1, 1], [], []>} : vector<8x32xf32>, vector<32x128xf32>, vector<8x128xf32> -> vector<8x128xf32>
    %c0_428 = arith.constant 0 : index
    %c0_429 = arith.constant 0 : index
    %745 = vector.load %arg10[%c0_428, %c0_429] : memref<32x128xf32, #tpu.memory_space<vmem>>, vector<32x128xf32>
    %cst_430 = arith.constant dense<0.000000e+00> : vector<8x128xf32>
    %746 = tpu.matmul %742, %745, %cst_430 {dimension_numbers = #tpu.dot_dimension_numbers<[1], [0], [0], [1], [0, 0, 1, 1], [], []>} : vector<8x32xf32>, vector<32x128xf32>, vector<8x128xf32> -> vector<8x128xf32>
    %747 = arith.addf %744, %746 : vector<8x128xf32>
    %c0_431 = arith.constant 0 : index
    %c0_432 = arith.constant 0 : index
    %748 = vector.load %arg11[%c0_431, %c0_432] : memref<1x128xf32, #tpu.memory_space<vmem>>, vector<1x128xf32>
    %749 = vector.broadcast %748 : vector<1x128xf32> to vector<8x128xf32>
    %750 = arith.addf %747, %749 : vector<8x128xf32>
    %751 = math.tanh %750 : vector<8x128xf32>
    %752 = vector.extract_strided_slice %751 {offsets = [0, 0], sizes = [8, 32], strides = [1, 1]} : vector<8x128xf32> to vector<8x32xf32>
    %cst_433 = arith.constant 5.000000e-01 : f32
    %753 = vector.broadcast %cst_433 : f32 to vector<8x32xf32>
    %754 = arith.mulf %753, %752 : vector<8x32xf32>
    %cst_434 = arith.constant 5.000000e-01 : f32
    %755 = vector.broadcast %cst_434 : f32 to vector<8x32xf32>
    %756 = arith.addf %755, %754 : vector<8x32xf32>
    %757 = vector.extract_strided_slice %751 {offsets = [0, 64], sizes = [8, 32], strides = [1, 1]} : vector<8x128xf32> to vector<8x32xf32>
    %758 = vector.extract_strided_slice %751 {offsets = [0, 96], sizes = [8, 32], strides = [1, 1]} : vector<8x128xf32> to vector<8x32xf32>
    %cst_435 = arith.constant 5.000000e-01 : f32
    %759 = vector.broadcast %cst_435 : f32 to vector<8x32xf32>
    %760 = arith.mulf %759, %758 : vector<8x32xf32>
    %cst_436 = arith.constant 5.000000e-01 : f32
    %761 = vector.broadcast %cst_436 : f32 to vector<8x32xf32>
    %762 = arith.addf %761, %760 : vector<8x32xf32>
    %763 = arith.mulf %756, %757 : vector<8x32xf32>
    %764 = math.tanh %763 : vector<8x32xf32>
    %765 = arith.mulf %762, %764 : vector<8x32xf32>
    %c0_437 = arith.constant 0 : index
    %c0_438 = arith.constant 0 : index
    %766 = vector.load %arg12[%c0_437, %c0_438] : memref<32x128xf32, #tpu.memory_space<vmem>>, vector<32x128xf32>
    %cst_439 = arith.constant dense<0.000000e+00> : vector<8x128xf32>
    %767 = tpu.matmul %740, %766, %cst_439 {dimension_numbers = #tpu.dot_dimension_numbers<[1], [0], [0], [1], [0, 0, 1, 1], [], []>} : vector<8x32xf32>, vector<32x128xf32>, vector<8x128xf32> -> vector<8x128xf32>
    %c0_440 = arith.constant 0 : index
    %c0_441 = arith.constant 0 : index
    %768 = vector.load %arg13[%c0_440, %c0_441] : memref<32x128xf32, #tpu.memory_space<vmem>>, vector<32x128xf32>
    %cst_442 = arith.constant dense<0.000000e+00> : vector<8x128xf32>
    %769 = tpu.matmul %765, %768, %cst_442 {dimension_numbers = #tpu.dot_dimension_numbers<[1], [0], [0], [1], [0, 0, 1, 1], [], []>} : vector<8x32xf32>, vector<32x128xf32>, vector<8x128xf32> -> vector<8x128xf32>
    %770 = arith.addf %767, %769 : vector<8x128xf32>
    %c0_443 = arith.constant 0 : index
    %c0_444 = arith.constant 0 : index
    %771 = vector.load %arg14[%c0_443, %c0_444] : memref<1x128xf32, #tpu.memory_space<vmem>>, vector<1x128xf32>
    %772 = vector.broadcast %771 : vector<1x128xf32> to vector<8x128xf32>
    %773 = arith.addf %770, %772 : vector<8x128xf32>
    %c0_445 = arith.constant 0 : index
    %c0_446 = arith.constant 0 : index
    %774 = vector.load %arg15[%c0_445, %c0_446] : memref<8x128xf32, #tpu.memory_space<vmem>>, vector<8x128xf32>
    tpu.vector_store %arg15[%c0_445, %c0_446], %773 {strides = array<i32>} : memref<8x128xf32, #tpu.memory_space<vmem>>, vector<8x128xf32>,
    return
  }
}

</mosaic_0001>

<bundles_post_ra>
// kernel: bilstm_forward.1
= control target key start
LH: loop header
LB: loop body
LE: loop exit
PB: predicated region body
PF: predicated region fallthrough
CT: control target
= control target key end

     0   :  { %20 = vsyncpa [#allocation8], 0  ;;  %s5408_s0 = inlined_call_operand.vmem [shape: s32[8,4], index: 0, kind: input, shape index: {}]   ;;  %s5409_s1 = inlined_call_operand.hbm [shape: f32[50,256], index: 1, kind: input, shape index: {}]   ;;  %s5410_s2 = inlined_call_operand.hbm [shape: f32[50,256], index: 2, kind: input, shape index: {}]   ;;  %s5411_s3 = inlined_call_operand.hbm [shape: f32[1,256], index: 3, kind: input, shape index: {}]   ;;  %s5412_s4 = inlined_call_operand.hbm [shape: f32[64,256], index: 4, kind: input, shape index: {}]   ;;  %s5413_s5 = inlined_call_operand.hbm [shape: f32[32,128], index: 5, kind: input, shape index: {}]   ;;  %s5414_s6 = inlined_call_operand.hbm [shape: f32[32,128], index: 6, kind: input, shape index: {}]   ;;  %s5415_s7 = inlined_call_operand.vmem [shape: f32[32,128], index: 7, kind: input, shape index: {}]   ;;  %s5416_s8 = inlined_call_operand.vmem [shape: f32[1,128], index: 8, kind: input, shape index: {}]   ;;  %s5417_s9 = inlined_call_operand.hbm [shape: f32[32,128], index: 9, kind: input, shape index: {}]   ;;  %s5418_s10 = inlined_call_operand.hbm [shape: f32[32,128], index: 10, kind: input, shape index: {}]   ;;  %s5419_s11 = inlined_call_operand.hbm [shape: f32[1,128], index: 11, kind: input, shape index: {}]   ;;  %s5420_s12 = inlined_call_operand.hbm [shape: f32[32,128], index: 12, kind: input, shape index: {}]   ;;  %s5421_s13 = inlined_call_operand.hbm [shape: f32[32,128], index: 13, kind: input, shape index: {}]   ;;  %s5422_s14 = inlined_call_operand.hbm [shape: f32[1,128], index: 14, kind: input, shape index: {}]   ;;  %s5423_s15 = inlined_call_operand.vmem [shape: f32[8,128], index: 15, kind: output, shape index: {}]  }
   0x1   :  { %21 = vsyncpa [#allocation7], 0 }
   0x2   :  { %22 = vsyncpa [#allocation11], 0 }
   0x3   :  { %23 = vsyncpa [#allocation14], 0 }
   0x4   :  { %24 = vsyncpa [#allocation17], 0 }
   0x5   :  { %25 = vsyncpa [#allocation20], 0 }
   0x6   :  { %26 = vsyncpa [#allocation23], 0 }
   0x7   :  { %27 = vsyncpa [#allocation26], 0  ;;  %s4446_s18 = smov [#allocation10]   ;;  %s4447_s20 = smov [#allocation13]  }
   0x8   :  { %s55_s19 = sshll.u32 %s4446_s18, 4  ;;  %s77_s21 = sshll.u32 %s4447_s20, 4  ;;  %s56_s19 = int_to_ptr.vmem [resolvable:$true] %s55_s19  ;;  %s78_s21 = int_to_ptr.vmem [resolvable:$true] %s77_s21 }
   0x9   :  { %s4186_s22 = scalar_lea.vmem %s56_s19, 1792  ;;  %p4191_p1 = scmp.lt.s32.totalorder %s56_s19, %s56_s19 }
   0xa   :  { %p4187_p0 = scmp.ne.s32.totalorder %s56_s19, %s4186_s22  ;;  %p4192_p2 = scmp.lt.s32.totalorder %s4186_s22, %s4186_s22 }
   0xc   :  { %p4193_p3 = por %p4192_p2, %p4191_p1 }
   0xe   :  { %p4194_p4 = pnand %p4193_p3, %p4187_p0 }
  0x10   :  { %4197 = shalt.err (!%p4194_p4)
}
  0x11   :  { %s4448_s23 = smov 256   ;;  %s4449_s24 = smov 16  }
  0x12   :  { %61 = dma.hbm_to_vmem [thread:$0]  %s5410_s2, 1792, %s56_s19, [#allocation11], %s4448_s23, %s4448_s23, %s4449_s24  }
  0x13   :  { %s4206_s27 = scalar_lea.vmem %s78_s21, 2048  ;;  %p4211_p6 = scmp.lt.s32.totalorder %s78_s21, %s78_s21 }
  0x14   :  { %p4207_p5 = scmp.ne.s32.totalorder %s78_s21, %s4206_s27  ;;  %p4212_p7 = scmp.lt.s32.totalorder %s4206_s27, %s4206_s27 }
  0x16   :  { %p4213_p8 = por %p4212_p7, %p4211_p6 }
  0x18   :  { %p4214_p9 = pnand %p4213_p8, %p4207_p5 }
  0x1a   :  { %4217 = shalt.err (!%p4214_p9)
}
  0x1b   :  { %83 = dma.hbm_to_vmem [thread:$0]  %s5412_s4, 2048, %s78_s21, [#allocation14], %s4448_s23, %s4448_s23, %s4449_s24  }
  0x1c   :  { %s4450_s30 = smov [#allocation16]   ;;  %s4451_s17 = smov [#allocation19]  }
  0x1d   :  { %s101_s16 = sshll.u32 %s4450_s30, 4  ;;  %s129_s18 = sshll.u32 %s4451_s17, 4  ;;  %s102_s16 = int_to_ptr.vmem [resolvable:$true] %s101_s16  ;;  %s130_s18 = int_to_ptr.vmem [resolvable:$true] %s129_s18 }
  0x1e   :  { %s4226_s2 = scalar_lea.vmem %s102_s16, 512  ;;  %p4231_p11 = scmp.lt.s32.totalorder %s102_s16, %s102_s16 }
  0x1f   :  { %p4227_p10 = scmp.ne.s32.totalorder %s102_s16, %s4226_s2  ;;  %p4232_p12 = scmp.lt.s32.totalorder %s4226_s2, %s4226_s2 }
  0x21   :  { %p4233_p13 = por %p4232_p12, %p4231_p11 }
  0x23   :  { %p4234_p0 = pnand %p4233_p13, %p4227_p10 }
  0x25   :  { %4237 = shalt.err (!%p4234_p0)
}
  0x26   :  { %s4452_s19 = smov 128   ;;  %s4453_s20 = smov 8  }
  0x27   :  { %107 = dma.hbm_to_vmem [thread:$0]  %s5414_s6, 512, %s102_s16, [#allocation17], %s4452_s19, %s4452_s19, %s4453_s20  }
  0x28   :  { %s4246_s21 = scalar_lea.vmem %s130_s18, 512  ;;  %p4251_p2 = scmp.lt.s32.totalorder %s130_s18, %s130_s18 }
  0x29   :  { %p4247_p1 = scmp.ne.s32.totalorder %s130_s18, %s4246_s21  ;;  %p4252_p3 = scmp.lt.s32.totalorder %s4246_s21, %s4246_s21 }
  0x2b   :  { %p4253_p4 = por %p4252_p3, %p4251_p2 }
  0x2d   :  { %p4254_p5 = pnand %p4253_p4, %p4247_p1 }
  0x2f   :  { %4257 = shalt.err (!%p4254_p5)
}
  0x30   :  { %135 = dma.hbm_to_vmem [thread:$0]  %s5418_s10, 512, %s130_s18, [#allocation20], %s4452_s19, %s4452_s19, %s4453_s20  }
  0x31   :  { %s34_s29 = sshll.u32 %s5408_s0, 4  ;;  %s4454_s30 = smov [#allocation22]   ;;  %s35_s29 = int_to_ptr.vmem [resolvable:$true] %s34_s29 }
  0x32   :  { %s151_s6 = sshll.u32 %s4454_s30, 4  ;;  %s152_s6 = int_to_ptr.vmem [resolvable:$true] %s151_s6 }
  0x33   :  { %s4266_s16 = scalar_lea.vmem %s152_s6, 512  ;;  %p4271_p7 = scmp.lt.s32.totalorder %s152_s6, %s152_s6 }
  0x34   :  { %p4267_p6 = scmp.ne.s32.totalorder %s152_s6, %s4266_s16  ;;  %p4272_p8 = scmp.lt.s32.totalorder %s4266_s16, %s4266_s16 }
  0x36   :  { %p4273_p9 = por %p4272_p8, %p4271_p7 }
  0x38   :  { %p4274_p10 = pnand %p4273_p9, %p4267_p6 }
  0x3a   :  { %4277 = shalt.err (!%p4274_p10)
}
  0x3b   :  { %157 = dma.hbm_to_vmem [thread:$0]  %s5420_s12, 512, %s152_s6, [#allocation23], %s4452_s19, %s4452_s19, %s4453_s20  }
  0x3c   :  { %s4278_s18 = scalar_lea.vmem %s35_s29, 128  ;;  %p4283_p12 = scmp.lt.s32.totalorder %s35_s29, %s35_s29 }
  0x3d   :  { %p4279_p11 = scmp.ne.s32.totalorder %s35_s29, %s4278_s18  ;;  %p4284_p13 = scmp.lt.s32.totalorder %s4278_s18, %s4278_s18 }
  0x3f   :  { %p4285_p0 = por %p4284_p13, %p4283_p12 }
  0x41   :  { %p4286_p1 = pnand %p4285_p0, %p4279_p11 }
  0x43   :  { %4289 = shalt.err (!%p4286_p1)
}
  0x44   :  { %s4455_s0 = smov [#allocation6]   ;;  %s4456_s2 = smov [#allocation9]  }
  0x45   :  { %37 = dma.vmem_to_smem %s35_s29, 128, %s4455_s0, [#allocation8]  }
  0x46   :  { %s43_s22 = sshll.u32 %s4456_s2, 4  ;;  %s4457_s4 = smov [#allocation12]   ;;  %s44_s22 = int_to_ptr.vmem [resolvable:$true] %s43_s22 }
  0x47   :  { %s68_s21 = sshll.u32 %s4457_s4, 4  ;;  %s4298_s25 = scalar_lea.vmem %s44_s22, 1792  ;;  %s69_s21 = int_to_ptr.vmem [resolvable:$true] %s68_s21 }
  0x48   :  { %p4299_p2 = scmp.ne.s32.totalorder %s44_s22, %s4298_s25  ;;  %p4303_p3 = scmp.lt.s32.totalorder %s44_s22, %s44_s22 }
  0x49   :  { %p4304_p4 = scmp.lt.s32.totalorder %s4298_s25, %s4298_s25 }
  0x4b   :  { %p4305_p5 = por %p4304_p4, %p4303_p3 }
  0x4d   :  { %p4306_p6 = pnand %p4305_p5, %p4299_p2 }
  0x4f   :  { %4309 = shalt.err (!%p4306_p6)
}
  0x50   :  { %49 = dma.hbm_to_vmem [thread:$0]  %s5409_s1, 1792, %s44_s22, [#allocation7], %s4448_s23, %s4448_s23, %s4449_s24  }
  0x51   :  { %s4318_s27 = scalar_lea.vmem %s69_s21, 32  ;;  %p4323_p8 = scmp.lt.s32.totalorder %s69_s21, %s69_s21 }
  0x52   :  { %p4319_p7 = scmp.ne.s32.totalorder %s69_s21, %s4318_s27  ;;  %p4324_p9 = scmp.lt.s32.totalorder %s4318_s27, %s4318_s27 }
  0x54   :  { %p4325_p10 = por %p4324_p9, %p4323_p8 }
  0x56   :  { %p4326_p11 = pnand %p4325_p10, %p4319_p7 }
  0x58   :  { %4329 = shalt.err (!%p4326_p11)
}
  0x59   :  { %71 = dma.hbm_to_vmem [thread:$0]  %s5411_s3, 32, %s69_s21, [#allocation11]  }
  0x5a   :  { %s4458_s30 = smov [#allocation15]   ;;  %s4459_s16 = smov [#allocation18]  }
  0x5b   :  { %s89_s6 = sshll.u32 %s4458_s30, 4  ;;  %s117_s17 = sshll.u32 %s4459_s16, 4  ;;  %s90_s6 = int_to_ptr.vmem [resolvable:$true] %s89_s6  ;;  %s118_s17 = int_to_ptr.vmem [resolvable:$true] %s117_s17 }
  0x5c   :  { %s4338_s10 = scalar_lea.vmem %s90_s6, 512  ;;  %p4343_p13 = scmp.lt.s32.totalorder %s90_s6, %s90_s6 }
  0x5d   :  { %p4339_p12 = scmp.ne.s32.totalorder %s90_s6, %s4338_s10  ;;  %p4344_p0 = scmp.lt.s32.totalorder %s4338_s10, %s4338_s10 }
  0x5f   :  { %p4345_p1 = por %p4344_p0, %p4343_p13 }
  0x61   :  { %p4346_p2 = pnand %p4345_p1, %p4339_p12 }
  0x63   :  { %4349 = shalt.err (!%p4346_p2)
}
  0x64   :  { %95 = dma.hbm_to_vmem [thread:$0]  %s5413_s5, 512, %s90_s6, [#allocation14], %s4452_s19, %s4452_s19, %s4453_s20  }
  0x65   :  { %s4358_s3 = scalar_lea.vmem %s118_s17, 512  ;;  %p4363_p4 = scmp.lt.s32.totalorder %s118_s17, %s118_s17 }
  0x66   :  { %p4359_p3 = scmp.ne.s32.totalorder %s118_s17, %s4358_s3  ;;  %p4364_p5 = scmp.lt.s32.totalorder %s4358_s3, %s4358_s3 }
  0x68   :  { %p4365_p6 = por %p4364_p5, %p4363_p4 }
  0x6a   :  { %p4366_p7 = pnand %p4365_p6, %p4359_p3 }
  0x6c   :  { %4369 = shalt.err (!%p4366_p7)
}
  0x6d   :  { %123 = dma.hbm_to_vmem [thread:$0]  %s5417_s9, 512, %s118_s17, [#allocation17], %s4452_s19, %s4452_s19, %s4453_s20  }
  0x6e   :  { %s4460_s0 = smov [#allocation21]   ;;  %s4461_s22 = smov [#allocation24]  }
  0x6f   :  { %s142_s2 = sshll.u32 %s4460_s0, 4  ;;  %s163_s4 = sshll.u32 %s4461_s22, 4  ;;  %s143_s2 = int_to_ptr.vmem [resolvable:$true] %s142_s2  ;;  %s164_s4 = int_to_ptr.vmem [resolvable:$true] %s163_s4 }
  0x70   :  { %s4378_s5 = scalar_lea.vmem %s143_s2, 16  ;;  %s4382_s21 = scalar_lea.vmem %s143_s2, 32 }
  0x71   :  { %p4379_p8 = scmp.ne.s32.totalorder %s143_s2, %s4378_s5  ;;  %p4383_p9 = scmp.lt.s32.totalorder %s143_s2, %s143_s2 }
  0x72   :  { %p4384_p10 = scmp.lt.s32.totalorder %s4382_s21, %s4378_s5 }
  0x74   :  { %p4385_p11 = por %p4384_p10, %p4383_p9 }
  0x76   :  { %p4386_p12 = pnand %p4385_p11, %p4379_p8 }
  0x78   :  { %4389 = shalt.err (!%p4386_p12)
}
  0x79   :  { %145 = dma.hbm_to_vmem [thread:$0]  %s5419_s11, 16, %s143_s2, [#allocation20]  }
  0x7a   :  { %s4398_s26 = scalar_lea.vmem %s164_s4, 512  ;;  %p4403_p0 = scmp.lt.s32.totalorder %s164_s4, %s164_s4 }
  0x7b   :  { %p4399_p13 = scmp.ne.s32.totalorder %s164_s4, %s4398_s26  ;;  %p4404_p1 = scmp.lt.s32.totalorder %s4398_s26, %s4398_s26 }
  0x7d   :  { %p4405_p2 = por %p4404_p1, %p4403_p0 }
  0x7f   :  { %p4406_p3 = pnand %p4405_p2, %p4399_p13 }
  0x81   :  { %4409 = shalt.err (!%p4406_p3)
}
  0x82   :  { %169 = dma.hbm_to_vmem [thread:$0]  %s5421_s13, 512, %s164_s4, [#allocation23], %s4452_s19, %s4452_s19, %s4453_s20  }
  0x83   :  { %s4462_s28 = smov [#allocation25]  }
  0x84   :  { %s176_s29 = sshll.u32 %s4462_s28, 4  ;;  %s177_s29 = int_to_ptr.vmem [resolvable:$true] %s176_s29 }
  0x85   :  { %s4418_s30 = scalar_lea.vmem %s177_s29, 16  ;;  %s4422_s11 = scalar_lea.vmem %s177_s29, 32 }
  0x86   :  { %p4419_p4 = scmp.ne.s32.totalorder %s177_s29, %s4418_s30  ;;  %p4423_p5 = scmp.lt.s32.totalorder %s177_s29, %s177_s29 }
  0x87   :  { %p4424_p6 = scmp.lt.s32.totalorder %s4422_s11, %s4418_s30 }
  0x89   :  { %p4425_p7 = por %p4424_p6, %p4423_p5 }
  0x8b   :  { %p4426_p8 = pnand %p4425_p7, %p4419_p4 }
  0x8d   :  { %4429 = shalt.err (!%p4426_p8)
}
  0x8e   :  { %179 = dma.hbm_to_vmem [thread:$0]  %s5422_s14, 16, %s177_s29, [#allocation26]  }
  0x8f   :  { %4430 = dma.done.wait [#allocation8], 128  }
  0x90   :  { %4431 = vsyncadd [#allocation8], 4294967168 }
  0x91   :  { %4432 = dma.done.wait [#allocation7], 1792  }
  0x92   :  { %4433 = vsyncadd [#allocation7], 4294965504 }
  0x93   :  { %4434 = dma.done.wait [#allocation11], 1824  }
  0x94   :  { %4435 = vsyncadd [#allocation11], 4294965472 }
  0x95   :  { %4436 = dma.done.wait [#allocation14], 2560  }
  0x96   :  { %4437 = vsyncadd [#allocation14], 4294964736 }
  0x97   :  { %4438 = dma.done.wait [#allocation17], 1024  }
  0x98   :  { %4439 = vsyncadd [#allocation17], 4294966272 }
  0x99   :  { %4440 = dma.done.wait [#allocation20], 528  }
  0x9a   :  { %4441 = vsyncadd [#allocation20], 4294966768 }
  0x9b   :  { %4442 = dma.done.wait [#allocation23], 1024  }
  0x9c   :  { %4443 = vsyncadd [#allocation23], 4294966272 }
  0x9d   :  { %4444 = dma.done.wait [#allocation26], 16  }
  0x9e   :  { %4445 = vsyncadd [#allocation26], 4294967280 }
  0x9f   :  { %219 = sfence }
  0xa0   :  { %v4614_v0 = vld [vmem:[#allocation13 + $0x78] sm:$0xff]  ;;  %v4616_v1 = vld [vmem:[#allocation13 + $0x70] sm:$0xff]  ;;  %v4618_v2 = vld [vmem:[#allocation13 + $0x68] sm:$0xff]  ;;  %v222_v3 = vlaneseq  ;;  %s4620_s13 = sld [smem:[#allocation6]]  ;;  %v4463_v5 = vmov 0.0   ;;  %vm1165_vm1 = vcmask 261120  }
  0xa1   :  { %1089 = vmatprep.subr.mxu0 %v4614_v0  ;;  %v4623_v4 = vld [vmem:[#allocation13 + $0x60] sm:$0xff]  ;;  %1137 = vmatprep.mubr.f32.mxu0 %v4463_v5  ;;  %s4626_s14 = sld [smem:[#allocation6 + $0x380]]  ;;  %v4629_v6 = vld [vmem:[#allocation13 + $0x58] sm:$0xff]  ;;  %v4634_v8 = vld [vmem:[#allocation13 + $0x50] sm:$0xff]  ;;  %vm1069_vm2 = vcmask 523264   ;;  %vm4466_vm3 = vmmov 0  }
  0xa2   :  { %1090 = vmatpush1.msra.mxu0 %v4616_v1  ;;  %v223_v7 = vshrl.u32 %v222_v3, 7  ;;  %1191 = vmatprep.subr.mxu1 %v4614_v0  ;;  %s4636_s19 = sld [smem:[#allocation6 + $0x1]]  ;;  %v4640_v9 = vld [vmem:[#allocation13 + $0x48] sm:$0xff]  ;;  %v4644_v12 = vld [vmem:[#allocation13 + $0x40] sm:$0xff]  ;;  %v4646_v13 = vld [vmem:[#allocation12] sm:$0x3] }
  0xa3   :  { %1091 = vmatprep.subr.mxu0 %v4618_v2  ;;  %1192 = vmatpush1.msra.mxu1 %v4616_v1  ;;  %s4648_s20 = sld [smem:[#allocation6 + $0x381]]  ;;  %v4652_v14 = vld [vmem:[#allocation13 + $0x38] sm:$0xff]  ;;  %v4660_v17 = vld [vmem:[#allocation13 + $0x30] sm:$0xff]  ;;  %v4665_v18 = vld [vmem:[#allocation13 + $0x28] sm:$0xff]  ;;  %vm4695_vm0 = vcmp.lt.s32.totalorder %v222_v3, 256 }
  0xa4   :  { %1092 = vmatpush1.msra.mxu0 %v4623_v4  ;;  %v224_v10 = vsub.s32 0, %v223_v7  ;;  %v228_v11 = vsub.s32 1, %v223_v7  ;;  %1193 = vmatprep.subr.mxu1 %v4618_v2  ;;  %v4670_v19 = vld [vmem:[#allocation13 + $0x20] sm:$0xff]  ;;  %v4674_v20 = vld [vmem:[#allocation13 + $0x18] sm:$0xff]  ;;  %v4679_v22 = vld [vmem:[#allocation13 + $0x10] sm:$0xff]  ;;  %s3520_s29 = sld [smem:[#allocation6 + $0x2]] }
  0xa5   :  { %1093 = vmatprep.subr.mxu0 %v4629_v6  ;;  %1194 = vmatpush1.msra.mxu1 %v4623_v4  ;;  %v4684_v23 = vld [vmem:[#allocation13 + $0x8] sm:$0xff]  ;;  %v4689_v25 = vld [vmem:[#allocation13] sm:$0xff]  ;;  %s4704_s30 = sld [smem:[#allocation6 + $0x382]] }
  0xa6   :  { %1094 = vmatpush1.msra.mxu0 %v4634_v8  ;;  %v225_v15 = vrot.slane %v4646_v13, %v224_v10  ;;  %v229_v16 = vrot.slane %v4646_v13, %v228_v11  ;;  %s250_s17 = sshra.s32 %s4620_s13, 3  ;;  %s253_s10 = sand.u32 7, %s4620_s13  ;;  %1195 = vmatprep.subr.mxu1 %v4629_v6 }
  0xa7   :  { %1095 = vmatprep.subr.mxu0 %v4640_v9  ;;  %s3736_s1 = sshll.u32 %s250_s17, 4  ;;  %s259_s23 = sshra.s32 %s4626_s14, 3  ;;  %1196 = vmatpush1.msra.mxu1 %v4634_v8 }
  0xa8   :  { %1096 = vmatpush1.msra.mxu0 %v4644_v12  ;;  %232 = vst [vmem:[#allocation2] sm:$0xff] %v225_v15  ;;  %233 = vst [vmem:[#allocation2 + $0x8] sm:$0xff] %v229_v16  ;;  %s256_s3 = sadd.s32 %s3736_s1, %s253_s10  ;;  %s262_s24 = sand.u32 7, %s4626_s14  ;;  %1197 = vmatprep.subr.mxu1 %v4640_v9 }
  0xa9   :  { %234 = vst [vmem:[#allocation2 + $0x10] sm:$0xff] %v225_v15  ;;  %235 = vst [vmem:[#allocation2 + $0x18] sm:$0xff] %v229_v16  ;;  %1097 = vmatprep.subr.mxu0 %v4652_v14  ;;  %s3737_s18 = sshll.u32 %s259_s23, 4  ;;  %1198 = vmatpush1.msra.mxu1 %v4644_v12  ;;  %s257_s0 = scalar_lea.vmem [#allocation9], %s256_s3 }
  0xaa   :  { %236 = vst [vmem:[#allocation2 + $0x20] sm:$0xff] %v225_v15  ;;  %237 = vst [vmem:[#allocation2 + $0x28] sm:$0xff] %v229_v16  ;;  %1098 = vmatpush1.msra.mxu0 %v4660_v17  ;;  %v258_v21 = vld [vmem:[%s257_s0] ss:$8 sm:$0x3]  ;;  %s265_s2 = sadd.s32 %s3737_s18, %s262_s24  ;;  %s278_s22 = sshra.s32 %s4636_s19, 3  ;;  %1199 = vmatprep.subr.mxu1 %v4652_v14 }
  0xab   :  { %238 = vst [vmem:[#allocation2 + $0x30] sm:$0xff] %v225_v15  ;;  %239 = vst [vmem:[#allocation2 + $0x38] sm:$0xff] %v229_v16  ;;  %1099 = vmatprep.subr.mxu0 %v4665_v18  ;;  %s281_s4 = sand.u32 7, %s4636_s19  ;;  %1200 = vmatpush1.msra.mxu1 %v4660_v17  ;;  %s266_s5 = scalar_lea.vmem [#allocation10], %s265_s2 }
  0xac   :  { %240 = vst [vmem:[#allocation2 + $0x40] sm:$0xff] %v225_v15  ;;  %241 = vst [vmem:[#allocation2 + $0x48] sm:$0xff] %v229_v16  ;;  %1100 = vmatpush1.msra.mxu0 %v4670_v19  ;;  %v267_v24 = vld [vmem:[%s266_s5] ss:$8 sm:$0x3]  ;;  %s3738_s21 = sshll.u32 %s278_s22, 4  ;;  %1201 = vmatprep.subr.mxu1 %v4665_v18 }
  0xad   :  { %242 = vst [vmem:[#allocation2 + $0x50] sm:$0xff] %v225_v15  ;;  %243 = vst [vmem:[#allocation2 + $0x58] sm:$0xff] %v229_v16  ;;  %s287_s25 = sshra.s32 %s4648_s20, 3  ;;  %1101 = vmatprep.subr.mxu0 %v4674_v20  ;;  %v268_v26 = vadd.f32 %v267_v24, %v258_v21  ;;  %s284_s12 = sadd.s32 %s3738_s21, %s281_s4  ;;  %1202 = vmatpush1.msra.mxu1 %v4670_v19 }
  0xae   :  { %244 = vst [vmem:[#allocation2 + $0x60] sm:$0xff] %v225_v15  ;;  %245 = vst [vmem:[#allocation2 + $0x68] sm:$0xff] %v229_v16  ;;  %s290_s26 = sand.u32 7, %s4648_s20  ;;  %1102 = vmatpush1.msra.mxu0 %v4679_v22  ;;  %s3739_s9 = sshll.u32 %s287_s25, 4  ;;  %1203 = vmatprep.subr.mxu1 %v4674_v20 }
  0xaf   :  { %246 = vst [vmem:[#allocation2 + $0x70] sm:$0xff] %v225_v15  ;;  %247 = vst [vmem:[#allocation2 + $0x78] sm:$0xff] %v229_v16  ;;  %1103 = vmatprep.subr.mxu0 %v4684_v23  ;;  %v269_v28 = vadd.f32 %v268_v26, %v4646_v13  ;;  %s285_s27 = scalar_lea.vmem [#allocation9], %s284_s12  ;;  %s293_s28 = sadd.s32 %s3739_s9, %s290_s26  ;;  %1204 = vmatpush1.msra.mxu1 %v4679_v22 }
  0xb0   :  { %v286_v29 = vld [vmem:[%s285_s27] ss:$8 sm:$0x3]  ;;  %1104 = vmatpush1.msra.mxu0 %v4689_v25  ;;  %1205 = vmatprep.subr.mxu1 %v4684_v23  ;;  %s294_s11 = scalar_lea.vmem [#allocation10], %s293_s28  ;;  %s4710_s6 = sld [smem:[#allocation6 + $0x3]] }
  0xb1   :  { %1138 = vmatmul.mubr.f32.vlgmr.msra.gmra.mxu0 %v4463_v5  ;;  %274 = vst.msk [vmem:[#allocation2] ss:$8 sm:$0x3] %vm4695_vm0, %v269_v28  ;;  %v295_v30 = vld [vmem:[%s294_s11] ss:$8 sm:$0x3]  ;;  %1206 = vmatpush1.msra.mxu1 %v4689_v25 }
  0xb2   :  { %v296_v31 = vadd.f32 %v295_v30, %v286_v29  ;;  %1239 = vmatprep.mubr.f32.mxu1 %v4463_v5  ;;  %1292 = vmatprep.subr.mxu0 %v4614_v0  ;;  %s4715_s16 = sld [smem:[#allocation6 + $0x383]]  ;;  %s303_s13 = sshra.s32 %s3520_s29, 3 }
  0xb3   :  { %1293 = vmatpush1.msra.mxu0 %v4616_v1  ;;  %1340 = vmatprep.mubr.f32.mxu0 %v4463_v5  ;;  %s306_s14 = sand.u32 7, %s3520_s29  ;;  %s3740_s19 = sshll.u32 %s303_s13, 4 }
  0xb4   :  { %v297_v32 = vadd.f32 %v296_v31, %v4646_v13  ;;  %1294 = vmatprep.subr.mxu0 %v4618_v2  ;;  %1393 = vmatprep.subr.mxu1 %v4614_v0  ;;  %s312_s20 = sshra.s32 %s4704_s30, 3  ;;  %s309_s17 = sadd.s32 %s3740_s19, %s306_s14 }
  0xb5   :  { %1295 = vmatpush1.msra.mxu0 %v4623_v4  ;;  %s315_s10 = sand.u32 7, %s4704_s30  ;;  %s3741_s1 = sshll.u32 %s312_s20, 4 }
  0xb6   :  { %299 = vst.msk [vmem:[#allocation2 + $0x1] ss:$8 sm:$0x3] %vm4695_vm0, %v297_v32  ;;  %1296 = vmatprep.subr.mxu0 %v4629_v6  ;;  %s310_s23 = scalar_lea.vmem [#allocation9], %s309_s17  ;;  %s318_s3 = sadd.s32 %s3741_s1, %s315_s10 }
  0xb7   :  { %1297 = vmatpush1.msra.mxu0 %v4634_v8  ;;  %v311_v33 = vld [vmem:[%s310_s23] ss:$8 sm:$0x3]  ;;  %s328_s24 = sshra.s32 %s4710_s6, 3  ;;  %s331_s18 = sand.u32 7, %s4710_s6 }
  0xb8   :  { %1298 = vmatprep.subr.mxu0 %v4640_v9  ;;  %s319_s0 = scalar_lea.vmem [#allocation10], %s318_s3  ;;  %s3742_s2 = sshll.u32 %s328_s24, 4 }
  0xb9   :  { %1299 = vmatpush1.msra.mxu0 %v4644_v12  ;;  %v320_v34 = vld [vmem:[%s319_s0] ss:$8 sm:$0x3]  ;;  %s337_s22 = sshra.s32 %s4715_s16, 3  ;;  %s334_s4 = sadd.s32 %s3742_s2, %s331_s18 }
  0xba   :  { %1300 = vmatprep.subr.mxu0 %v4652_v14  ;;  %v321_v35 = vadd.f32 %v320_v34, %v311_v33  ;;  %s340_s5 = sand.u32 7, %s4715_s16  ;;  %s3743_s21 = sshll.u32 %s337_s22, 4 }
  0xbb   :  { %1301 = vmatpush1.msra.mxu0 %v4660_v17  ;;  %s335_s25 = scalar_lea.vmem [#allocation9], %s334_s4  ;;  %s343_s12 = sadd.s32 %s3743_s21, %s340_s5 }
  0xbc   :  { %1302 = vmatprep.subr.mxu0 %v4665_v18  ;;  %v322_v36 = vadd.f32 %v321_v35, %v4646_v13  ;;  %v336_v37 = vld [vmem:[%s335_s25] ss:$8 sm:$0x3]  ;;  %s344_s26 = scalar_lea.vmem [#allocation10], %s343_s12  ;;  %s4464_s9 = smov 64  }
  0xbd   :  { %1303 = vmatpush1.msra.mxu0 %v4670_v19  ;;  %v345_v38 = vld [vmem:[%s344_s26] ss:$8 sm:$0x3]  ;;  %s3532_s27 = sld [smem:[#allocation6 + $0x80]] }
  0xbe   :  { %1304 = vmatprep.subr.mxu0 %v4674_v20  ;;  %324 = vst.msk [vmem:[#allocation2 + $0x2] ss:$8 sm:$0x3] %vm4695_vm0, %v322_v36  ;;  %v346_v39 = vadd.f32 %v345_v38, %v336_v37  ;;  %s3533_s28 = sld [smem:[#allocation6 + $0x300]] }
  0xbf   :  { %1305 = vmatpush1.msra.mxu0 %v4679_v22  ;;  %s3538_s29 = sld [smem:[#allocation6 + $0x81]] }
  0xc0   :  { %1306 = vmatprep.subr.mxu0 %v4684_v23  ;;  %v347_v40 = vadd.f32 %v346_v39, %v4646_v13  ;;  %s4754_s30 = sld [smem:[#allocation6 + $0x301]] }
  0xc1   :  { %1307 = vmatpush1.msra.mxu0 %v4689_v25  ;;  %s4756_s11 = sld [smem:[#allocation6 + $0x82]] }
  0xc2   :  { %1494 = vmatprep.subr.mxu0 %v4614_v0  ;;  %349 = vst.msk [vmem:[#allocation2 + $0x3] ss:$8 sm:$0x3] %vm4695_vm0, %v347_v40  ;;  %s4758_s6 = sld [smem:[#allocation6 + $0x302]] }
  0xc3   :  { %s353_s16 = sshra.s32 %s3532_s27, 3  ;;  %s356_s13 = sand.u32 7, %s3532_s27 }
  0xc4   :  { %s3744_s14 = sshll.u32 %s353_s16, 4  ;;  %s362_s19 = sshra.s32 %s3533_s28, 3 }
  0xc5   :  { %s359_s20 = sadd.s32 %s3744_s14, %s356_s13  ;;  %s365_s17 = sand.u32 7, %s3533_s28 }
  0xc6   :  { %s3745_s10 = sshll.u32 %s362_s19, 4  ;;  %s360_s1 = scalar_lea.vmem [#allocation9], %s359_s20 }
  0xc7   :  { %v361_v58 = vld [vmem:[%s360_s1] ss:$8 sm:$0x3]  ;;  %s368_s23 = sadd.s32 %s3745_s10, %s365_s17  ;;  %s378_s3 = sshra.s32 %s3538_s29, 3 }
  0xc8   :  { %s381_s24 = sand.u32 7, %s3538_s29  ;;  %s369_s18 = scalar_lea.vmem [#allocation10], %s368_s23 }
  0xc9   :  { %v1067_v41 = vld [vmem:[#allocation2] sm:$0xff]  ;;  %v1068_v43 = vld [vmem:[#allocation2 + $0x8] sm:$0xff]  ;;  %s3746_s0 = sshll.u32 %s378_s3, 4  ;;  %s387_s2 = sshra.s32 %s4754_s30, 3 }
  0xca   :  { %v370_v60 = vld [vmem:[%s369_s18] ss:$8 sm:$0x3]  ;;  %s384_s22 = sadd.s32 %s3746_s0, %s381_s24  ;;  %s390_s4 = sand.u32 7, %s4754_s30 }
  0xcb   :  { %v371_v61 = vadd.f32 %v370_v60, %v361_v58  ;;  %s3747_s5 = sshll.u32 %s387_s2, 4  ;;  %s385_s21 = scalar_lea.vmem [#allocation9], %s384_s22 }
  0xcc   :  { %v386_v63 = vld [vmem:[%s385_s21] ss:$8 sm:$0x3]  ;;  %s393_s25 = sadd.s32 %s3747_s5, %s390_s4  ;;  %s403_s12 = sshra.s32 %s4756_s11, 3 }
  0xcd   :  { %v372_v62 = vadd.f32 %v371_v61, %v4646_v13  ;;  %s406_s26 = sand.u32 7, %s4756_s11  ;;  %s394_s27 = scalar_lea.vmem [#allocation10], %s393_s25 }
  0xce   :  { %v395_v3 = vld [vmem:[%s394_s27] ss:$8 sm:$0x3]  ;;  %s3748_s28 = sshll.u32 %s403_s12, 4  ;;  %s412_s29 = sshra.s32 %s4758_s6, 3 }
  0xcf   :  { %374 = vst.msk [vmem:[#allocation2 + $0x10] ss:$8 sm:$0x3] %vm4695_vm0, %v372_v62  ;;  %v396_v7 = vadd.f32 %v395_v3, %v386_v63  ;;  %s409_s16 = sadd.s32 %s3748_s28, %s406_s26  ;;  %s415_s13 = sand.u32 7, %s4758_s6 }
  0xd0   :  { %s3749_s14 = sshll.u32 %s412_s29, 4  ;;  %s410_s30 = scalar_lea.vmem [#allocation9], %s409_s16 }
  0xd1   :  { %v397_v10 = vadd.f32 %v396_v7, %v4646_v13  ;;  %v411_v11 = vld [vmem:[%s410_s30] ss:$8 sm:$0x3]  ;;  %s418_s19 = sadd.s32 %s3749_s14, %s415_s13  ;;  %s3550_s20 = sld [smem:[#allocation6 + $0x83]] }
  0xd2   :  { %s3551_s17 = sld [smem:[#allocation6 + $0x303]]  ;;  %s419_s11 = scalar_lea.vmem [#allocation10], %s418_s19 }
  0xd3   :  { %399 = vst.msk [vmem:[#allocation2 + $0x11] ss:$8 sm:$0x3] %vm4695_vm0, %v397_v10  ;;  %v420_v15 = vld [vmem:[%s419_s11] ss:$8 sm:$0x3] }
  0xd4   :  { %v421_v16 = vadd.f32 %v420_v15, %v411_v11  ;;  %s3556_s4 = sld [smem:[#allocation6 + $0x100]] }
  0xd5   :  { %s3557_s5 = sld [smem:[#allocation6 + $0x280]] }
  0xd6   :  { %v422_v21 = vadd.f32 %v421_v16, %v4646_v13  ;;  %s3562_s21 = sld [smem:[#allocation6 + $0x101]] }
  0xd7   :  { %s428_s10 = sshra.s32 %s3550_s20, 3  ;;  %s431_s1 = sand.u32 7, %s3550_s20 }
  0xd8   :  { %424 = vst.msk [vmem:[#allocation2 + $0x12] ss:$8 sm:$0x3] %vm4695_vm0, %v422_v21  ;;  %s3750_s6 = sshll.u32 %s428_s10, 4  ;;  %s437_s23 = sshra.s32 %s3551_s17, 3 }
  0xd9   :  { %s434_s3 = sadd.s32 %s3750_s6, %s431_s1  ;;  %s440_s24 = sand.u32 7, %s3551_s17 }
  0xda   :  { %s3751_s18 = sshll.u32 %s437_s23, 4  ;;  %s435_s0 = scalar_lea.vmem [#allocation9], %s434_s3 }
  0xdb   :  { %v436_v24 = vld [vmem:[%s435_s0] ss:$8 sm:$0x3]  ;;  %s443_s2 = sadd.s32 %s3751_s18, %s440_s24  ;;  %s4806_s25 = sld [smem:[#allocation6 + $0x281]] }
  0xdc   :  { %s444_s22 = scalar_lea.vmem [#allocation10], %s443_s2  ;;  %s4808_s12 = sld [smem:[#allocation6 + $0x102]] }
  0xdd   :  { %v445_v26 = vld [vmem:[%s444_s22] ss:$8 sm:$0x3]  ;;  %s4810_s26 = sld [smem:[#allocation6 + $0x282]]  ;;  %s453_s27 = sshra.s32 %s3556_s4, 3 }
  0xde   :  { %v446_v28 = vadd.f32 %v445_v26, %v436_v24  ;;  %s456_s28 = sand.u32 7, %s3556_s4  ;;  %s3752_s29 = sshll.u32 %s453_s27, 4 }
  0xdf   :  { %s462_s16 = sshra.s32 %s3557_s5, 3  ;;  %s4812_s13 = sadd.s32 %s3752_s29, %s456_s28 }
  0xe0   :  { %v447_v29 = vadd.f32 %v446_v28, %v4646_v13  ;;  %s465_s14 = sand.u32 7, %s3557_s5  ;;  %s3753_s30 = sshll.u32 %s462_s16, 4 }
  0xe1   :  { %s460_s19 = scalar_lea.vmem [#allocation9], %s4812_s13  ;;  %s4815_s20 = sadd.s32 %s3753_s30, %s465_s14 }
  0xe2   :  { %449 = vst.msk [vmem:[#allocation2 + $0x13] ss:$8 sm:$0x3] %vm4695_vm0, %v447_v29  ;;  %s478_s17 = sshra.s32 %s3562_s21, 3  ;;  %s481_s11 = sand.u32 7, %s3562_s21 }
  0xe3   :  { %s469_s10 = scalar_lea.vmem [#allocation10], %s4815_s20  ;;  %s3754_s1 = sshll.u32 %s478_s17, 4 }
  0xe4   :  { %s487_s6 = sshra.s32 %s4806_s25, 3  ;;  %s4823_s23 = sadd.s32 %s3754_s1, %s481_s11 }
  0xe5   :  { %s490_s3 = sand.u32 7, %s4806_s25  ;;  %s3755_s24 = sshll.u32 %s487_s6, 4 }
  0xe6   :  { %s485_s18 = scalar_lea.vmem [#allocation9], %s4823_s23  ;;  %s4828_s0 = sadd.s32 %s3755_s24, %s490_s3 }
  0xe7   :  { %s503_s2 = sshra.s32 %s4808_s12, 3  ;;  %s506_s22 = sand.u32 7, %s4808_s12 }
  0xe8   :  { %s494_s4 = scalar_lea.vmem [#allocation10], %s4828_s0  ;;  %s3756_s5 = sshll.u32 %s503_s2, 4 }
  0xe9   :  { %v1171_v31 = vld [vmem:[#allocation2 + $0x10] sm:$0xff]  ;;  %v1172_v33 = vld [vmem:[#allocation2 + $0x18] sm:$0xff]  ;;  %s512_s21 = sshra.s32 %s4810_s26, 3  ;;  %s4836_s27 = sadd.s32 %s3756_s5, %s506_s22 }
  0xea   :  { %s515_s25 = sand.u32 7, %s4810_s26  ;;  %s3757_s28 = sshll.u32 %s512_s21, 4 }
  0xeb   :  { %s510_s29 = scalar_lea.vmem [#allocation9], %s4836_s27  ;;  %s4841_s16 = sadd.s32 %s3757_s28, %s515_s25 }
  0xec   :  { %s3574_s12 = sld [smem:[#allocation6 + $0x103]]  ;;  %s519_s30 = scalar_lea.vmem [#allocation10], %s4841_s16 }
  0xed   :  { %s3575_s14 = sld [smem:[#allocation6 + $0x283]]  ;;  %v520_v58 = vld [vmem:[%s519_s30] ss:$8 sm:$0x3] }
  0xee   :  { %s3580_s2 = sld [smem:[#allocation6 + $0x180]] }
  0xef   :  { %s3581_s22 = sld [smem:[#allocation6 + $0x200]] }
  0xf0   :  { %s4882_s5 = sld [smem:[#allocation6 + $0x201]] }
  0xf1   :  { %s4884_s21 = sld [smem:[#allocation6 + $0x182]] }
  0xf2   :  { %s531_s26 = sand.u32 7, %s3574_s12  ;;  %s4886_s25 = sld [smem:[#allocation6 + $0x202]] }
  0xf3   :  { %s537_s11 = sshra.s32 %s3575_s14, 3  ;;  %s540_s1 = sand.u32 7, %s3575_s14 }
  0xf4   :  { %s3759_s6 = sshll.u32 %s537_s11, 4  ;;  %s553_s28 = sshra.s32 %s3580_s2, 3 }
  0xf5   :  { %s4852_s24 = sadd.s32 %s3759_s6, %s540_s1  ;;  %s562_s14 = sshra.s32 %s3581_s22, 3 }
 0x171   :  { %v1139_v42 = vpop.f32.mrf.mxu0 }
 0x172   :  { %v1144_v44 = vadd.f32 %v1139_v42, %v1067_v41 }
 0x173   :  { %v1141_v45 = vpop.f32.mrf.mxu0 }
 0x174   :  { %4078 = vtanh.f32 %v1144_v44  ;;  %v1145_v46 = vadd.f32 %v1141_v45, %v1068_v43 }
 0x176   :  { %4080 = vtanh.f32 %v1145_v46 }
 0x181   :  { %v4079_v47 = vpop.eup %4078 }
 0x182   :  { %v1148_v48 = vmul.f32 0.5, %v4079_v47 }
 0x183   :  { %v4081_v50 = vpop.eup %4080 }
 0x184   :  { %v1149_v49 = vadd.f32 0.5, %v1148_v48  ;;  %v1150_v55 = vmul.f32 0.5, %v4081_v50  ;;  %v461_v48 = vld [vmem:[%s460_s19] ss:$8 sm:$0x3]  ;;  %s528_s19 = sshra.s32 %s3574_s12, 3 }
 0x185   :  { %s3758_s17 = sshll.u32 %s528_s19, 4  ;;  %s3760_s12 = sshll.u32 %s553_s28, 4 }
 0x186   :  { %v1153_v51 = vmul.f32 %v4081_v50, %v1149_v49  ;;  %v1152_v52 = vmul.f32 0.0, %v1149_v49  ;;  %v1151_v56 = vadd.f32 0.5, %v1150_v55  ;;  %v470_v50 = vld [vmem:[%s469_s10] ss:$8 sm:$0x3]  ;;  %s4849_s10 = sadd.s32 %s3758_s17, %s531_s26  ;;  %s565_s19 = sand.u32 7, %s3581_s22 }
 0x187   :  { %s535_s3 = scalar_lea.vmem [#allocation9], %s4849_s10  ;;  %s3761_s26 = sshll.u32 %s562_s14, 4 }
 0x188   :  { %1155 = vrot.lane.b32.xlu0 %v1153_v51, %s4464_s9  ;;  %v471_v51 = vadd.f32 %v470_v50, %v461_v48  ;;  %v536_v62 = vld [vmem:[%s535_s3] ss:$8 sm:$0x3]  ;;  %s4891_s11 = sadd.s32 %s3761_s26, %s565_s19  ;;  %s590_s28 = sand.u32 7, %s4882_s5 }
 0x189   :  { %s569_s3 = scalar_lea.vmem [#allocation10], %s4891_s11  ;;  %s603_s14 = sshra.s32 %s4884_s21, 3 }
 0x18a   :  { %s606_s19 = sand.u32 7, %s4884_s21  ;;  %s3598_s21 = sld [smem:[#allocation6 + $0x183]] }
 0x1fa   :  { %v1156_v53 = vpop.permute.xlu0 %1155 }
 0x1fb   :  { %v4751_v54 = vadd.f32 %v1156_v53, %v1152_v52  ;;  %v472_v52 = vadd.f32 %v471_v51, %v4646_v13  ;;  %v486_v53 = vld [vmem:[%s485_s18] ss:$8 sm:$0x3]  ;;  %s544_s18 = scalar_lea.vmem [#allocation10], %s4852_s24 }
 0x1fc   :  { %v545_v63 = vld [vmem:[%s544_s18] ss:$8 sm:$0x3] }
 0x1fd   :  { %4082 = vtanh.f32 %v4751_v54  ;;  %474 = vst.msk [vmem:[#allocation2 + $0x20] ss:$8 sm:$0x3] %vm4695_vm0, %v472_v52  ;;  %v546_v3 = vadd.f32 %v545_v63, %v536_v62 }
 0x1ff   :  { %v547_v7 = vadd.f32 %v546_v3, %v4646_v13 }
 0x201   :  { %549 = vst.msk [vmem:[#allocation2 + $0x23] ss:$8 sm:$0x3] %vm4695_vm0, %v547_v7 }
 0x20a   :  { %v4083_v57 = vpop.eup %4082 }
 0x20b   :  { %v4760_v59 = vmul.f32 %v4083_v57, %v1151_v56  ;;  %v511_v57 = vld [vmem:[%s510_s29] ss:$8 sm:$0x3]  ;;  %s556_s29 = sand.u32 7, %s3580_s2  ;;  %s587_s2 = sshra.s32 %s4882_s5, 3 }
 0x20c   :  { %v521_v60 = vadd.f32 %v520_v58, %v511_v57  ;;  %s4888_s30 = sadd.s32 %s3760_s12, %s556_s29  ;;  %s3763_s29 = sshll.u32 %s587_s2, 4 }
 0x20d   :  { %1162 = vrot.lane.b32.xlu0 %v4760_v59, %s4464_s9  ;;  %s560_s17 = scalar_lea.vmem [#allocation9], %s4888_s30  ;;  %s615_s5 = sand.u32 7, %s4886_s25 }
 0x20e   :  { %v522_v61 = vadd.f32 %v521_v60, %v4646_v13 }
 0x210   :  { %524 = vst.msk [vmem:[#allocation2 + $0x22] ss:$8 sm:$0x3] %vm4695_vm0, %v522_v61 }
 0x27f   :  { %v1163_v30 = vpop.permute.xlu0 %1162 }
 0x280   :  { %1166 = vst.msk [vmem:[#allocation3] sm:$0xff] %vm1165_vm1, %v1163_v30  ;;  %3699 = vmatmul.mubr.msk.f32.vlgmr.msra.gmra.mxu1 %vm1069_vm2, %v1163_v30 }
 0x281   :  { %1394 = vmatpush1.msra.mxu1 %v4616_v1  ;;  %1441 = vmatprep.mubr.f32.mxu1 %v4463_v5 }
 0x282   :  { %1395 = vmatprep.subr.mxu1 %v4618_v2 }
 0x283   :  { %1396 = vmatpush1.msra.mxu1 %v4623_v4 }
 0x284   :  { %1397 = vmatprep.subr.mxu1 %v4629_v6 }
 0x285   :  { %1398 = vmatpush1.msra.mxu1 %v4634_v8 }
 0x286   :  { %1399 = vmatprep.subr.mxu1 %v4640_v9 }
 0x287   :  { %1400 = vmatpush1.msra.mxu1 %v4644_v12 }
 0x288   :  { %1401 = vmatprep.subr.mxu1 %v4652_v14 }
 0x289   :  { %1402 = vmatpush1.msra.mxu1 %v4660_v17 }
 0x28a   :  { %1403 = vmatprep.subr.mxu1 %v4665_v18 }
 0x28b   :  { %1404 = vmatpush1.msra.mxu1 %v4670_v19 }
 0x28c   :  { %1405 = vmatprep.subr.mxu1 %v4674_v20 }
 0x28d   :  { %1406 = vmatpush1.msra.mxu1 %v4679_v22 }
 0x28e   :  { %1407 = vmatprep.subr.mxu1 %v4684_v23 }
 0x28f   :  { %1408 = vmatpush1.msra.mxu1 %v4689_v25 }
 0x290   :  { %1595 = vmatprep.subr.mxu1 %v4614_v0 }
 0x340   :  { %v1241_v32 = vpop.f32.mrf.mxu1 }
 0x341   :  { %v1246_v34 = vadd.f32 %v1241_v32, %v1171_v31 }
 0x342   :  { %v1243_v35 = vpop.f32.mrf.mxu1 }
 0x343   :  { %4084 = vtanh.f32 %v1246_v34  ;;  %v1247_v36 = vadd.f32 %v1243_v35, %v1172_v33 }
 0x345   :  { %4086 = vtanh.f32 %v1247_v36 }
 0x350   :  { %v4085_v37 = vpop.eup %4084 }
 0x351   :  { %v1250_v38 = vmul.f32 0.5, %v4085_v37 }
 0x352   :  { %v4087_v40 = vpop.eup %4086 }
 0x353   :  { %v1251_v39 = vadd.f32 0.5, %v1250_v38  ;;  %v1252_v45 = vmul.f32 0.5, %v4087_v40 }
 0x355   :  { %v1255_v41 = vmul.f32 %v4087_v40, %v1251_v39  ;;  %v1254_v42 = vmul.f32 %v1251_v39, %v4751_v54  ;;  %v1253_v46 = vadd.f32 0.5, %v1252_v45  ;;  %v495_v54 = vld [vmem:[%s494_s4] ss:$8 sm:$0x3]  ;;  %s3586_s4 = sld [smem:[#allocation6 + $0x181]] }
 0x356   :  { %v496_v55 = vadd.f32 %v495_v54, %v486_v53  ;;  %v561_v39 = vld [vmem:[%s560_s17] ss:$8 sm:$0x3]  ;;  %s3764_s17 = sshll.u32 %s603_s14, 4 }
 0x357   :  { %1257 = vrot.lane.b32.xlu1 %v1255_v41, %s4464_s9  ;;  %v570_v41 = vld [vmem:[%s569_s3] ss:$8 sm:$0x3] }
 0x358   :  { %v497_v56 = vadd.f32 %v496_v55, %v4646_v13 }
 0x35a   :  { %499 = vst.msk [vmem:[#allocation2 + $0x21] ss:$8 sm:$0x3] %vm4695_vm0, %v497_v56 }
 0x35b   :  { %s578_s1 = sshra.s32 %s3586_s4, 3  ;;  %s581_s6 = sand.u32 7, %s3586_s4 }
 0x35c   :  { %s3762_s18 = sshll.u32 %s578_s1, 4  ;;  %s4904_s4 = sadd.s32 %s3763_s29, %s590_s28 }
 0x35d   :  { %s4899_s22 = sadd.s32 %s3762_s18, %s581_s6  ;;  %s594_s26 = scalar_lea.vmem [#allocation10], %s4904_s4 }
 0x35e   :  { %s585_s12 = scalar_lea.vmem [#allocation9], %s4899_s22  ;;  %v595_v45 = vld [vmem:[%s594_s26] ss:$8 sm:$0x3]  ;;  %s612_s1 = sshra.s32 %s4886_s25, 3 }
 0x35f   :  { %s4912_s6 = sadd.s32 %s3764_s17, %s606_s19  ;;  %s3765_s3 = sshll.u32 %s612_s1, 4 }
 0x360   :  { %s610_s18 = scalar_lea.vmem [#allocation9], %s4912_s6  ;;  %s4917_s2 = sadd.s32 %s3765_s3, %s615_s5 }
 0x361   :  { %v1272_v11 = vld [vmem:[#allocation2 + $0x20] sm:$0xff]  ;;  %v1273_v16 = vld [vmem:[#allocation2 + $0x28] sm:$0xff]  ;;  %s3599_s28 = sld [smem:[#allocation6 + $0x203]]  ;;  %s619_s29 = scalar_lea.vmem [#allocation10], %s4917_s2 }
 0x362   :  { %v611_v48 = vld [vmem:[%s610_s18] ss:$8 sm:$0x3]  ;;  %s631_s25 = sand.u32 7, %s3598_s21 }
 0x363   :  { %v620_v50 = vld [vmem:[%s619_s29] ss:$8 sm:$0x3]  ;;  %s685_s29 = scalar_lea.vmem [#allocation9], %s4904_s4  ;;  %s769_s4 = scalar_lea.vmem [#allocation10], %s4812_s13 }
 0x364   :  { %v621_v51 = vadd.f32 %v620_v50, %v611_v48  ;;  %v686_v7 = vld [vmem:[%s685_s29] ss:$8 sm:$0x3]  ;;  %v5014_v48 = vld [vmem:[#allocation13 + $0x28] sm:$0xff]  ;;  %s835_s13 = scalar_lea.vmem [#allocation9], %s4852_s24  ;;  %s5073_s24 = sld [smem:[#allocation6 + $0x82]] }
 0x366   :  { %v622_v52 = vadd.f32 %v621_v51, %v4646_v13 }
 0x367   :  { %s637_s19 = sshra.s32 %s3599_s28, 3  ;;  %s640_s17 = sand.u32 7, %s3599_s28 }
 0x368   :  { %624 = vst.msk [vmem:[#allocation2 + $0x32] ss:$8 sm:$0x3] %vm4695_vm0, %v622_v52  ;;  %s3767_s1 = sshll.u32 %s637_s19, 4  ;;  %s669_s28 = scalar_lea.vmem [#allocation10], %s4888_s30 }
 0x369   :  { %s4928_s3 = sadd.s32 %s3767_s1, %s640_s17  ;;  %v670_v63 = vld [vmem:[%s669_s28] ss:$8 sm:$0x3]  ;;  %s810_s19 = scalar_lea.vmem [#allocation9], %s4841_s16 }
 0x36a   :  { %s644_s18 = scalar_lea.vmem [#allocation10], %s4928_s3  ;;  %s735_s30 = scalar_lea.vmem [#allocation9], %s4928_s3 }
 0x36b   :  { %v645_v54 = vld [vmem:[%s644_s18] ss:$8 sm:$0x3]  ;;  %s5069_s16 = sld [smem:[#allocation6 + $0x81]] }
 0x3c9   :  { %v1258_v43 = vpop.permute.xlu1 %1257 }
 0x3ca   :  { %v4803_v44 = vadd.f32 %v1258_v43, %v1254_v42  ;;  %v571_v42 = vadd.f32 %v570_v41, %v561_v39  ;;  %v4990_v39 = vld [vmem:[#allocation13 + $0x68] sm:$0xff]  ;;  %v4993_v41 = vld [vmem:[#allocation13 + $0x60] sm:$0xff] }
 0x3cc   :  { %4088 = vtanh.f32 %v4803_v44  ;;  %v572_v43 = vadd.f32 %v571_v42, %v4646_v13  ;;  %v4996_v42 = vld [vmem:[#allocation13 + $0x58] sm:$0xff] }
 0x3ce   :  { %574 = vst.msk [vmem:[#allocation2 + $0x30] ss:$8 sm:$0x3] %vm4695_vm0, %v572_v43  ;;  %v4999_v43 = vld [vmem:[#allocation13 + $0x50] sm:$0xff] }
 0x3d9   :  { %v4089_v47 = vpop.eup %4088 }
 0x3da   :  { %v4817_v49 = vmul.f32 %v4089_v47, %v1253_v46 }
 0x3dc   :  { %1264 = vrot.lane.b32.xlu1 %v4817_v49, %s4464_s9 }
 0x44e   :  { %v1265_v10 = vpop.permute.xlu1 %1264 }
 0x44f   :  { %1267 = vst.msk [vmem:[#allocation3 + $0x8] sm:$0xff] %vm1165_vm1, %v1265_v10  ;;  %3700 = vmatmul.mubr.msk.f32.vlgmr.msra.gmra.mxu0 %vm1069_vm2, %v1265_v10 }
 0x450   :  { %1495 = vmatpush1.msra.mxu0 %v4616_v1  ;;  %1542 = vmatprep.mubr.f32.mxu0 %v4463_v5 }
 0x451   :  { %1496 = vmatprep.subr.mxu0 %v4618_v2 }
 0x452   :  { %1497 = vmatpush1.msra.mxu0 %v4623_v4 }
 0x453   :  { %1498 = vmatprep.subr.mxu0 %v4629_v6 }
 0x454   :  { %1499 = vmatpush1.msra.mxu0 %v4634_v8 }
 0x455   :  { %1500 = vmatprep.subr.mxu0 %v4640_v9 }
 0x456   :  { %1501 = vmatpush1.msra.mxu0 %v4644_v12  ;;  %v1879_v27 = vld [vmem:[#allocation3 + $0x8] sm:$0xff] }
 0x457   :  { %1502 = vmatprep.subr.mxu0 %v4652_v14 }
 0x458   :  { %1503 = vmatpush1.msra.mxu0 %v4660_v17 }
 0x459   :  { %1504 = vmatprep.subr.mxu0 %v4665_v18 }
 0x45a   :  { %1505 = vmatpush1.msra.mxu0 %v4670_v19 }
 0x45b   :  { %1506 = vmatprep.subr.mxu0 %v4674_v20 }
 0x45c   :  { %1507 = vmatpush1.msra.mxu0 %v4679_v22 }
 0x45d   :  { %1508 = vmatprep.subr.mxu0 %v4684_v23 }
 0x45e   :  { %1509 = vmatpush1.msra.mxu0 %v4689_v25 }
 0x45f   :  { %1696 = vmatprep.subr.mxu0 %v4614_v0 }
 0x50f   :  { %v1342_v15 = vpop.f32.mrf.mxu0 }
 0x510   :  { %v1347_v21 = vadd.f32 %v1342_v15, %v1272_v11 }
 0x511   :  { %v1344_v24 = vpop.f32.mrf.mxu0 }
 0x512   :  { %4090 = vtanh.f32 %v1347_v21  ;;  %v1348_v26 = vadd.f32 %v1344_v24, %v1273_v16 }
 0x514   :  { %4092 = vtanh.f32 %v1348_v26 }
 0x51f   :  { %v4091_v28 = vpop.eup %4090 }
 0x520   :  { %v1351_v29 = vmul.f32 0.5, %v4091_v28 }
 0x521   :  { %v4093_v31 = vpop.eup %4092 }
 0x522   :  { %v1352_v30 = vadd.f32 0.5, %v1351_v29  ;;  %v1353_v36 = vmul.f32 0.5, %v4093_v31  ;;  %v736_v29 = vld [vmem:[%s735_s30] ss:$8 sm:$0x3] }
 0x524   :  { %v1356_v32 = vmul.f32 %v4093_v31, %v1352_v30  ;;  %v1355_v33 = vmul.f32 %v1352_v30, %v4803_v44  ;;  %v1354_v37 = vadd.f32 0.5, %v1353_v36  ;;  %v586_v44 = vld [vmem:[%s585_s12] ss:$8 sm:$0x3]  ;;  %s628_s12 = sshra.s32 %s3598_s21, 3  ;;  %s660_s21 = scalar_lea.vmem [#allocation9], %s4891_s11 }
 0x525   :  { %v596_v46 = vadd.f32 %v595_v45, %v586_v44  ;;  %s3766_s14 = sshll.u32 %s628_s12, 4  ;;  %v661_v62 = vld [vmem:[%s660_s21] ss:$8 sm:$0x3]  ;;  %s694_s12 = scalar_lea.vmem [#allocation10], %s4899_s22  ;;  %v5002_v44 = vld [vmem:[#allocation13 + $0x48] sm:$0xff] }
 0x526   :  { %1358 = vrot.lane.b32.xlu0 %v1356_v32, %s4464_s9  ;;  %s4925_s26 = sadd.s32 %s3766_s14, %s631_s25  ;;  %v671_v3 = vadd.f32 %v670_v63, %v661_v62  ;;  %v695_v10 = vld [vmem:[%s694_s12] ss:$8 sm:$0x3]  ;;  %s710_s25 = scalar_lea.vmem [#allocation9], %s4917_s2 }
 0x527   :  { %v597_v47 = vadd.f32 %v596_v46, %v4646_v13  ;;  %s635_s5 = scalar_lea.vmem [#allocation9], %s4925_s26  ;;  %v696_v16 = vadd.f32 %v695_v10, %v686_v7  ;;  %v711_v21 = vld [vmem:[%s710_s25] ss:$8 sm:$0x3]  ;;  %s719_s14 = scalar_lea.vmem [#allocation10], %s4912_s6 }
 0x528   :  { %v636_v53 = vld [vmem:[%s635_s5] ss:$8 sm:$0x3]  ;;  %v672_v15 = vadd.f32 %v671_v3, %v4646_v13  ;;  %s744_s11 = scalar_lea.vmem [#allocation10], %s4925_s26  ;;  %s760_s22 = scalar_lea.vmem [#allocation9], %s4815_s20 }
 0x529   :  { %599 = vst.msk [vmem:[#allocation2 + $0x31] ss:$8 sm:$0x3] %vm4695_vm0, %v597_v47  ;;  %v646_v55 = vadd.f32 %v645_v54, %v636_v53  ;;  %v720_v24 = vld [vmem:[%s719_s14] ss:$8 sm:$0x3]  ;;  %v697_v26 = vadd.f32 %v696_v16, %v4646_v13 }
 0x52a   :  { %674 = vst.msk [vmem:[#allocation2 + $0x40] ss:$8 sm:$0x3] %vm4695_vm0, %v672_v15  ;;  %v721_v28 = vadd.f32 %v720_v24, %v711_v21  ;;  %v745_v30 = vld [vmem:[%s744_s11] ss:$8 sm:$0x3] }
 0x52b   :  { %v647_v56 = vadd.f32 %v646_v55, %v4646_v13  ;;  %699 = vst.msk [vmem:[#allocation2 + $0x41] ss:$8 sm:$0x3] %vm4695_vm0, %v697_v26  ;;  %v4972_v31 = vld [vmem:[#allocation12] sm:$0x3]  ;;  %v5005_v45 = vld [vmem:[#allocation13 + $0x40] sm:$0xff] }
 0x52c   :  { %v722_v32 = vadd.f32 %v4972_v31, %v721_v28  ;;  %v5008_v46 = vld [vmem:[#allocation13 + $0x38] sm:$0xff]  ;;  %v5011_v47 = vld [vmem:[#allocation13 + $0x30] sm:$0xff]  ;;  %s785_s6 = scalar_lea.vmem [#allocation9], %s4828_s0  ;;  %s794_s2 = scalar_lea.vmem [#allocation10], %s4823_s23  ;;  %v4173_v21 = vld [vmem:[#allocation13 + $0x20] sm:$0xff] }
 0x52d   :  { %649 = vst.msk [vmem:[#allocation2 + $0x33] ss:$8 sm:$0x3] %vm4695_vm0, %v647_v56  ;;  %s819_s26 = scalar_lea.vmem [#allocation10], %s4836_s27  ;;  %s844_s20 = scalar_lea.vmem [#allocation10], %s4849_s10  ;;  %v4174_v24 = vld [vmem:[#allocation13 + $0x18] sm:$0xff] }
 0x52e   :  { %724 = vst.msk [vmem:[#allocation2 + $0x42] ss:$8 sm:$0x3] %vm4695_vm0, %v722_v32  ;;  %v845_v62 = vld [vmem:[%s844_s20] ss:$8 sm:$0x3] }
 0x52f   :  { %v4175_v26 = vld [vmem:[#allocation13 + $0x10] sm:$0xff]  ;;  %v4176_v28 = vld [vmem:[#allocation13 + $0x8] sm:$0xff]  ;;  %s3652_s23 = sld [smem:[#allocation6 + $0x300]] }
 0x530   :  { %s3653_s0 = sld [smem:[#allocation6 + $0x80]] }
 0x531   :  { %s3658_s27 = sld [smem:[#allocation6 + $0x301]] }
 0x532   :  { %s5071_s10 = sld [smem:[#allocation6 + $0x302]] }
 0x535   :  { %s853_s17 = sshra.s32 %s3652_s23, 3  ;;  %s856_s1 = sand.u32 7, %s3652_s23 }
 0x536   :  { %s3784_s5 = sshll.u32 %s853_s17, 4  ;;  %s862_s3 = sshra.s32 %s3653_s0, 3 }
 0x537   :  { %s859_s18 = sadd.s32 %s3784_s5, %s856_s1  ;;  %s865_s21 = sand.u32 7, %s3653_s0 }
 0x538   :  { %s3785_s28 = sshll.u32 %s862_s3, 4  ;;  %s860_s29 = scalar_lea.vmem [#allocation9], %s859_s18 }
 0x539   :  { %s868_s12 = sadd.s32 %s3785_s28, %s865_s21  ;;  %s878_s25 = sshra.s32 %s3658_s27, 3 }
 0x53a   :  { %s881_s14 = sand.u32 7, %s3658_s27  ;;  %s869_s30 = scalar_lea.vmem [#allocation10], %s868_s12 }
 0x53b   :  { %s3786_s11 = sshll.u32 %s878_s25, 4  ;;  %s906_s20 = sand.u32 7, %s5071_s10 }
 0x53c   :  { %s912_s27 = sshra.s32 %s5073_s24, 3  ;;  %s915_s1 = sand.u32 7, %s5073_s24 }
 0x53d   :  { %s3789_s5 = sshll.u32 %s912_s27, 4  ;;  %s3670_s18 = sld [smem:[#allocation6 + $0x303]] }
 0x53e   :  { %s918_s3 = sadd.s32 %s3789_s5, %s915_s1  ;;  %s3671_s21 = sld [smem:[#allocation6 + $0x83]] }
 0x543   :  { %s928_s28 = sshra.s32 %s3670_s18, 3 }
 0x544   :  { %s3790_s24 = sshll.u32 %s928_s28, 4  ;;  %s937_s12 = sshra.s32 %s3671_s21, 3 }
 0x598   :  { %v1359_v34 = vpop.permute.xlu0 %1358 }
 0x599   :  { %v4879_v35 = vadd.f32 %v1359_v34, %v1355_v33  ;;  %v746_v33 = vadd.f32 %v745_v30, %v736_v29  ;;  %v4177_v29 = vld [vmem:[#allocation13] sm:$0xff] }
 0x59b   :  { %4094 = vtanh.f32 %v4879_v35  ;;  %v747_v13 = vadd.f32 %v4972_v31, %v746_v33 }
 0x59d   :  { %749 = vst.msk [vmem:[#allocation2 + $0x43] ss:$8 sm:$0x3] %vm4695_vm0, %v747_v13 }
 0x5a4   :  { %v1474_v50 = vld [vmem:[#allocation2 + $0x40] sm:$0xff]  ;;  %v1475_v52 = vld [vmem:[#allocation2 + $0x48] sm:$0xff] }
 0x5a8   :  { %v4095_v38 = vpop.eup %4094 }
 0x5a9   :  { %v4893_v40 = vmul.f32 %v4095_v38, %v1354_v37  ;;  %v4986_v38 = vld [vmem:[#allocation13 + $0x70] sm:$0xff] }
 0x5ab   :  { %1365 = vrot.lane.b32.xlu1 %v4893_v40, %s4464_s9 }
 0x61d   :  { %v1366_v57 = vpop.permute.xlu1 %1365 }
 0x61e   :  { %1368 = vst.msk [vmem:[#allocation3 + $0x10] sm:$0xff] %vm1165_vm1, %v1366_v57  ;;  %3701 = vmatmul.mubr.msk.f32.vlgmr.msra.gmra.mxu1 %vm1069_vm2, %v1366_v57 }
 0x61f   :  { %1596 = vmatpush1.msra.mxu1 %v4616_v1  ;;  %1643 = vmatprep.mubr.f32.mxu1 %v4463_v5  ;;  %v1373_v1 = vld [vmem:[#allocation2 + $0x30] sm:$0xff] }
 0x620   :  { %1597 = vmatprep.subr.mxu1 %v4618_v2 }
 0x621   :  { %1598 = vmatpush1.msra.mxu1 %v4623_v4  ;;  %v1374_v4 = vld [vmem:[#allocation2 + $0x38] sm:$0xff] }
 0x622   :  { %1599 = vmatprep.subr.mxu1 %v4629_v6 }
 0x623   :  { %1600 = vmatpush1.msra.mxu1 %v4634_v8 }
 0x624   :  { %1601 = vmatprep.subr.mxu1 %v4640_v9 }
 0x625   :  { %1602 = vmatpush1.msra.mxu1 %v4644_v12 }
 0x626   :  { %1603 = vmatprep.subr.mxu1 %v4652_v14 }
 0x627   :  { %1604 = vmatpush1.msra.mxu1 %v4660_v17 }
 0x628   :  { %1605 = vmatprep.subr.mxu1 %v4665_v18 }
 0x629   :  { %1606 = vmatpush1.msra.mxu1 %v4670_v19 }
 0x62a   :  { %1607 = vmatprep.subr.mxu1 %v4674_v20 }
 0x62b   :  { %1608 = vmatpush1.msra.mxu1 %v4679_v22 }
 0x62c   :  { %1609 = vmatprep.subr.mxu1 %v4684_v23 }
 0x62d   :  { %1610 = vmatpush1.msra.mxu1 %v4689_v25 }
 0x62e   :  { %1797 = vmatprep.subr.mxu1 %v4614_v0 }
 0x6de   :  { %v1443_v2 = vpop.f32.mrf.mxu1 }
 0x6df   :  { %v1448_v6 = vadd.f32 %v1443_v2, %v1373_v1  ;;  %v761_v2 = vld [vmem:[%s760_s22] ss:$8 sm:$0x3]  ;;  %s887_s22 = sshra.s32 %s5069_s16, 3 }
 0x6e0   :  { %v1445_v8 = vpop.f32.mrf.mxu1 }
 0x6e1   :  { %4096 = vtanh.f32 %v1448_v6  ;;  %v1449_v9 = vadd.f32 %v1445_v8, %v1374_v4  ;;  %v770_v4 = vld [vmem:[%s769_s4] ss:$8 sm:$0x3]  ;;  %s884_s4 = sadd.s32 %s3786_s11, %s881_s14  ;;  %s940_s14 = sand.u32 7, %s3671_s21 }
 0x6e2   :  { %v771_v6 = vadd.f32 %v770_v4, %v761_v2  ;;  %v786_v8 = vld [vmem:[%s785_s6] ss:$8 sm:$0x3]  ;;  %s890_s6 = sand.u32 7, %s5069_s16 }
 0x6e3   :  { %4098 = vtanh.f32 %v1449_v9  ;;  %v795_v9 = vld [vmem:[%s794_s2] ss:$8 sm:$0x3]  ;;  %s3787_s2 = sshll.u32 %s887_s22, 4 }
 0x6ee   :  { %v4097_v12 = vpop.eup %4096 }
 0x6ef   :  { %v1452_v14 = vmul.f32 0.5, %v4097_v12 }
 0x6f0   :  { %v4099_v18 = vpop.eup %4098 }
 0x6f1   :  { %v1453_v17 = vadd.f32 0.5, %v1452_v14  ;;  %v1454_v11 = vmul.f32 0.5, %v4099_v18  ;;  %v772_v14 = vadd.f32 %v4972_v31, %v771_v6 }
 0x6f3   :  { %v1457_v58 = vmul.f32 %v4099_v18, %v1453_v17  ;;  %v1456_v0 = vmul.f32 %v1453_v17, %v4879_v35  ;;  %v1455_v34 = vadd.f32 0.5, %v1454_v11  ;;  %v796_v17 = vadd.f32 %v795_v9, %v786_v8  ;;  %v811_v18 = vld [vmem:[%s810_s19] ss:$8 sm:$0x3]  ;;  %s885_s19 = scalar_lea.vmem [#allocation9], %s884_s4 }
 0x6f4   :  { %774 = vst.msk [vmem:[#allocation2 + $0x50] ss:$8 sm:$0x3] %vm4695_vm0, %v772_v14 }
 0x6f5   :  { %1459 = vrot.lane.b32.xlu0 %v1457_v58, %s4464_s9  ;;  %v820_v58 = vld [vmem:[%s819_s26] ss:$8 sm:$0x3]  ;;  %s893_s26 = sadd.s32 %s3787_s2, %s890_s6  ;;  %s3676_s6 = sld [smem:[#allocation6 + $0x380]] }
 0x6f6   :  { %s894_s23 = scalar_lea.vmem [#allocation10], %s893_s26  ;;  %s952_s2 = sld [smem:[#allocation6]] }
 0x6f7   :  { %s3682_s26 = sld [smem:[#allocation6 + $0x1]] }
 0x6fc   :  { %s965_s5 = sand.u32 7, %s952_s2 }
 0x767   :  { %v1460_v60 = vpop.permute.xlu0 %1459 }
 0x768   :  { %v4955_v61 = vadd.f32 %v1460_v60, %v1456_v0  ;;  %v797_v0 = vadd.f32 %v4972_v31, %v796_v17  ;;  %v821_v60 = vadd.f32 %v820_v58, %v811_v18 }
 0x76a   :  { %4100 = vtanh.f32 %v4955_v61  ;;  %799 = vst.msk [vmem:[#allocation2 + $0x51] ss:$8 sm:$0x3] %vm4695_vm0, %v797_v0  ;;  %v822_v63 = vadd.f32 %v4972_v31, %v821_v60 }
 0x76c   :  { %824 = vst.msk [vmem:[#allocation2 + $0x52] ss:$8 sm:$0x3] %vm4695_vm0, %v822_v63 }
 0x777   :  { %v4101_v35 = vpop.eup %4100 }
 0x778   :  { %v4978_v36 = vmul.f32 %v4101_v35, %v1455_v34 }
 0x77a   :  { %1466 = vrot.lane.b32.xlu1 %v4978_v36, %s4464_s9 }
 0x7ec   :  { %v1467_v37 = vpop.permute.xlu1 %1466 }
 0x7ed   :  { %1469 = vst.msk [vmem:[#allocation3 + $0x18] sm:$0xff] %vm1165_vm1, %v1467_v37  ;;  %3702 = vmatmul.mubr.msk.f32.vlgmr.msra.gmra.mxu0 %vm1069_vm2, %v1467_v37 }
 0x7ee   :  { %1697 = vmatpush1.msra.mxu0 %v4986_v38  ;;  %1744 = vmatprep.mubr.f32.mxu0 %v4463_v5 }
 0x7ef   :  { %1698 = vmatprep.subr.mxu0 %v4990_v39 }
 0x7f0   :  { %1699 = vmatpush1.msra.mxu0 %v4993_v41 }
 0x7f1   :  { %1700 = vmatprep.subr.mxu0 %v4996_v42 }
 0x7f2   :  { %1701 = vmatpush1.msra.mxu0 %v4999_v43 }
 0x7f3   :  { %1702 = vmatprep.subr.mxu0 %v5002_v44 }
 0x7f4   :  { %1703 = vmatpush1.msra.mxu0 %v5005_v45 }
 0x7f5   :  { %1704 = vmatprep.subr.mxu0 %v5008_v46 }
 0x7f6   :  { %1705 = vmatpush1.msra.mxu0 %v5011_v47 }
 0x7f7   :  { %1706 = vmatprep.subr.mxu0 %v5014_v48 }
 0x7f8   :  { %1707 = vmatpush1.msra.mxu0 %v4670_v19 }
 0x7f9   :  { %1708 = vmatprep.subr.mxu0 %v4674_v20 }
 0x7fa   :  { %1709 = vmatpush1.msra.mxu0 %v4679_v22 }
 0x7fb   :  { %1710 = vmatprep.subr.mxu0 %v4684_v23 }
 0x7fc   :  { %1711 = vmatpush1.msra.mxu0 %v4689_v25 }
 0x8ad   :  { %v1544_v51 = vpop.f32.mrf.mxu0 }
 0x8ae   :  { %v1549_v53 = vadd.f32 %v1544_v51, %v1474_v50  ;;  %v861_v50 = vld [vmem:[%s860_s29] ss:$8 sm:$0x3]  ;;  %s931_s29 = sand.u32 7, %s3670_s18 }
 0x8af   :  { %v1546_v54 = vpop.f32.mrf.mxu0  ;;  %s934_s25 = sadd.s32 %s3790_s24, %s931_s29  ;;  %s987_s24 = sshra.s32 %s3682_s26, 3 }
 0x8b0   :  { %4102 = vtanh.f32 %v1549_v53  ;;  %v1550_v55 = vadd.f32 %v1546_v54, %v1475_v52  ;;  %v870_v52 = vld [vmem:[%s869_s30] ss:$8 sm:$0x3]  ;;  %s3791_s30 = sshll.u32 %s937_s12, 4  ;;  %s935_s11 = scalar_lea.vmem [#allocation9], %s934_s25 }
 0x8b1   :  { %v871_v53 = vadd.f32 %v870_v52, %v861_v50  ;;  %s943_s22 = sadd.s32 %s3791_s30, %s940_s14  ;;  %s990_s25 = sand.u32 7, %s3682_s26  ;;  %v1887_v50 = vld [vmem:[#allocation15 + $0x8] sm:$0xff]  ;;  %v1886_v52 = vld [vmem:[#allocation15] sm:$0xff] }
 0x8b2   :  { %4104 = vtanh.f32 %v1550_v55  ;;  %v886_v55 = vld [vmem:[%s885_s19] ss:$8 sm:$0x3]  ;;  %s944_s4 = scalar_lea.vmem [#allocation10], %s943_s22  ;;  %s3681_s19 = sld [smem:[#allocation6 + $0x381]] }
 0x8b3   :  { %v872_v54 = vadd.f32 %v4972_v31, %v871_v53  ;;  %v945_v2 = vld [vmem:[%s944_s4] ss:$8 sm:$0x3]  ;;  %s3795_s14 = sshll.u32 %s987_s24, 4  ;;  %v1881_v53 = vld [vmem:[#allocation3 + $0x18] sm:$0xff] }
 0x8b5   :  { %874 = vst.msk [vmem:[#allocation2 + $0x60] ss:$8 sm:$0x3] %vm4695_vm0, %v872_v54 }
 0x8b8   :  { %s978_s21 = sshra.s32 %s3681_s19, 3 }
 0x8b9   :  { %s3794_s29 = sshll.u32 %s978_s21, 4 }
 0x8bd   :  { %v4103_v19 = vpop.eup %4102 }
 0x8be   :  { %v1553_v56 = vmul.f32 0.5, %v4103_v19  ;;  %v895_v19 = vld [vmem:[%s894_s23] ss:$8 sm:$0x3]  ;;  %s953_s23 = sshra.s32 %s3676_s6, 3 }
 0x8bf   :  { %v4105_v22 = vpop.eup %4104  ;;  %s3792_s27 = sshll.u32 %s953_s23, 4 }
 0x8c0   :  { %v1554_v20 = vadd.f32 0.5, %v1553_v56  ;;  %v1555_v12 = vmul.f32 0.5, %v4105_v22  ;;  %v896_v56 = vadd.f32 %v895_v19, %v886_v55 }
 0x8c2   :  { %v1558_v57 = vmul.f32 %v4105_v22, %v1554_v20  ;;  %v1557_v23 = vmul.f32 %v1554_v20, %v4955_v61  ;;  %v836_v61 = vld [vmem:[%s835_s13] ss:$8 sm:$0x3]  ;;  %v1556_v7 = vadd.f32 0.5, %v1555_v12  ;;  %s903_s13 = sshra.s32 %s5071_s10, 3  ;;  %v897_v20 = vadd.f32 %v4972_v31, %v896_v56  ;;  %s919_s10 = scalar_lea.vmem [#allocation10], %s918_s3 }
 0x8c3   :  { %v846_v3 = vadd.f32 %v845_v62, %v836_v61  ;;  %s3788_s0 = sshll.u32 %s903_s13, 4  ;;  %s5111_s13 = sld [smem:[#allocation6 + $0x382]] }
 0x8c4   :  { %1560 = vrot.lane.b32.xlu0 %v1558_v57, %s4464_s9  ;;  %s909_s17 = sadd.s32 %s3788_s0, %s906_s20  ;;  %899 = vst.msk [vmem:[#allocation2 + $0x61] ss:$8 sm:$0x3] %vm4695_vm0, %v897_v20  ;;  %v920_v57 = vld [vmem:[%s919_s10] ss:$8 sm:$0x3] }
 0x8c5   :  { %v847_v11 = vadd.f32 %v4972_v31, %v846_v3  ;;  %s910_s16 = scalar_lea.vmem [#allocation9], %s909_s17  ;;  %v5100_v3 = vld [vmem:[#allocation15 + $0x18] sm:$0xff]  ;;  %s5113_s20 = sld [smem:[#allocation6 + $0x2]] }
 0x8c6   :  { %v911_v22 = vld [vmem:[%s910_s16] ss:$8 sm:$0x3]  ;;  %s956_s0 = sand.u32 7, %s3676_s6  ;;  %s962_s17 = sshra.s32 %s952_s2, 3 }
 0x8c7   :  { %849 = vst.msk [vmem:[#allocation2 + $0x53] ss:$8 sm:$0x3] %vm4695_vm0, %v847_v11  ;;  %s959_s1 = sadd.s32 %s3792_s27, %s956_s0  ;;  %s3793_s16 = sshll.u32 %s962_s17, 4 }
 0x8c8   :  { %s960_s3 = scalar_lea.vmem [#allocation9], %s959_s1  ;;  %s968_s18 = sadd.s32 %s3793_s16, %s965_s5 }
 0x8c9   :  { %s981_s10 = sand.u32 7, %s3681_s19  ;;  %s969_s28 = scalar_lea.vmem [#allocation10], %s968_s18 }
 0x8ca   :  { %s984_s12 = sadd.s32 %s3794_s29, %s981_s10  ;;  %s1003_s22 = sshra.s32 %s5111_s13, 3 }
 0x8cb   :  { %s985_s30 = scalar_lea.vmem [#allocation9], %s984_s12  ;;  %s1006_s4 = sand.u32 7, %s5111_s13 }
 0x8cc   :  { %s3796_s2 = sshll.u32 %s1003_s22, 4  ;;  %s1012_s19 = sshra.s32 %s5113_s20, 3 }
 0x8cd   :  { %s1009_s23 = sadd.s32 %s3796_s2, %s1006_s4  ;;  %s1015_s0 = sand.u32 7, %s5113_s20 }
 0x8ce   :  { %v1575_v30 = vld [vmem:[#allocation2 + $0x50] sm:$0xff]  ;;  %v1576_v33 = vld [vmem:[#allocation2 + $0x58] sm:$0xff]  ;;  %s3797_s27 = sshll.u32 %s1012_s19, 4  ;;  %s1010_s26 = scalar_lea.vmem [#allocation9], %s1009_s23 }
 0x8cf   :  { %s1018_s17 = sadd.s32 %s3797_s27, %s1015_s0  ;;  %s3693_s1 = sld [smem:[#allocation6 + $0x383]] }
 0x8d0   :  { %s3694_s5 = sld [smem:[#allocation6 + $0x3]]  ;;  %s1019_s13 = scalar_lea.vmem [#allocation10], %s1018_s17 }
 0x8d5   :  { %s1028_s16 = sshra.s32 %s3693_s1, 3 }
 0x8d6   :  { %s3798_s20 = sshll.u32 %s1028_s16, 4  ;;  %s1037_s18 = sshra.s32 %s3694_s5, 3 }
 0x8d7   :  { %s1040_s10 = sand.u32 7, %s3694_s5 }
 0x936   :  { %v1561_v25 = vpop.permute.xlu0 %1560 }
 0x937   :  { %v5024_v1 = vadd.f32 %v1561_v25, %v1557_v23  ;;  %v921_v23 = vadd.f32 %v920_v57, %v911_v22 }
 0x939   :  { %4106 = vtanh.f32 %v5024_v1  ;;  %v922_v25 = vadd.f32 %v4972_v31, %v921_v23 }
 0x93b   :  { %924 = vst.msk [vmem:[#allocation2 + $0x62] ss:$8 sm:$0x3] %vm4695_vm0, %v922_v25 }
 0x946   :  { %v4107_v10 = vpop.eup %4106 }
 0x947   :  { %v5045_v15 = vmul.f32 %v4107_v10, %v1556_v7 }
 0x949   :  { %1567 = vrot.lane.b32.xlu1 %v5045_v15, %s4464_s9 }
 0x9bb   :  { %v1568_v16 = vpop.permute.xlu1 %1567 }
 0x9bc   :  { %1570 = vst.msk [vmem:[#allocation3 + $0x20] sm:$0xff] %vm1165_vm1, %v1568_v16  ;;  %3703 = vmatmul.mubr.msk.f32.vlgmr.msra.gmra.mxu1 %vm1069_vm2, %v1568_v16 }
 0x9bd   :  { %1798 = vmatpush1.msra.mxu1 %v4986_v38  ;;  %1845 = vmatprep.mubr.f32.mxu1 %v4463_v5 }
 0x9be   :  { %1799 = vmatprep.subr.mxu1 %v4990_v39 }
 0x9bf   :  { %1800 = vmatpush1.msra.mxu1 %v4993_v41 }
 0x9c0   :  { %1801 = vmatprep.subr.mxu1 %v4996_v42 }
 0x9c1   :  { %1802 = vmatpush1.msra.mxu1 %v4999_v43 }
 0x9c2   :  { %1803 = vmatprep.subr.mxu1 %v5002_v44 }
 0x9c3   :  { %1804 = vmatpush1.msra.mxu1 %v5005_v45  ;;  %v1882_v54 = vld [vmem:[#allocation3 + $0x20] sm:$0xff] }
 0x9c4   :  { %1805 = vmatprep.subr.mxu1 %v5008_v46 }
 0x9c5   :  { %1806 = vmatpush1.msra.mxu1 %v5011_v47 }
 0x9c6   :  { %1807 = vmatprep.subr.mxu1 %v5014_v48 }
 0x9c7   :  { %1808 = vmatpush1.msra.mxu1 %v4173_v21 }
 0x9c8   :  { %1809 = vmatprep.subr.mxu1 %v4174_v24 }
 0x9c9   :  { %1810 = vmatpush1.msra.mxu1 %v4175_v26 }
 0x9ca   :  { %1811 = vmatprep.subr.mxu1 %v4176_v28  ;;  %v961_v28 = vld [vmem:[%s960_s3] ss:$8 sm:$0x3]  ;;  %s1031_s3 = sand.u32 7, %s3693_s1 }
 0x9cb   :  { %1812 = vmatpush1.msra.mxu1 %v4177_v29  ;;  %v970_v29 = vld [vmem:[%s969_s28] ss:$8 sm:$0x3]  ;;  %s1034_s21 = sadd.s32 %s3798_s20, %s1031_s3  ;;  %s3799_s28 = sshll.u32 %s1037_s18, 4 }
 0x9cc   :  { %3904 = vmatprep.subr.mxu1 %v5100_v3  ;;  %s1035_s29 = scalar_lea.vmem [#allocation9], %s1034_s21  ;;  %s1043_s24 = sadd.s32 %s3799_s28, %s1040_s10 }
 0x9cd   :  { %s1044_s12 = scalar_lea.vmem [#allocation10], %s1043_s24 }
 0xa7c   :  { %v1645_v32 = vpop.f32.mrf.mxu1 }
 0xa7d   :  { %v1650_v34 = vadd.f32 %v1645_v32, %v1575_v30  ;;  %v971_v30 = vadd.f32 %v970_v29, %v961_v28 }
 0xa7e   :  { %v1647_v35 = vpop.f32.mrf.mxu1 }
 0xa7f   :  { %4108 = vtanh.f32 %v1650_v34  ;;  %v1651_v13 = vadd.f32 %v1647_v35, %v1576_v33  ;;  %v972_v32 = vadd.f32 %v4972_v31, %v971_v30  ;;  %v986_v33 = vld [vmem:[%s985_s30] ss:$8 sm:$0x3] }
 0xa81   :  { %4110 = vtanh.f32 %v1651_v13  ;;  %974 = vst.msk [vmem:[#allocation2 + $0x70] ss:$8 sm:$0x3] %vm4695_vm0, %v972_v32 }
 0xa8c   :  { %v4109_v37 = vpop.eup %4108 }
 0xa8d   :  { %v1654_v38 = vmul.f32 0.5, %v4109_v37  ;;  %v1011_v37 = vld [vmem:[%s1010_s26] ss:$8 sm:$0x3] }
 0xa8e   :  { %v4111_v41 = vpop.eup %4110 }
 0xa8f   :  { %v1655_v39 = vadd.f32 0.5, %v1654_v38  ;;  %v1656_v46 = vmul.f32 0.5, %v4111_v41  ;;  %v1020_v38 = vld [vmem:[%s1019_s13] ss:$8 sm:$0x3] }
 0xa91   :  { %v1659_v42 = vmul.f32 %v4111_v41, %v1655_v39  ;;  %v1658_v43 = vmul.f32 %v1655_v39, %v5024_v1  ;;  %v1657_v47 = vadd.f32 0.5, %v1656_v46  ;;  %v936_v1 = vld [vmem:[%s935_s11] ss:$8 sm:$0x3]  ;;  %s993_s11 = sadd.s32 %s3795_s14, %s990_s25  ;;  %v1021_v39 = vadd.f32 %v1020_v38, %v1011_v37  ;;  %s4465_s25 = smov 32  }
 0xa92   :  { %v946_v4 = vadd.f32 %v945_v2, %v936_v1  ;;  %s994_s6 = scalar_lea.vmem [#allocation10], %s993_s11 }
 0xa93   :  { %1661 = vrot.lane.b32.xlu0 %v1659_v42, %s4464_s9  ;;  %v995_v34 = vld [vmem:[%s994_s6] ss:$8 sm:$0x3]  ;;  %v1022_v41 = vadd.f32 %v4972_v31, %v1021_v39 }
 0xa94   :  { %v947_v6 = vadd.f32 %v4972_v31, %v946_v4  ;;  %v996_v35 = vadd.f32 %v995_v34, %v986_v33  ;;  %v1036_v42 = vld [vmem:[%s1035_s29] ss:$8 sm:$0x3] }
 0xa95   :  { %1024 = vst.msk [vmem:[#allocation2 + $0x72] ss:$8 sm:$0x3] %vm4695_vm0, %v1022_v41 }
 0xa96   :  { %949 = vst.msk [vmem:[#allocation2 + $0x63] ss:$8 sm:$0x3] %vm4695_vm0, %v947_v6  ;;  %v997_v13 = vadd.f32 %v4972_v31, %v996_v35 }
 0xa98   :  { %999 = vst.msk [vmem:[#allocation2 + $0x71] ss:$8 sm:$0x3] %vm4695_vm0, %v997_v13 }
 0xa9d   :  { %v1676_v9 = vld [vmem:[#allocation2 + $0x60] sm:$0xff]  ;;  %v1677_v14 = vld [vmem:[#allocation2 + $0x68] sm:$0xff] }
 0xb05   :  { %v1662_v44 = vpop.permute.xlu0 %1661 }
 0xb06   :  { %v5066_v45 = vadd.f32 %v1662_v44, %v1658_v43  ;;  %v1045_v43 = vld [vmem:[%s1044_s12] ss:$8 sm:$0x3] }
 0xb07   :  { %v1046_v44 = vadd.f32 %v1045_v43, %v1036_v42 }
 0xb08   :  { %4112 = vtanh.f32 %v5066_v45 }
 0xb15   :  { %v4113_v48 = vpop.eup %4112 }
 0xb16   :  { %v5075_v51 = vmul.f32 %v4113_v48, %v1657_v47  ;;  %v1888_v47 = vld [vmem:[#allocation15 + $0x10] sm:$0xff]  ;;  %v1878_v48 = vld [vmem:[#allocation3] sm:$0xff] }
 0xb18   :  { %1668 = vrot.lane.b32.xlu1 %v5075_v51, %s4464_s9 }
 0xb8a   :  { %v1669_v8 = vpop.permute.xlu1 %1668 }
 0xb8b   :  { %1671 = vst.msk [vmem:[#allocation3 + $0x28] sm:$0xff] %vm1165_vm1, %v1669_v8  ;;  %3704 = vmatmul.mubr.msk.f32.vlgmr.msra.gmra.mxu0 %vm1069_vm2, %v1669_v8 }
 0xb92   :  { %v1883_v55 = vld [vmem:[#allocation3 + $0x28] sm:$0xff] }
 0xc4b   :  { %v1746_v12 = vpop.f32.mrf.mxu0 }
 0xc4c   :  { %v1751_v17 = vadd.f32 %v1746_v12, %v1676_v9 }
 0xc4d   :  { %v1748_v18 = vpop.f32.mrf.mxu0 }
 0xc4e   :  { %4114 = vtanh.f32 %v1751_v17  ;;  %v1752_v58 = vadd.f32 %v1748_v18, %v1677_v14  ;;  %v1901_v18 = vld [vmem:[#allocation16 + $0x18] sm:$0xff] }
 0xc4f   :  { %3884 = vmatprep.subr.mxu0 %v1901_v18 }
 0xc50   :  { %4116 = vtanh.f32 %v1752_v58  ;;  %v1900_v58 = vld [vmem:[#allocation16 + $0x10] sm:$0xff]  ;;  %3885 = vmatpush3.msra.mxu0 %v1901_v18 }
 0xc51   :  { %3886 = vmatprep.subr.mxu0 %v1900_v58 }
 0xc52   :  { %3887 = vmatpush3.msra.mxu0 %v1900_v58 }
 0xc5b   :  { %v4115_v0 = vpop.eup %4114 }
 0xc5c   :  { %v1755_v60 = vmul.f32 0.5, %v4115_v0 }
 0xc5d   :  { %v4117_v62 = vpop.eup %4116 }
 0xc5e   :  { %v1756_v61 = vadd.f32 0.5, %v1755_v60  ;;  %v1757_v16 = vmul.f32 0.5, %v4117_v62 }
 0xc60   :  { %v1760_v63 = vmul.f32 %v4117_v62, %v1756_v61  ;;  %v1759_v7 = vmul.f32 %v1756_v61, %v5066_v45  ;;  %v1758_v21 = vadd.f32 0.5, %v1757_v16  ;;  %v1047_v45 = vadd.f32 %v4972_v31, %v1046_v44  ;;  %v1880_v31 = vld [vmem:[#allocation3 + $0x10] sm:$0xff]  ;;  %v5159_v62 = vld [vmem:[%s5415_s7 + $0x18] sm:$0xff]  ;;  %v5189_v16 = vld [vmem:[%s5415_s7] sm:$0xff] }
 0xc62   :  { %1762 = vrot.lane.b32.xlu0 %v1760_v63, %s4464_s9  ;;  %1049 = vst.msk [vmem:[#allocation2 + $0x73] ss:$8 sm:$0x3] %vm4695_vm0, %v1047_v45 }
 0xc69   :  { %v1777_v56 = vld [vmem:[#allocation2 + $0x70] sm:$0xff]  ;;  %v1778_v22 = vld [vmem:[#allocation2 + $0x78] sm:$0xff] }
 0xcd4   :  { %v1763_v10 = vpop.permute.xlu0 %1762 }
 0xcd5   :  { %v5104_v11 = vadd.f32 %v1763_v10, %v1759_v7  ;;  %v5171_v10 = vld [vmem:[%s5415_s7 + $0x10] sm:$0xff] }
 0xcd7   :  { %4118 = vtanh.f32 %v5104_v11 }
 0xce4   :  { %v4119_v24 = vpop.eup %4118 }
 0xce5   :  { %v5107_v26 = vmul.f32 %v4119_v24, %v1758_v21 }
 0xce7   :  { %1769 = vrot.lane.b32.xlu1 %v5107_v26, %s4464_s9 }
 0xd59   :  { %v1770_v46 = vpop.permute.xlu1 %1769 }
 0xd5a   :  { %1772 = vst.msk [vmem:[#allocation3 + $0x30] sm:$0xff] %vm1165_vm1, %v1770_v46  ;;  %3705 = vmatmul.mubr.msk.f32.vlgmr.msra.gmra.mxu1 %vm1069_vm2, %v1770_v46 }
 0xd5b   :  { %3905 = vmatpush3.msra.mxu1 %v5100_v3  ;;  %3912 = vmatprep.mubr.msk.f32.mxu1 %vm1165_vm1, %v1878_v48 }
 0xd5c   :  { %3906 = vmatprep.subr.mxu1 %v1888_v47 }
 0xd5d   :  { %3907 = vmatpush3.msra.mxu1 %v1888_v47  ;;  %v5246_v47 = vld [vmem:[%s5416_s8] ss:$0 sm:$0xff]  ;;  %s4467_s8 = smov 96  }
 0xd5e   :  { %3908 = vmatprep.subr.mxu1 %v1887_v50 }
 0xd5f   :  { %3909 = vmatpush3.msra.mxu1 %v1887_v50 }
 0xd60   :  { %3910 = vmatprep.subr.mxu1 %v1886_v52 }
 0xd61   :  { %3911 = vmatpush3.msra.mxu1 %v1886_v52  ;;  %v1884_v19 = vld [vmem:[#allocation3 + $0x30] sm:$0xff] }
 0xd62   :  { %3913 = vmatmul.mubr.msk.f32.vlgmr.msra.gmra.mxu1 %vm1165_vm1, %v1879_v27  ;;  %3935 = vmatprep.subr.mxu1 %v4463_v5 }
 0xd63   :  { %3915 = vmatprep.mubr.msk.f32.mxu1 %vm1165_vm1, %v1880_v31  ;;  %3936 = vmatpush3.msra.mxu1 %v5159_v62 }
 0xd64   :  { %3937 = vmatprep.subr.mxu1 %v4463_v5 }
 0xd65   :  { %3938 = vmatpush3.msra.mxu1 %v5171_v10 }
 0xd66   :  { %3916 = vmatmul.mubr.msk.f32.gmra.mxu1 %vm1165_vm1, %v1881_v53  ;;  %3939 = vmatprep.subr.mxu1 %v4463_v5 }
 0xd67   :  { %3918 = vmatprep.mubr.msk.f32.mxu1 %vm1165_vm1, %v1882_v54 }
 0xd6a   :  { %3919 = vmatmul.mubr.msk.f32.gmra.mxu1 %vm1165_vm1, %v1883_v55 }
 0xd6b   :  { %3921 = vmatprep.mubr.msk.f32.mxu1 %vm1165_vm1, %v1884_v19 }
 0xe1a   :  { %v1847_v20 = vpop.f32.mrf.mxu1 }
 0xe1b   :  { %v1852_v57 = vadd.f32 %v1847_v20, %v1777_v56 }
 0xe1c   :  { %v1849_v23 = vpop.f32.mrf.mxu1 }
 0xe1d   :  { %4120 = vtanh.f32 %v1852_v57  ;;  %v1853_v25 = vadd.f32 %v1849_v23, %v1778_v22 }
 0xe1f   :  { %4122 = vtanh.f32 %v1853_v25 }
 0xe22   :  { %v3914_v38 = vpop.f32.mrf.mxu1 }
 0xe24   :  { %v2121_v42 = vpop.f32.mrf.mxu1 }
 0xe2a   :  { %v4121_v1 = vpop.eup %4120 }
 0xe2b   :  { %v1856_v2 = vmul.f32 0.5, %v4121_v1 }
 0xe2c   :  { %v4123_v6 = vpop.eup %4122 }
 0xe2d   :  { %v1857_v4 = vadd.f32 0.5, %v1856_v2 }
 0xe2f   :  { %v1861_v8 = vmul.f32 %v4123_v6, %v1857_v4  ;;  %v1860_v9 = vmul.f32 %v1857_v4, %v5104_v11  ;;  %v5180_v11 = vld [vmem:[%s5415_s7 + $0x8] sm:$0xff] }
 0xe30   :  { %3940 = vmatpush3.msra.mxu1 %v5180_v11 }
 0xe31   :  { %1863 = vrot.lane.b32.xlu0 %v1861_v8, %s4464_s9  ;;  %3941 = vmatprep.subr.mxu1 %v4463_v5 }
 0xe32   :  { %3942 = vmatpush3.msra.mxu1 %v5189_v16 }
 0xe33   :  { %3957 = vmatprep.subr.mxu1 %v4463_v5 }
 0xe35   :  { %1773 = vrot.lane.b32.xlu0 %v5107_v26, %s4465_s25 }
 0xe39   :  { %1571 = vrot.lane.b32.xlu0 %v5045_v15, %s4465_s25  ;;  %v1898_v15 = vld [vmem:[#allocation16] sm:$0xff] }
 0xe3d   :  { %1369 = vrot.lane.b32.xlu0 %v4893_v40, %s4465_s25  ;;  %v1899_v40 = vld [vmem:[#allocation16 + $0x8] sm:$0xff] }
 0xe3e   :  { %3888 = vmatprep.subr.mxu0 %v1899_v40 }
 0xe3f   :  { %3889 = vmatpush3.msra.mxu0 %v1899_v40 }
 0xe40   :  { %3890 = vmatprep.subr.mxu0 %v1898_v15 }
 0xe41   :  { %1167 = vrot.lane.b32.xlu0 %v4760_v59, %s4465_s25  ;;  %v1858_v59 = vmul.f32 0.5, %v4123_v6  ;;  %3891 = vmatpush3.msra.mxu0 %v1898_v15  ;;  %v5273_v6 = vpop.f32.mrf.mxu1 }
 0xe42   :  { %3924 = vmatprep.subr.mxu0 %v4463_v5 }
 0xe43   :  { %v1859_v61 = vadd.f32 0.5, %v1858_v59  ;;  %v2131_v8 = vpop.f32.mrf.mxu1 }
 0xea3   :  { %v1864_v12 = vpop.permute.xlu0 %1863 }
 0xea4   :  { %v1866_v14 = vadd.f32 %v1864_v12, %v1860_v9  ;;  %v5275_v9 = vpop.f32.mrf.mxu1 }
 0xea6   :  { %4124 = vtanh.f32 %v1866_v14  ;;  %v5277_v12 = vpop.f32.mrf.mxu1 }
 0xea7   :  { %v1774_v17 = vpop.permute.xlu0 %1773 }
 0xea8   :  { %1776 = vst.msk [vmem:[#allocation4 + $0x8] sm:$0xff] %vm1165_vm1, %v1774_v17 }
 0xeab   :  { %v1572_v0 = vpop.permute.xlu0 %1571 }
 0xeac   :  { %1574 = vst.msk [vmem:[#allocation4 + $0x18] sm:$0xff] %vm1165_vm1, %v1572_v0 }
 0xeaf   :  { %v1370_v60 = vpop.permute.xlu0 %1369  ;;  %v1891_v26 = vld [vmem:[#allocation4 + $0x8] sm:$0xff] }
 0xeb0   :  { %1372 = vst.msk [vmem:[#allocation4 + $0x28] sm:$0xff] %vm1165_vm1, %v1370_v60 }
 0xeb3   :  { %v4125_v63 = vpop.eup %4124  ;;  %v1168_v3 = vpop.permute.xlu0 %1167 }
 0xeb4   :  { %1170 = vst.msk [vmem:[#allocation4 + $0x38] sm:$0xff] %vm1165_vm1, %v1168_v3  ;;  %v5163_v7 = vmul.f32 %v4125_v63, %v1859_v61 }
 0xeb6   :  { %1874 = vrot.lane.b32.xlu1 %v5163_v7, %s4465_s25 }
 0xeb7   :  { %v1895_v32 = vld [vmem:[#allocation4 + $0x28] sm:$0xff] }
 0xeba   :  { %1672 = vrot.lane.b32.xlu1 %v5075_v51, %s4465_s25 }
 0xebb   :  { %v5214_v34 = vld [vmem:[#allocation4 + $0x38] sm:$0xff] }
 0xebe   :  { %1470 = vrot.lane.b32.xlu1 %v4978_v36, %s4465_s25 }
 0xec2   :  { %1268 = vrot.lane.b32.xlu1 %v4817_v49, %s4465_s25  ;;  %v1893_v49 = vld [vmem:[#allocation4 + $0x18] sm:$0xff] }
 0xf28   :  { %v1875_v51 = vpop.permute.xlu1 %1874 }
 0xf29   :  { %1877 = vst.msk [vmem:[#allocation4] sm:$0xff] %vm1165_vm1, %v1875_v51 }
 0xf2c   :  { %v1673_v21 = vpop.permute.xlu1 %1672 }
 0xf2d   :  { %1675 = vst.msk [vmem:[#allocation4 + $0x10] sm:$0xff] %vm1165_vm1, %v1673_v21 }
 0xf30   :  { %v1471_v24 = vpop.permute.xlu1 %1470  ;;  %v1890_v36 = vld [vmem:[#allocation4] sm:$0xff] }
 0xf31   :  { %1473 = vst.msk [vmem:[#allocation4 + $0x20] sm:$0xff] %vm1165_vm1, %v1471_v24  ;;  %3892 = vmatprep.mubr.msk.f32.mxu0 %vm1165_vm1, %v1890_v36 }
 0xf32   :  { %3893 = vmatmul.mubr.msk.f32.vlgmr.msra.gmra.mxu0 %vm1165_vm1, %v1891_v26 }
 0xf33   :  { %3925 = vmatpush3.msra.mxu0 %v5159_v62 }
 0xf34   :  { %v1269_v28 = vpop.permute.xlu1 %1268  ;;  %v1892_v29 = vld [vmem:[#allocation4 + $0x10] sm:$0xff]  ;;  %3926 = vmatprep.subr.mxu0 %v4463_v5 }
 0xf35   :  { %1271 = vst.msk [vmem:[#allocation4 + $0x30] sm:$0xff] %vm1165_vm1, %v1269_v28  ;;  %3895 = vmatprep.mubr.msk.f32.mxu0 %vm1165_vm1, %v1892_v29  ;;  %3927 = vmatpush3.msra.mxu0 %v5171_v10 }
 0xf36   :  { %3896 = vmatmul.mubr.msk.f32.gmra.mxu0 %vm1165_vm1, %v1893_v49  ;;  %3928 = vmatprep.subr.mxu0 %v4463_v5 }
 0xf37   :  { %3929 = vmatpush3.msra.mxu0 %v5180_v11 }
 0xf38   :  { %v1894_v30 = vld [vmem:[#allocation4 + $0x20] sm:$0xff]  ;;  %3930 = vmatprep.subr.mxu0 %v4463_v5 }
 0xf39   :  { %3898 = vmatprep.mubr.msk.f32.mxu0 %vm1165_vm1, %v1894_v30  ;;  %3931 = vmatpush3.msra.mxu0 %v5189_v16 }
 0xf3a   :  { %3899 = vmatmul.mubr.msk.f32.gmra.mxu0 %vm1165_vm1, %v1895_v32  ;;  %3946 = vmatprep.subr.mxu0 %v4463_v5 }
 0xf3c   :  { %v1896_v33 = vld [vmem:[#allocation4 + $0x30] sm:$0xff] }
 0xf3d   :  { %3901 = vmatprep.mubr.msk.f32.mxu0 %vm1165_vm1, %v1896_v33 }
 0xf3e   :  { %3902 = vmatmul.mubr.msk.f32.gmra.mxu0 %vm1165_vm1, %v5214_v34 }
 0xf3f   :  { %3932 = vmatprep.mubr.msk.f32.mxu0 %vm4466_vm3, %v4463_v5 }
 0xf42   :  { %3933 = vmatmul.mubr.f32.vlgmr.msra.gmra.mxu0 %v4463_v5 }
 0xf43   :  { %3947 = vmatpush3.msra.mxu0 %v5159_v62  ;;  %3954 = vmatprep.mubr.msk.f32.mxu0 %vm4466_vm3, %v4463_v5 }
 0xf44   :  { %3948 = vmatprep.subr.mxu0 %v4463_v5 }
 0xf45   :  { %3949 = vmatpush3.msra.mxu0 %v5171_v10 }
 0xf46   :  { %3950 = vmatprep.subr.mxu0 %v4463_v5 }
 0xf47   :  { %3951 = vmatpush3.msra.mxu0 %v5180_v11 }
 0xf48   :  { %3952 = vmatprep.subr.mxu0 %v4463_v5 }
 0xf49   :  { %3953 = vmatpush3.msra.mxu0 %v5189_v16 }
 0xf4a   :  { %3968 = vmatprep.subr.mxu0 %v4463_v5 }
 0xff2   :  { %v3894_v35 = vpop.f32.mrf.mxu0 }
 0xff3   :  { %v2127_v17 = vadd.f32 %v3914_v38, %v3894_v35 }
 0xff4   :  { %v1992_v13 = vpop.f32.mrf.mxu0 }
 0xff5   :  { %v2122_v44 = vadd.f32 %v2121_v42, %v1992_v13  ;;  %v2168_v58 = vadd.f32 %v5246_v47, %v2127_v17 }
 0xff6   :  { %v5231_v37 = vpop.f32.mrf.mxu0 }
 0xff7   :  { %v2167_v48 = vadd.f32 %v5246_v47, %v2122_v44 }
 0xff8   :  { %v5233_v39 = vpop.f32.mrf.mxu0 }
 0xff9   :  { %v2132_v29 = vadd.f32 %v2131_v8, %v5233_v39 }
 0xffa   :  { %v5235_v41 = vpop.f32.mrf.mxu0 }
 0xffb   :  { %v2169_v49 = vadd.f32 %v5246_v47, %v2132_v29 }
 0xffc   :  { %v5237_v43 = vpop.f32.mrf.mxu0 }
 0xffe   :  { %v5239_v45 = vpop.f32.mrf.mxu0 }
0x1000   :  { %v5241_v46 = vpop.f32.mrf.mxu0 }
0x1002   :  { %v2256_v50 = vpop.f32.mrf.mxu0 }
0x1003   :  { %v2260_v52 = vadd.f32 %v2256_v50, %v2167_v48 }
0x1004   :  { %v3934_v27 = vpop.f32.mrf.mxu0 }
0x1005   :  { %4126 = vtanh.f32 %v2260_v52 }
0x1012   :  { %v4127_v31 = vpop.eup %4126 }
0x1013   :  { %2266 = vrot.lane.b32.xlu1 %v4127_v31, %s4464_s9  ;;  %v2262_v53 = vmul.f32 0.5, %v4127_v31 }
0x1015   :  { %v2263_v54 = vadd.f32 0.5, %v2262_v53 }
0x1017   :  { %v2264_v56 = vmul.f32 0.0, %v2263_v54 }
0x1085   :  { %v2267_v55 = vpop.permute.xlu1 %2266 }
0x1086   :  { %v2269_v19 = vmul.f32 %v2267_v55, %v2263_v54 }
0x1088   :  { %2271 = vrot.lane.b32.xlu0 %v2269_v19, %s4465_s25 }
0x108c   :  { %1870 = vrot.lane.b32.xlu0 %v5163_v7, %s4464_s9 }
0x10fa   :  { %v2272_v20 = vpop.permute.xlu0 %2271 }
0x10fb   :  { %v2274_v22 = vadd.f32 %v2272_v20, %v2264_v56 }
0x10fd   :  { %4128 = vtanh.f32 %v2274_v22 }
0x10fe   :  { %v1871_v57 = vpop.permute.xlu0 %1870 }
0x10ff   :  { %1873 = vst.msk [vmem:[#allocation3 + $0x38] sm:$0xff] %vm1165_vm1, %v1871_v57 }
0x1106   :  { %v5254_v23 = vld [vmem:[#allocation3 + $0x38] sm:$0xff] }
0x1107   :  { %3922 = vmatmul.mubr.msk.f32.gmra.mxu1 %vm1165_vm1, %v5254_v23 }
0x1108   :  { %3943 = vmatprep.mubr.msk.f32.mxu1 %vm4466_vm3, %v4463_v5 }
0x110a   :  { %v4129_v25 = vpop.eup %4128 }
0x110b   :  { %2277 = vrot.lane.b32.xlu1 %v4129_v25, %s4464_s9 }
0x117d   :  { %v2278_v1 = vpop.permute.xlu1 %2277 }
0x117e   :  { %v2280_v2 = vmul.f32 %v2278_v1, %v2263_v54  ;;  %v2137_v54 = vadd.f32 %v5273_v6, %v5231_v37 }
0x1180   :  { %2283 = vrot.lane.b32.xlu1 %v2280_v2, %s4465_s25  ;;  %v2170_v55 = vadd.f32 %v5246_v47, %v2137_v54 }
0x11c7   :  { %v5279_v14 = vpop.f32.mrf.mxu1 }
0x11c9   :  { %v5281_v18 = vpop.f32.mrf.mxu1 }
0x11f2   :  { %v2284_v4 = vpop.permute.xlu1 %2283 }
0x11f3   :  { %3944 = vmatmul.mubr.msk.f32.vlgmr.msra.gmra.mxu1 %vm1165_vm1, %v2284_v4 }
0x11f4   :  { %3958 = vmatpush3.msra.mxu1 %v5159_v62  ;;  %3965 = vmatprep.mubr.msk.f32.mxu1 %vm4466_vm3, %v4463_v5 }
0x11f5   :  { %3959 = vmatprep.subr.mxu1 %v4463_v5 }
0x11f6   :  { %3960 = vmatpush3.msra.mxu1 %v5171_v10 }
0x11f7   :  { %3961 = vmatprep.subr.mxu1 %v4463_v5 }
0x11f8   :  { %3962 = vmatpush3.msra.mxu1 %v5180_v11 }
0x11f9   :  { %3963 = vmatprep.subr.mxu1 %v4463_v5 }
0x11fa   :  { %3964 = vmatpush3.msra.mxu1 %v5189_v16 }
0x11fb   :  { %3979 = vmatprep.subr.mxu1 %v4463_v5 }
0x12b3   :  { %v2353_v0 = vpop.f32.mrf.mxu1 }
0x12b4   :  { %v2357_v40 = vadd.f32 %v2353_v0, %v2168_v58 }
0x12b5   :  { %v3945_v15 = vpop.f32.mrf.mxu1 }
0x12b6   :  { %4130 = vtanh.f32 %v2357_v40  ;;  %v2142_v40 = vadd.f32 %v5277_v12, %v5237_v43 }
0x12b8   :  { %v2171_v15 = vadd.f32 %v5246_v47, %v2142_v40  ;;  %v2963_v40 = vld [vmem:[#allocation18 + $0x8] sm:$0xff] }
0x12c3   :  { %v4131_v59 = vpop.eup %4130 }
0x12c4   :  { %2363 = vrot.lane.b32.xlu0 %v4131_v59, %s4464_s9  ;;  %v2359_v60 = vmul.f32 0.5, %v4131_v59 }
0x12c6   :  { %v2360_v61 = vadd.f32 0.5, %v2359_v60 }
0x12c8   :  { %v2361_v7 = vmul.f32 %v2360_v61, %v2274_v22 }
0x1336   :  { %v2364_v63 = vpop.permute.xlu0 %2363 }
0x1337   :  { %v2366_v3 = vmul.f32 %v2364_v63, %v2360_v61 }
0x1339   :  { %2368 = vrot.lane.b32.xlu1 %v2366_v3, %s4465_s25 }
0x13ab   :  { %v2369_v51 = vpop.permute.xlu1 %2368 }
0x13ac   :  { %v2371_v21 = vadd.f32 %v2369_v51, %v2361_v7 }
0x13ae   :  { %4132 = vtanh.f32 %v2371_v21 }
0x13bb   :  { %v4133_v24 = vpop.eup %4132 }
0x13bc   :  { %2374 = vrot.lane.b32.xlu0 %v4133_v24, %s4464_s9 }
0x142e   :  { %v2375_v36 = vpop.permute.xlu0 %2374 }
0x142f   :  { %v2377_v26 = vmul.f32 %v2375_v36, %v2360_v61 }
0x1431   :  { %2380 = vrot.lane.b32.xlu1 %v2377_v26, %s4465_s25 }
0x14a3   :  { %v2381_v28 = vpop.permute.xlu1 %2380 }
0x14a4   :  { %3955 = vmatmul.mubr.msk.f32.vlgmr.msra.gmra.mxu0 %vm1165_vm1, %v2381_v28 }
0x14a5   :  { %3969 = vmatpush3.msra.mxu0 %v5159_v62  ;;  %3976 = vmatprep.mubr.msk.f32.mxu0 %vm4466_vm3, %v4463_v5 }
0x14a6   :  { %3970 = vmatprep.subr.mxu0 %v4463_v5 }
0x14a7   :  { %3971 = vmatpush3.msra.mxu0 %v5171_v10 }
0x14a8   :  { %3972 = vmatprep.subr.mxu0 %v4463_v5 }
0x14a9   :  { %3973 = vmatpush3.msra.mxu0 %v5180_v11 }
0x14aa   :  { %3974 = vmatprep.subr.mxu0 %v4463_v5 }
0x14ab   :  { %3975 = vmatpush3.msra.mxu0 %v5189_v16 }
0x14ac   :  { %3990 = vmatprep.subr.mxu0 %v4463_v5 }
0x1564   :  { %v2450_v30 = vpop.f32.mrf.mxu0 }
0x1565   :  { %v2454_v32 = vadd.f32 %v2450_v30, %v2169_v49 }
0x1566   :  { %v3956_v33 = vpop.f32.mrf.mxu0 }
0x1567   :  { %4134 = vtanh.f32 %v2454_v32 }
0x1574   :  { %v4135_v35 = vpop.eup %4134 }
0x1575   :  { %2460 = vrot.lane.b32.xlu0 %v4135_v35, %s4464_s9  ;;  %v2456_v13 = vmul.f32 0.5, %v4135_v35 }
0x1577   :  { %v2457_v38 = vadd.f32 0.5, %v2456_v13 }
0x1579   :  { %v2458_v48 = vmul.f32 %v2457_v38, %v2371_v21 }
0x15e7   :  { %v2461_v42 = vpop.permute.xlu0 %2460 }
0x15e8   :  { %v2463_v44 = vmul.f32 %v2461_v42, %v2457_v38 }
0x15ea   :  { %2465 = vrot.lane.b32.xlu1 %v2463_v44, %s4465_s25 }
0x165c   :  { %v2466_v50 = vpop.permute.xlu1 %2465 }
0x165d   :  { %v2468_v52 = vadd.f32 %v2466_v50, %v2458_v48  ;;  %v2969_v50 = vld [vmem:[#allocation19 + $0x18] sm:$0xff] }
0x165f   :  { %4136 = vtanh.f32 %v2468_v52 }
0x166c   :  { %v4137_v39 = vpop.eup %4136 }
0x166d   :  { %2471 = vrot.lane.b32.xlu0 %v4137_v39, %s4464_s9  ;;  %v2968_v39 = vld [vmem:[#allocation19 + $0x10] sm:$0xff] }
0x16df   :  { %v2472_v27 = vpop.permute.xlu0 %2471 }
0x16e0   :  { %v2474_v31 = vmul.f32 %v2472_v27, %v2457_v38  ;;  %v2967_v27 = vld [vmem:[#allocation19 + $0x8] sm:$0xff] }
0x16e2   :  { %2477 = vrot.lane.b32.xlu1 %v2474_v31, %s4465_s25  ;;  %v2966_v31 = vld [vmem:[#allocation19] sm:$0xff] }
0x1754   :  { %v2478_v53 = vpop.permute.xlu1 %2477 }
0x1755   :  { %3966 = vmatmul.mubr.msk.f32.vlgmr.msra.gmra.mxu1 %vm1165_vm1, %v2478_v53  ;;  %v2152_v53 = vadd.f32 %v5281_v18, %v5241_v46 }
0x1756   :  { %3980 = vmatpush3.msra.mxu1 %v5159_v62  ;;  %3987 = vmatprep.mubr.msk.f32.mxu1 %vm4466_vm3, %v4463_v5 }
0x1757   :  { %3981 = vmatprep.subr.mxu1 %v4463_v5  ;;  %v2173_v54 = vadd.f32 %v5246_v47, %v2152_v53 }
0x1758   :  { %3982 = vmatpush3.msra.mxu1 %v5171_v10 }
0x1759   :  { %3983 = vmatprep.subr.mxu1 %v4463_v5 }
0x175a   :  { %3984 = vmatpush3.msra.mxu1 %v5180_v11 }
0x175b   :  { %3985 = vmatprep.subr.mxu1 %v4463_v5 }
0x175c   :  { %3986 = vmatpush3.msra.mxu1 %v5189_v16 }
0x175d   :  { %4001 = vmatprep.subr.mxu1 %v4463_v5 }
0x1815   :  { %v2547_v19 = vpop.f32.mrf.mxu1 }
0x1816   :  { %v2551_v56 = vadd.f32 %v2547_v19, %v2170_v55 }
0x1817   :  { %v3967_v20 = vpop.f32.mrf.mxu1 }
0x1818   :  { %4138 = vtanh.f32 %v2551_v56 }
0x1825   :  { %v4139_v22 = vpop.eup %4138 }
0x1826   :  { %2557 = vrot.lane.b32.xlu0 %v4139_v22, %s4464_s9  ;;  %v2553_v57 = vmul.f32 0.5, %v4139_v22 }
0x1828   :  { %v2554_v25 = vadd.f32 0.5, %v2553_v57 }
0x182a   :  { %v2555_v4 = vmul.f32 %v2554_v25, %v2468_v52 }
0x1898   :  { %v2558_v1 = vpop.permute.xlu0 %2557 }
0x1899   :  { %v2560_v2 = vmul.f32 %v2558_v1, %v2554_v25 }
0x189b   :  { %2562 = vrot.lane.b32.xlu1 %v2560_v2, %s4465_s25 }
0x190d   :  { %v2563_v8 = vpop.permute.xlu1 %2562 }
0x190e   :  { %v2565_v17 = vadd.f32 %v2563_v8, %v2555_v4 }
0x1910   :  { %4140 = vtanh.f32 %v2565_v17 }
0x191d   :  { %v4141_v37 = vpop.eup %4140 }
0x191e   :  { %2568 = vrot.lane.b32.xlu0 %v4141_v37, %s4464_s9 }
0x1990   :  { %v2569_v6 = vpop.permute.xlu0 %2568 }
0x1991   :  { %v2571_v58 = vmul.f32 %v2569_v6, %v2554_v25  ;;  %v2965_v6 = vld [vmem:[#allocation18 + $0x18] sm:$0xff] }
0x1993   :  { %2574 = vrot.lane.b32.xlu1 %v2571_v58, %s4465_s25 }
0x1a05   :  { %v2575_v0 = vpop.permute.xlu1 %2574 }
0x1a06   :  { %3977 = vmatmul.mubr.msk.f32.vlgmr.msra.gmra.mxu0 %vm1165_vm1, %v2575_v0  ;;  %v2964_v0 = vld [vmem:[#allocation18 + $0x10] sm:$0xff] }
0x1a07   :  { %3991 = vmatpush3.msra.mxu0 %v5159_v62  ;;  %3998 = vmatprep.mubr.msk.f32.mxu0 %vm4466_vm3, %v4463_v5 }
0x1a08   :  { %3992 = vmatprep.subr.mxu0 %v4463_v5 }
0x1a09   :  { %3993 = vmatpush3.msra.mxu0 %v5171_v10 }
0x1a0a   :  { %3994 = vmatprep.subr.mxu0 %v4463_v5 }
0x1a0b   :  { %3995 = vmatpush3.msra.mxu0 %v5180_v11 }
0x1a0c   :  { %3996 = vmatprep.subr.mxu0 %v4463_v5 }
0x1a0d   :  { %3997 = vmatpush3.msra.mxu0 %v5189_v16 }
0x1a0e   :  { %4012 = vmatprep.subr.mxu0 %v4463_v5 }
0x1ac6   :  { %v2644_v59 = vpop.f32.mrf.mxu0 }
0x1ac7   :  { %v2648_v60 = vadd.f32 %v2644_v59, %v2171_v15  ;;  %v2962_v15 = vld [vmem:[#allocation18] sm:$0xff]  ;;  %v2157_v59 = vadd.f32 %v5279_v14, %v5239_v45 }
0x1ac8   :  { %v3978_v61 = vpop.f32.mrf.mxu0 }
0x1ac9   :  { %4142 = vtanh.f32 %v2648_v60  ;;  %v2174_v60 = vadd.f32 %v5246_v47, %v2157_v59 }
0x1ad6   :  { %v4143_v63 = vpop.eup %4142 }
0x1ad7   :  { %2654 = vrot.lane.b32.xlu0 %v4143_v63, %s4464_s9  ;;  %v2650_v3 = vmul.f32 0.5, %v4143_v63 }
0x1ad9   :  { %v2651_v7 = vadd.f32 0.5, %v2650_v3 }
0x1adb   :  { %v2652_v24 = vmul.f32 %v2651_v7, %v2565_v17 }
0x1b49   :  { %v2655_v51 = vpop.permute.xlu0 %2654 }
0x1b4a   :  { %v2657_v21 = vmul.f32 %v2655_v51, %v2651_v7  ;;  %v3732_v51 = vld [vmem:[#allocation21] ss:$0 sm:$0xff] }
0x1b4c   :  { %2659 = vrot.lane.b32.xlu1 %v2657_v21, %s4465_s25 }
0x1bbe   :  { %v2660_v36 = vpop.permute.xlu1 %2659 }
0x1bbf   :  { %v2662_v26 = vadd.f32 %v2660_v36, %v2652_v24 }
0x1bc1   :  { %4144 = vtanh.f32 %v2662_v26 }
0x1bce   :  { %v4145_v43 = vpop.eup %4144 }
0x1bcf   :  { %2665 = vrot.lane.b32.xlu0 %v4145_v43, %s4464_s9 }
0x1c41   :  { %v2666_v12 = vpop.permute.xlu0 %2665 }
0x1c42   :  { %v2668_v28 = vmul.f32 %v2666_v12, %v2651_v7 }
0x1c44   :  { %2671 = vrot.lane.b32.xlu1 %v2668_v28, %s4465_s25 }
0x1cb6   :  { %v2672_v29 = vpop.permute.xlu1 %2671 }
0x1cb7   :  { %3988 = vmatmul.mubr.msk.f32.vlgmr.msra.gmra.mxu1 %vm1165_vm1, %v2672_v29 }
0x1cb8   :  { %4002 = vmatpush3.msra.mxu1 %v5159_v62  ;;  %4009 = vmatprep.mubr.msk.f32.mxu1 %vm4466_vm3, %v4463_v5  ;;  %v2147_v62 = vadd.f32 %v5275_v9, %v5235_v41 }
0x1cb9   :  { %4003 = vmatprep.subr.mxu1 %v4463_v5 }
0x1cba   :  { %4004 = vmatpush3.msra.mxu1 %v5171_v10  ;;  %v2172_v49 = vadd.f32 %v5246_v47, %v2147_v62 }
0x1cbb   :  { %4005 = vmatprep.subr.mxu1 %v4463_v5 }
0x1cbc   :  { %4006 = vmatpush3.msra.mxu1 %v5180_v11 }
0x1cbd   :  { %4007 = vmatprep.subr.mxu1 %v4463_v5 }
0x1cbe   :  { %4008 = vmatpush3.msra.mxu1 %v5189_v16 }
0x1cbf   :  { %4023 = vmatprep.subr.mxu1 %v4463_v5 }
0x1d77   :  { %v2741_v30 = vpop.f32.mrf.mxu1 }
0x1d78   :  { %v2745_v32 = vadd.f32 %v2741_v30, %v2172_v49 }
0x1d79   :  { %v3989_v33 = vpop.f32.mrf.mxu1 }
0x1d7a   :  { %4146 = vtanh.f32 %v2745_v32 }
0x1d87   :  { %v4147_v10 = vpop.eup %4146 }
0x1d88   :  { %2751 = vrot.lane.b32.xlu0 %v4147_v10, %s4464_s9  ;;  %v2747_v35 = vmul.f32 0.5, %v4147_v10  ;;  %v3145_v10 = vld [vmem:[#allocation24 + $0x18] sm:$0xff] }
0x1d8a   :  { %v2748_v11 = vadd.f32 0.5, %v2747_v35  ;;  %v3144_v35 = vld [vmem:[#allocation24 + $0x10] sm:$0xff] }
0x1d8c   :  { %v2749_v16 = vmul.f32 %v2748_v11, %v2662_v26 }
0x1dfa   :  { %v2752_v13 = vpop.permute.xlu0 %2751 }
0x1dfb   :  { %v2754_v38 = vmul.f32 %v2752_v13, %v2748_v11  ;;  %v3142_v13 = vld [vmem:[#allocation24] sm:$0xff] }
0x1dfd   :  { %2756 = vrot.lane.b32.xlu1 %v2754_v38, %s4465_s25  ;;  %v3141_v38 = vld [vmem:[#allocation22 + $0x18] sm:$0xff] }
0x1e6f   :  { %v2757_v42 = vpop.permute.xlu1 %2756 }
0x1e70   :  { %v2759_v44 = vadd.f32 %v2757_v42, %v2749_v16  ;;  %v3140_v16 = vld [vmem:[#allocation22 + $0x10] sm:$0xff] }
0x1e72   :  { %4148 = vtanh.f32 %v2759_v44 }
0x1e7f   :  { %v4149_v41 = vpop.eup %4148 }
0x1e80   :  { %2762 = vrot.lane.b32.xlu0 %v4149_v41, %s4464_s9  ;;  %v3138_v41 = vld [vmem:[#allocation22] sm:$0xff] }
0x1ef2   :  { %v2763_v9 = vpop.permute.xlu0 %2762 }
0x1ef3   :  { %v2765_v48 = vmul.f32 %v2763_v9, %v2748_v11  ;;  %v3143_v11 = vld [vmem:[#allocation24 + $0x8] sm:$0xff] }
0x1ef5   :  { %2768 = vrot.lane.b32.xlu1 %v2765_v48, %s4465_s25 }
0x1f67   :  { %v2769_v52 = vpop.permute.xlu1 %2768 }
0x1f68   :  { %3999 = vmatmul.mubr.msk.f32.vlgmr.msra.gmra.mxu0 %vm1165_vm1, %v2769_v52 }
0x1f69   :  { %4013 = vmatpush3.msra.mxu0 %v2969_v50  ;;  %4020 = vmatprep.mubr.msk.f32.mxu0 %vm4466_vm3, %v4463_v5 }
0x1f6a   :  { %4014 = vmatprep.subr.mxu0 %v4463_v5 }
0x1f6b   :  { %4015 = vmatpush3.msra.mxu0 %v2968_v39 }
0x1f6c   :  { %4016 = vmatprep.subr.mxu0 %v4463_v5 }
0x1f6d   :  { %4017 = vmatpush3.msra.mxu0 %v2967_v27 }
0x1f6e   :  { %4018 = vmatprep.subr.mxu0 %v4463_v5 }
0x1f6f   :  { %4019 = vmatpush3.msra.mxu0 %v2966_v31 }
0x1f70   :  { %4021 = vmatmul.mubr.msk.f32.vlgmr.msra.gmra.mxu0 %vm1165_vm1, %v5214_v34  ;;  %4034 = vmatprep.subr.mxu0 %v4463_v5 }
0x1f71   :  { %4042 = vmatprep.mubr.msk.f32.mxu0 %vm4466_vm3, %v4463_v5  ;;  %4035 = vmatpush3.msra.mxu0 %v3145_v10 }
0x1f72   :  { %4036 = vmatprep.subr.mxu0 %v4463_v5 }
0x1f73   :  { %4037 = vmatpush3.msra.mxu0 %v3144_v35 }
0x1f74   :  { %4038 = vmatprep.subr.mxu0 %v4463_v5 }
0x1f75   :  { %4039 = vmatpush3.msra.mxu0 %v3143_v11 }
0x1f76   :  { %4040 = vmatprep.subr.mxu0 %v4463_v5 }
0x1f77   :  { %4041 = vmatpush3.msra.mxu0 %v3142_v13 }
0x2028   :  { %v2838_v55 = vpop.f32.mrf.mxu0 }
0x2029   :  { %v2842_v19 = vadd.f32 %v2838_v55, %v2173_v54  ;;  %v3735_v55 = vld [vmem:[#allocation25] ss:$0 sm:$0xff] }
0x202a   :  { %v4000_v56 = vpop.f32.mrf.mxu0 }
0x202b   :  { %4150 = vtanh.f32 %v2842_v19 }
0x2030   :  { %v3039_v20 = vpop.f32.mrf.mxu0 }
0x2032   :  { %v4022_v22 = vpop.f32.mrf.mxu0 }
0x2038   :  { %v4151_v57 = vpop.eup %4150 }
0x2039   :  { %2848 = vrot.lane.b32.xlu0 %v4151_v57, %s4464_s9  ;;  %v2844_v34 = vmul.f32 0.5, %v4151_v57 }
0x203b   :  { %v2845_v25 = vadd.f32 0.5, %v2844_v34 }
0x203d   :  { %v2846_v4 = vmul.f32 %v2845_v25, %v2759_v44  ;;  %v3139_v44 = vld [vmem:[#allocation22 + $0x8] sm:$0xff] }
0x20ab   :  { %v2849_v1 = vpop.permute.xlu0 %2848 }
0x20ac   :  { %v2851_v2 = vmul.f32 %v2849_v1, %v2845_v25 }
0x20ae   :  { %2853 = vrot.lane.b32.xlu1 %v2851_v2, %s4465_s25 }
0x2120   :  { %v2854_v8 = vpop.permute.xlu1 %2853 }
0x2121   :  { %v2856_v46 = vadd.f32 %v2854_v8, %v2846_v4 }
0x2123   :  { %4152 = vtanh.f32 %v2856_v46 }
0x2130   :  { %v4153_v18 = vpop.eup %4152 }
0x2131   :  { %2859 = vrot.lane.b32.xlu0 %v4153_v18, %s4464_s9 }
0x21a3   :  { %v2860_v17 = vpop.permute.xlu0 %2859 }
0x21a4   :  { %v2862_v37 = vmul.f32 %v2860_v17, %v2845_v25 }
0x21a6   :  { %2865 = vrot.lane.b32.xlu1 %v2862_v37, %s4465_s25 }
0x2218   :  { %v2866_v58 = vpop.permute.xlu1 %2865 }
0x2219   :  { %4010 = vmatmul.mubr.msk.f32.vlgmr.msra.gmra.mxu1 %vm1165_vm1, %v2866_v58 }
0x221a   :  { %4024 = vmatpush3.msra.mxu1 %v2965_v6  ;;  %4031 = vmatprep.mubr.msk.f32.mxu1 %vm4466_vm3, %v4463_v5 }
0x221b   :  { %4025 = vmatprep.subr.mxu1 %v4463_v5 }
0x221c   :  { %4026 = vmatpush3.msra.mxu1 %v2964_v0 }
0x221d   :  { %4027 = vmatprep.subr.mxu1 %v4463_v5 }
0x221e   :  { %4028 = vmatpush3.msra.mxu1 %v2963_v40 }
0x221f   :  { %4029 = vmatprep.subr.mxu1 %v4463_v5 }
0x2220   :  { %4030 = vmatpush3.msra.mxu1 %v2962_v15 }
0x2221   :  { %4032 = vmatmul.mubr.msk.f32.vlgmr.msra.gmra.mxu1 %vm1165_vm1, %v5254_v23  ;;  %4045 = vmatprep.subr.mxu1 %v4463_v5 }
0x2222   :  { %4053 = vmatprep.mubr.msk.f32.mxu1 %vm4466_vm3, %v4463_v5  ;;  %4046 = vmatpush3.msra.mxu1 %v3141_v38 }
0x2223   :  { %4047 = vmatprep.subr.mxu1 %v4463_v5 }
0x2224   :  { %4048 = vmatpush3.msra.mxu1 %v3140_v16 }
0x2225   :  { %4049 = vmatprep.subr.mxu1 %v4463_v5 }
0x2226   :  { %4050 = vmatpush3.msra.mxu1 %v3139_v44 }
0x2227   :  { %4051 = vmatprep.subr.mxu1 %v4463_v5 }
0x2228   :  { %4052 = vmatpush3.msra.mxu1 %v3138_v41 }
0x22d9   :  { %v2935_v61 = vpop.f32.mrf.mxu1 }
0x22da   :  { %v2939_v63 = vadd.f32 %v2935_v61, %v2174_v60 }
0x22db   :  { %v4011_v3 = vpop.f32.mrf.mxu1 }
0x22dc   :  { %4154 = vtanh.f32 %v2939_v63 }
0x22e1   :  { %v3112_v7 = vpop.f32.mrf.mxu1 }
0x22e2   :  { %v3113_v21 = vadd.f32 %v3112_v7, %v3039_v20 }
0x22e3   :  { %v4033_v24 = vpop.f32.mrf.mxu1 }
0x22e4   :  { %v3123_v36 = vadd.f32 %v3732_v51, %v3113_v21 }
0x22e6   :  { %4156 = vtanh.f32 %v3123_v36 }
0x22e9   :  { %v4155_v23 = vpop.eup %4154 }
0x22ea   :  { %2945 = vrot.lane.b32.xlu0 %v4155_v23, %s4464_s9  ;;  %v2941_v43 = vmul.f32 0.5, %v4155_v23 }
0x22ec   :  { %v2942_v45 = vadd.f32 0.5, %v2941_v43 }
0x22ee   :  { %v2943_v30 = vmul.f32 %v2942_v45, %v2856_v46 }
0x22f3   :  { %v4157_v26 = vpop.eup %4156 }
0x22f4   :  { %3128 = vrot.lane.b32.xlu0 %v4157_v26, %s4464_s9  ;;  %v3125_v12 = vmul.f32 0.5, %v4157_v26 }
0x22f6   :  { %v3126_v28 = vadd.f32 0.5, %v3125_v12 }
0x235c   :  { %v2946_v14 = vpop.permute.xlu0 %2945 }
0x235d   :  { %v2948_v47 = vmul.f32 %v2946_v14, %v2942_v45 }
0x235f   :  { %2950 = vrot.lane.b32.xlu1 %v2948_v47, %s4465_s25 }
0x2366   :  { %v3129_v29 = vpop.permute.xlu0 %3128 }
0x2367   :  { %v3131_v62 = vmul.f32 %v3129_v29, %v3126_v28 }
0x2369   :  { %4158 = vtanh.f32 %v3131_v62 }
0x2376   :  { %v4159_v49 = vpop.eup %4158 }
0x2377   :  { %3134 = vrot.lane.b32.xlu0 %v4159_v49, %s4467_s8 }
0x23d1   :  { %v2951_v32 = vpop.permute.xlu1 %2950 }
0x23d2   :  { %v2953_v33 = vadd.f32 %v2951_v32, %v2943_v30 }
0x23d4   :  { %4160 = vtanh.f32 %v2953_v33 }
0x23e1   :  { %v4161_v42 = vpop.eup %4160 }
0x23e2   :  { %2956 = vrot.lane.b32.xlu1 %v4161_v42, %s4464_s9 }
0x23e9   :  { %v3135_v9 = vpop.permute.xlu0 %3134 }
0x23ea   :  { %v3137_v48 = vmul.f32 %v3135_v9, %v3126_v28 }
0x23ec   :  { %3147 = vrot.lane.b32.xlu1 %v3137_v48, %s4465_s25 }
0x2454   :  { %v2957_v50 = vpop.permute.xlu1 %2956 }
0x2455   :  { %v2959_v52 = vmul.f32 %v2957_v50, %v2942_v45 }
0x2457   :  { %3222 = vrot.lane.b32.xlu0 %v2959_v52, %s4465_s25 }
0x245e   :  { %v3148_v39 = vpop.permute.xlu1 %3147 }
0x245f   :  { %4043 = vmatmul.mubr.msk.f32.vlgmr.msra.gmra.mxu0 %vm1165_vm1, %v3148_v39 }
0x24c9   :  { %v3223_v27 = vpop.permute.xlu0 %3222 }
0x24ca   :  { %4054 = vmatmul.mubr.msk.f32.vlgmr.msra.gmra.mxu1 %vm1165_vm1, %v3223_v27 }
0x251f   :  { %v3217_v31 = vpop.f32.mrf.mxu0 }
0x2521   :  { %v4044_v53 = vpop.f32.mrf.mxu0 }
0x258a   :  { %v3292_v54 = vpop.f32.mrf.mxu1 }
0x258b   :  { %v3293_v5 = vadd.f32 %v3292_v54, %v3217_v31 }
0x258c   :  { %v4055_v19 = vpop.f32.mrf.mxu1 }
0x258d   :  { %v3303_v56 = vadd.f32 %v3735_v55, %v3293_v5 }
0x258f   :  { %3304 = vst [vmem:[%s5423_s15] sm:$0xff] %v3303_v56 }
0x2590   :  { %3309 = vsyncpa [#allocation7], 1 }
0x2591   :  { %3310 = vsyncpa [#allocation11], 1 }
0x2592   :  { %3311 = vsyncpa [#allocation14], 1 }
0x2593   :  { %3312 = vsyncpa [#allocation17], 1 }
0x2594   :  { %3313 = vsyncpa [#allocation20], 1 }
0x2595   :  { %3314 = vsyncpa [#allocation23], 1 }
0x2596   :  { %3315 = vsyncpa [#allocation26], 1 }
0x2597   :  { %3316 = vsyncpa [#allocation8], 1 }

</bundles_post_ra>
